<compile_context>
chip_gen: v7x
topology: tpu7x:2x2x1
jax: 0.10.0
libtpu: 0.0.40
codegen_flags: <defaults>
</compile_context>

<pallas_src>
import math

import jax
import jax.numpy as jnp
from jax import lax
from jax.experimental import pallas as pl
from jax.experimental.pallas import tpu as pltpu

# Scaled-down config consistent with ATPConfig's structure.
N_LAYERS = 2
N_HEADS = 4
D_MODEL = 32
D_FF = 32
D_INPUT = 64
LN_EPS = 1e-5                       # nn.LayerNorm default

# ---- packed parameter slab layout (single (SLAB_ROWS, 128) f32 array) ----
SLAB_W = 128                        # lane-aligned width
EMB_ROWS = D_INPUT                  # rows [0, 64): embedding weight (pre-scaled)
LAYER_W_ROWS = 4 * D_MODEL          # per layer: wqkv(32) | wo(32) | w1(32) | w2(32)
W_ROWS = EMB_ROWS + N_LAYERS * LAYER_W_ROWS          # 320
VEC_HDR = 4                         # b_emb, mod, wl, bl
VEC_PER_LAYER = 8                   # bqkv, bo, b1, b2, ln1g, ln1b, ln2g, ln2b
VEC_ROWS = VEC_HDR + N_LAYERS * VEC_PER_LAYER        # 20
SLAB_ROWS = ((W_ROWS + VEC_ROWS + 7) // 8) * 8       # 344 (sublane aligned)

BATCH_BLOCK_CAP = 256               # per-grid-step batch rows (VMEM-safe on v7x)


def atp_kernel(x_ref, slab_ref, out_ref):
    B, L, Din = x_ref.shape
    BL = B * L
    dh = D_MODEL // N_HEADS

    x = x_ref[...].reshape(BL, Din)                      # (B*L, D_in)

    vb = W_ROWS
    b_emb = slab_ref[vb + 0:vb + 1, 0:D_MODEL]           # (1, 32), pre-scaled
    mod = slab_ref[vb + 1:vb + 2, 0:D_MODEL]             # (1, 32)
    wl_row = slab_ref[vb + 2:vb + 3, 0:D_MODEL]          # (1, 32)
    bl = slab_ref[vb + 3:vb + 4, 0:1]                    # (1, 1)

    # embedding (pre-multiplied by sqrt(d_model)) + modality vector
    w_emb = slab_ref[0:EMB_ROWS, 0:D_MODEL]              # (64, 32)
    h = jnp.dot(x, w_emb, preferred_element_type=jnp.float32) + b_emb + mod

    def layer_norm(v, g, b):
        mu = jnp.mean(v, axis=-1, keepdims=True)
        var = jnp.mean((v - mu) ** 2, axis=-1, keepdims=True)
        return (v - mu) * lax.rsqrt(var + LN_EPS) * g + b

    for l in range(N_LAYERS):                            # static unroll
        base = EMB_ROWS + LAYER_W_ROWS * l
        r = vb + VEC_HDR + VEC_PER_LAYER * l

        wqkv = slab_ref[base:base + D_MODEL, :]                          # (32, 128)
        wo_l = slab_ref[base + D_MODEL:base + 2 * D_MODEL, 0:D_MODEL]    # (32, 32)
        w1_l = slab_ref[base + 2 * D_MODEL:base + 3 * D_MODEL, 0:D_FF]   # (32, 32)
        w2_l = slab_ref[base + 3 * D_MODEL:base + 4 * D_MODEL, 0:D_MODEL]

        bqkv = slab_ref[r + 0:r + 1, :]                                  # (1, 128)
        bo = slab_ref[r + 1:r + 2, 0:D_MODEL]
        b1 = slab_ref[r + 2:r + 3, 0:D_FF]
        b2 = slab_ref[r + 3:r + 4, 0:D_MODEL]
        g1 = slab_ref[r + 4:r + 5, 0:D_MODEL]
        be1 = slab_ref[r + 5:r + 6, 0:D_MODEL]
        g2 = slab_ref[r + 6:r + 7, 0:D_MODEL]
        be2 = slab_ref[r + 7:r + 8, 0:D_MODEL]

        # ---- multi-head self-attention (post-norm TransformerEncoderLayer) --
        # fused QKV: single lane-dense (BL,128) matmul (cols 96..127 are zero).
        # Q columns / bias are pre-scaled by 1/sqrt(dh) host-side.
        qkv = jnp.dot(h, wqkv, preferred_element_type=jnp.float32) + bqkv
        q3 = qkv[:, 0:D_MODEL].reshape(B, L, D_MODEL)
        k3 = qkv[:, D_MODEL:2 * D_MODEL].reshape(B, L, D_MODEL)
        v3 = qkv[:, 2 * D_MODEL:3 * D_MODEL].reshape(B, L, D_MODEL)

        head_outs = []
        for hh in range(N_HEADS):                        # static unroll
            sl = slice(hh * dh, (hh + 1) * dh)
            qh, kh, vh = q3[:, :, sl], k3[:, :, sl], v3[:, :, sl]   # (B, L, dh)
            s = jnp.einsum('bqd,bkd->bqk', qh, kh,
                           preferred_element_type=jnp.float32)
            s = s - jnp.max(s, axis=-1, keepdims=True)
            p = jnp.exp(s)
            p = p / jnp.sum(p, axis=-1, keepdims=True)   # exact softmax
            head_outs.append(jnp.einsum('bqk,bkd->bqd', p, vh,
                                        preferred_element_type=jnp.float32))
        # cheap within-vreg lane concat, then ONE K=32 output projection matmul
        o = jnp.concatenate(head_outs, axis=-1).reshape(BL, D_MODEL)
        attn = jnp.dot(o, wo_l, preferred_element_type=jnp.float32) + bo
        h = layer_norm(h + attn, g1, be1)

        # ---- feed-forward (relu) ----
        ff = jnp.dot(h, w1_l, preferred_element_type=jnp.float32) + b1
        ff = jnp.maximum(ff, 0.0)
        ff = jnp.dot(ff, w2_l, preferred_element_type=jnp.float32) + b2
        h = layer_norm(h + ff, g2, be2)

    # ---- logits head + eval-mode hard selection over the frame axis ----
    h3 = h.reshape(B, L, D_MODEL)
    logits = jnp.sum(h3 * wl_row, axis=-1) + bl              # (B, L)
    m = jnp.max(logits, axis=-1, keepdims=True)              # (B, 1)
    iota = lax.broadcasted_iota(jnp.int32, (B, L), 1)
    first = jnp.min(jnp.where(logits == m, iota, L), axis=-1,
                    keepdims=True)                           # first maximal frame
    onehot = (iota == first).astype(jnp.float32)             # (B, L)
    out_ref[...] = onehot.T                                  # (L, B): batch on lanes


def pack_params(p):
    """Pack all parameters into one lane-aligned (SLAB_ROWS, 128) f32 slab,
    folding the sqrt(d_model) and 1/sqrt(d_head) constants into the weights."""
    sqrt_d = math.sqrt(float(D_MODEL))
    inv_sqrt_dh = 1.0 / math.sqrt(float(D_MODEL // N_HEADS))

    slab = jnp.zeros((SLAB_ROWS, SLAB_W), jnp.float32)
    slab = slab.at[0:EMB_ROWS, 0:D_MODEL].set(
        p['w_emb'].astype(jnp.float32) * sqrt_d)
    for l in range(N_LAYERS):
        base = EMB_ROWS + LAYER_W_ROWS * l
        wq = p['wq'][l].astype(jnp.float32) * inv_sqrt_dh
        wk = p['wk'][l].astype(jnp.float32)
        wv = p['wv'][l].astype(jnp.float32)
        slab = slab.at[base:base + D_MODEL, 0:3 * D_MODEL].set(
            jnp.concatenate([wq, wk, wv], axis=-1))
        slab = slab.at[base + D_MODEL:base + 2 * D_MODEL, 0:D_MODEL].set(
            p['wo'][l].astype(jnp.float32))
        slab = slab.at[base + 2 * D_MODEL:base + 3 * D_MODEL, 0:D_FF].set(
            p['w1'][l].astype(jnp.float32))
        slab = slab.at[base + 3 * D_MODEL:base + 4 * D_MODEL, 0:D_MODEL].set(
            p['w2'][l].astype(jnp.float32))

    def row(vec):
        vec = jnp.asarray(vec, jnp.float32).reshape(-1)
        return jnp.zeros((SLAB_W,), jnp.float32).at[:vec.shape[0]].set(vec)

    vb = W_ROWS
    slab = slab.at[vb + 0].set(row(jnp.asarray(p['b_emb'], jnp.float32) * sqrt_d))
    slab = slab.at[vb + 1].set(row(p['mod']))
    slab = slab.at[vb + 2].set(row(p['wl']))
    slab = slab.at[vb + 3].set(row(p['bl']))
    for l in range(N_LAYERS):
        r = vb + VEC_HDR + VEC_PER_LAYER * l
        bqkv = jnp.concatenate([jnp.asarray(p['bq'][l], jnp.float32) * inv_sqrt_dh,
                                jnp.asarray(p['bk'][l], jnp.float32),
                                jnp.asarray(p['bv'][l], jnp.float32)])
        slab = slab.at[r + 0].set(row(bqkv))
        slab = slab.at[r + 1].set(row(p['bo'][l]))
        slab = slab.at[r + 2].set(row(p['b1'][l]))
        slab = slab.at[r + 3].set(row(p['b2'][l]))
        slab = slab.at[r + 4].set(row(p['ln1g'][l]))
        slab = slab.at[r + 5].set(row(p['ln1b'][l]))
        slab = slab.at[r + 6].set(row(p['ln2g'][l]))
        slab = slab.at[r + 7].set(row(p['ln2b'][l]))
    return slab


def atp_selector(x, slab, batch_block=None):
    """x: (N, L, D_INPUT) -> selection mask (L, N, 1), one-hot over L per batch."""
    N, L, Din = x.shape
    assert Din == D_INPUT
    if batch_block is None:
        # one grid step for small batches; lane-aligned 256-row blocks otherwise
        batch_block = N if N <= BATCH_BLOCK_CAP else BATCH_BLOCK_CAP
    n_blocks = pl.cdiv(N, batch_block)
    n_pad = n_blocks * batch_block
    if n_pad != N:                                      # pad awkward batch sizes
        x = jnp.concatenate(
            [x, jnp.zeros((n_pad - N, L, Din), x.dtype)], axis=0)

    mask_ln = pl.pallas_call(
        atp_kernel,
        out_shape=jax.ShapeDtypeStruct((L, n_pad), jnp.float32),
        grid=(n_blocks,),
        in_specs=[pl.BlockSpec((batch_block, L, Din), lambda n: (n, 0, 0)),
                  pl.BlockSpec((SLAB_ROWS, SLAB_W), lambda n: (0, 0))],
        out_specs=pl.BlockSpec((L, batch_block), lambda n: (0, n)),
        compiler_params=pltpu.CompilerParams(
            dimension_semantics=("parallel",)),
    )(x.astype(jnp.float32), slab)
    return mask_ln[:, :N, None]                          # (L, N, 1)


def make_params(key):
    keys = jax.random.split(key, 16)

    def rnd(k, shape, scale=0.05):
        return jax.random.normal(k, shape, dtype=jnp.float32) * scale

    p = {}
    p['w_emb'] = rnd(keys[0], (D_INPUT, D_MODEL))
    p['b_emb'] = rnd(keys[1], (D_MODEL,))
    p['mod'] = rnd(keys[2], (D_MODEL,))          # visual modality embedding
    p['wq'] = rnd(keys[3], (N_LAYERS, D_MODEL, D_MODEL))
    p['bq'] = rnd(keys[4], (N_LAYERS, D_MODEL))
    p['wk'] = rnd(keys[5], (N_LAYERS, D_MODEL, D_MODEL))
    p['bk'] = rnd(keys[6], (N_LAYERS, D_MODEL))
    p['wv'] = rnd(keys[7], (N_LAYERS, D_MODEL, D_MODEL))
    p['bv'] = rnd(keys[8], (N_LAYERS, D_MODEL))
    p['wo'] = rnd(keys[9], (N_LAYERS, D_MODEL, D_MODEL))
    p['bo'] = rnd(keys[10], (N_LAYERS, D_MODEL))
    p['w1'] = rnd(keys[11], (N_LAYERS, D_MODEL, D_FF))
    p['b1'] = rnd(keys[12], (N_LAYERS, D_FF))
    p['w2'] = rnd(keys[13], (N_LAYERS, D_FF, D_MODEL))
    p['b2'] = rnd(keys[14], (N_LAYERS, D_MODEL))
    p['ln1g'] = jnp.ones((N_LAYERS, D_MODEL), jnp.float32)
    p['ln1b'] = jnp.zeros((N_LAYERS, D_MODEL), jnp.float32)
    p['ln2g'] = jnp.ones((N_LAYERS, D_MODEL), jnp.float32)
    p['ln2b'] = jnp.zeros((N_LAYERS, D_MODEL), jnp.float32)
    p['wl'] = rnd(keys[15], (D_MODEL,))
    p['bl'] = jnp.zeros((1,), jnp.float32)
    return p


def reference_forward(x, p):
    """Pure-JAX replica of the eval-mode forward. Returns (mask (L,N,1), logits (N,L))."""
    def ln(v, g, b):
        mu = v.mean(-1, keepdims=True)
        var = ((v - mu) ** 2).mean(-1, keepdims=True)
        return (v - mu) / jnp.sqrt(var + LN_EPS) * g + b

    N, L, _ = x.shape
    dh = D_MODEL // N_HEADS
    h = jnp.einsum('nld,dm->nlm', x, p['w_emb']) + p['b_emb']
    h = h * math.sqrt(float(D_MODEL)) + p['mod']
    for l in range(N_LAYERS):
        q = jnp.einsum('nld,de->nle', h, p['wq'][l]) + p['bq'][l]
        k = jnp.einsum('nld,de->nle', h, p['wk'][l]) + p['bk'][l]
        v = jnp.einsum('nld,de->nle', h, p['wv'][l]) + p['bv'][l]
        qh = q.reshape(N, L, N_HEADS, dh)
        kh = k.reshape(N, L, N_HEADS, dh)
        vh = v.reshape(N, L, N_HEADS, dh)
        s = jnp.einsum('nqhd,nkhd->nhqk', qh, kh) / math.sqrt(float(dh))
        pm = jax.nn.softmax(s, axis=-1)
        o = jnp.einsum('nhqk,nkhd->nqhd', pm, vh).reshape(N, L, D_MODEL)
        o = jnp.einsum('nld,de->nle', o, p['wo'][l]) + p['bo'][l]
        h = ln(h + o, p['ln1g'][l], p['ln1b'][l])
        ff = jnp.maximum(jnp.einsum('nld,df->nlf', h, p['w1'][l]) + p['b1'][l], 0.0)
        ff = jnp.einsum('nlf,fd->nld', ff, p['w2'][l]) + p['b2'][l]
        h = ln(h + ff, p['ln2g'][l], p['ln2b'][l])
    logits = jnp.einsum('nld,d->nl', h, p['wl']) + p['bl']          # (N, L)
    idx = jnp.argmax(logits, axis=-1)                               # (N,)
    mask = (jnp.arange(L)[None, :] == idx[:, None]).astype(jnp.float32)  # (N, L)
    return jnp.transpose(mask)[:, :, None], logits                  # (L, N, 1)


if __name__ == "__main__":
    key = jax.random.PRNGKey(0)
    kx, kp = jax.random.split(key)
    N, L = 4, 8
    x = jax.random.normal(kx, (N, L, D_INPUT), dtype=jnp.float32)
    params = make_params(kp)
    slab = pack_params(params)

    mask = atp_selector(x, slab)             # N<=256 -> single grid step
    jax.block_until_ready(mask)

    ref_mask, ref_logits = reference_forward(x, params)
    assert mask.shape == (L, N, 1), mask.shape
    assert bool(jnp.allclose(jnp.sum(mask, axis=0), 1.0)), \
        "mask must be one-hot over frames"
    if not bool(jnp.array_equal(mask, ref_mask)):
        # Accumulation-order differences can only flip the selection between
        # numerically tied frames; verify the chosen frame's logit is at the max.
        sel = jnp.argmax(mask[:, :, 0], axis=0)                       # (N,)
        gap = jnp.max(ref_logits, axis=-1) - ref_logits[jnp.arange(N), sel]
        assert bool(jnp.all(gap < 1e-3)), \
            "Pallas kernel mismatch vs pure-JAX reference"
    print("KERNEL_OK")
</pallas_src>

<mosaic_0001>
module attributes {stable_mosaic.version = 11 : i64} {
  func.func @atp_kernel(%arg0: i32, %arg1: memref<4x8x64xf32, #tpu.memory_space<vmem>>, %arg2: memref<344x128xf32, #tpu.memory_space<vmem>>, %arg3: memref<8x4xf32, #tpu.memory_space<vmem>>) attributes {dimension_semantics = [#tpu.dimension_semantics<parallel>], iteration_bounds = array<i64: 1>, scalar_prefetch = 0 : i64, scratch_operands = 0 : i64, tpu.core_type = #tpu.core_type<tc>, window_params = [{transform_indices = @transform_0, window_bounds = array<i64: 4, 8, 64>}, {pipeline_mode = #tpu.pipeline_mode<synchronous>, transform_indices = @transform_1, window_bounds = array<i64: 344, 128>}, {transform_indices = @transform_2, window_bounds = array<i64: 8, 4>}]} {
    %c0 = arith.constant 0 : index
    %c0_0 = arith.constant 0 : index
    %c0_1 = arith.constant 0 : index
    %0 = vector.load %arg1[%c0, %c0_0, %c0_1] : memref<4x8x64xf32, #tpu.memory_space<vmem>>, vector<4x8x64xf32>
    %1 = vector.shape_cast %0 : vector<4x8x64xf32> to vector<32x64xf32>
    %c320 = arith.constant 320 : index
    %c0_2 = arith.constant 0 : index
    %2 = vector.load %arg2[%c320, %c0_2] : memref<344x128xf32, #tpu.memory_space<vmem>>, vector<1x32xf32>
    %c321 = arith.constant 321 : index
    %c0_3 = arith.constant 0 : index
    %3 = vector.load %arg2[%c321, %c0_3] : memref<344x128xf32, #tpu.memory_space<vmem>>, vector<1x32xf32>
    %c322 = arith.constant 322 : index
    %c0_4 = arith.constant 0 : index
    %4 = vector.load %arg2[%c322, %c0_4] : memref<344x128xf32, #tpu.memory_space<vmem>>, vector<1x32xf32>
    %c323 = arith.constant 323 : index
    %c0_5 = arith.constant 0 : index
    %5 = vector.load %arg2[%c323, %c0_5] : memref<344x128xf32, #tpu.memory_space<vmem>>, vector<1x1xf32>
    %c0_6 = arith.constant 0 : index
    %c0_7 = arith.constant 0 : index
    %6 = vector.load %arg2[%c0_6, %c0_7] : memref<344x128xf32, #tpu.memory_space<vmem>>, vector<64x32xf32>
    %cst = arith.constant dense<0.000000e+00> : vector<32x32xf32>
    %7 = tpu.matmul %1, %6, %cst {dimension_numbers = #tpu.dot_dimension_numbers<[1], [0], [0], [1], [0, 0, 1, 1], [], []>} : vector<32x64xf32>, vector<64x32xf32>, vector<32x32xf32> -> vector<32x32xf32>
    %8 = vector.broadcast %2 : vector<1x32xf32> to vector<32x32xf32>
    %9 = arith.addf %7, %8 : vector<32x32xf32>
    %10 = vector.broadcast %3 : vector<1x32xf32> to vector<32x32xf32>
    %11 = arith.addf %9, %10 : vector<32x32xf32>
    %c64 = arith.constant 64 : index
    %c0_8 = arith.constant 0 : index
    %12 = vector.load %arg2[%c64, %c0_8] : memref<344x128xf32, #tpu.memory_space<vmem>>, vector<32x128xf32>
    %c96 = arith.constant 96 : index
    %c0_9 = arith.constant 0 : index
    %13 = vector.load %arg2[%c96, %c0_9] : memref<344x128xf32, #tpu.memory_space<vmem>>, vector<32x32xf32>
    %c128 = arith.constant 128 : index
    %c0_10 = arith.constant 0 : index
    %14 = vector.load %arg2[%c128, %c0_10] : memref<344x128xf32, #tpu.memory_space<vmem>>, vector<32x32xf32>
    %c160 = arith.constant 160 : index
    %c0_11 = arith.constant 0 : index
    %15 = vector.load %arg2[%c160, %c0_11] : memref<344x128xf32, #tpu.memory_space<vmem>>, vector<32x32xf32>
    %c324 = arith.constant 324 : index
    %c0_12 = arith.constant 0 : index
    %16 = vector.load %arg2[%c324, %c0_12] : memref<344x128xf32, #tpu.memory_space<vmem>>, vector<1x128xf32>
    %c325 = arith.constant 325 : index
    %c0_13 = arith.constant 0 : index
    %17 = vector.load %arg2[%c325, %c0_13] : memref<344x128xf32, #tpu.memory_space<vmem>>, vector<1x32xf32>
    %c326 = arith.constant 326 : index
    %c0_14 = arith.constant 0 : index
    %18 = vector.load %arg2[%c326, %c0_14] : memref<344x128xf32, #tpu.memory_space<vmem>>, vector<1x32xf32>
    %c327 = arith.constant 327 : index
    %c0_15 = arith.constant 0 : index
    %19 = vector.load %arg2[%c327, %c0_15] : memref<344x128xf32, #tpu.memory_space<vmem>>, vector<1x32xf32>
    %c328 = arith.constant 328 : index
    %c0_16 = arith.constant 0 : index
    %20 = vector.load %arg2[%c328, %c0_16] : memref<344x128xf32, #tpu.memory_space<vmem>>, vector<1x32xf32>
    %c329 = arith.constant 329 : index
    %c0_17 = arith.constant 0 : index
    %21 = vector.load %arg2[%c329, %c0_17] : memref<344x128xf32, #tpu.memory_space<vmem>>, vector<1x32xf32>
    %c330 = arith.constant 330 : index
    %c0_18 = arith.constant 0 : index
    %22 = vector.load %arg2[%c330, %c0_18] : memref<344x128xf32, #tpu.memory_space<vmem>>, vector<1x32xf32>
    %c331 = arith.constant 331 : index
    %c0_19 = arith.constant 0 : index
    %23 = vector.load %arg2[%c331, %c0_19] : memref<344x128xf32, #tpu.memory_space<vmem>>, vector<1x32xf32>
    %cst_20 = arith.constant dense<0.000000e+00> : vector<32x128xf32>
    %24 = tpu.matmul %11, %12, %cst_20 {dimension_numbers = #tpu.dot_dimension_numbers<[1], [0], [0], [1], [0, 0, 1, 1], [], []>} : vector<32x32xf32>, vector<32x128xf32>, vector<32x128xf32> -> vector<32x128xf32>
    %25 = vector.broadcast %16 : vector<1x128xf32> to vector<32x128xf32>
    %26 = arith.addf %24, %25 : vector<32x128xf32>
    %27 = vector.extract_strided_slice %26 {offsets = [0, 0], sizes = [32, 32], strides = [1, 1]} : vector<32x128xf32> to vector<32x32xf32>
    %28 = vector.shape_cast %27 : vector<32x32xf32> to vector<4x8x32xf32>
    %29 = vector.extract_strided_slice %26 {offsets = [0, 32], sizes = [32, 32], strides = [1, 1]} : vector<32x128xf32> to vector<32x32xf32>
    %30 = vector.shape_cast %29 : vector<32x32xf32> to vector<4x8x32xf32>
    %31 = vector.extract_strided_slice %26 {offsets = [0, 64], sizes = [32, 32], strides = [1, 1]} : vector<32x128xf32> to vector<32x32xf32>
    %32 = vector.shape_cast %31 : vector<32x32xf32> to vector<4x8x32xf32>
    %33 = vector.extract_strided_slice %28 {offsets = [0, 0, 0], sizes = [4, 8, 8], strides = [1, 1, 1]} : vector<4x8x32xf32> to vector<4x8x8xf32>
    %34 = vector.extract_strided_slice %30 {offsets = [0, 0, 0], sizes = [4, 8, 8], strides = [1, 1, 1]} : vector<4x8x32xf32> to vector<4x8x8xf32>
    %35 = vector.extract_strided_slice %32 {offsets = [0, 0, 0], sizes = [4, 8, 8], strides = [1, 1, 1]} : vector<4x8x32xf32> to vector<4x8x8xf32>
    "tpu.trace_start"() <{level = 10 : i32, message = "bqd,bkd->bqk"}> : () -> ()
    %cst_21 = arith.constant dense<0.000000e+00> : vector<4x8x8xf32>
    %36 = tpu.matmul %33, %34, %cst_21 {dimension_numbers = #tpu.dot_dimension_numbers<[2], [2], [1], [1], [0, 0, 0, 1, 1, 1], [0], [0]>} : vector<4x8x8xf32>, vector<4x8x8xf32>, vector<4x8x8xf32> -> vector<4x8x8xf32>
    "tpu.trace_stop"() : () -> ()
    %cst_22 = arith.constant dense<0xFF800000> : vector<4x8xf32>
    %37 = vector.multi_reduction <maximumf>, %36, %cst_22 [2] : vector<4x8x8xf32> to vector<4x8xf32>
    %38 = vector.shape_cast %37 : vector<4x8xf32> to vector<4x8x1xf32>
    %39 = vector.broadcast %38 : vector<4x8x1xf32> to vector<4x8x8xf32>
    %40 = arith.subf %36, %39 : vector<4x8x8xf32>
    %41 = math.exp %40 : vector<4x8x8xf32>
    %cst_23 = arith.constant dense<0.000000e+00> : vector<4x8xf32>
    %42 = vector.multi_reduction <add>, %41, %cst_23 [2] : vector<4x8x8xf32> to vector<4x8xf32>
    %43 = vector.shape_cast %42 : vector<4x8xf32> to vector<4x8x1xf32>
    %44 = vector.broadcast %43 : vector<4x8x1xf32> to vector<4x8x8xf32>
    %45 = arith.divf %41, %44 : vector<4x8x8xf32>
    "tpu.trace_start"() <{level = 10 : i32, message = "bqk,bkd->bqd"}> : () -> ()
    %cst_24 = arith.constant dense<0.000000e+00> : vector<4x8x8xf32>
    %46 = tpu.matmul %45, %35, %cst_24 {dimension_numbers = #tpu.dot_dimension_numbers<[2], [1], [1], [2], [0, 0, 0, 1, 1, 2], [0], [0]>} : vector<4x8x8xf32>, vector<4x8x8xf32>, vector<4x8x8xf32> -> vector<4x8x8xf32>
    "tpu.trace_stop"() : () -> ()
    %47 = vector.extract_strided_slice %28 {offsets = [0, 0, 8], sizes = [4, 8, 8], strides = [1, 1, 1]} : vector<4x8x32xf32> to vector<4x8x8xf32>
    %48 = vector.extract_strided_slice %30 {offsets = [0, 0, 8], sizes = [4, 8, 8], strides = [1, 1, 1]} : vector<4x8x32xf32> to vector<4x8x8xf32>
    %49 = vector.extract_strided_slice %32 {offsets = [0, 0, 8], sizes = [4, 8, 8], strides = [1, 1, 1]} : vector<4x8x32xf32> to vector<4x8x8xf32>
    "tpu.trace_start"() <{level = 10 : i32, message = "bqd,bkd->bqk"}> : () -> ()
    %cst_25 = arith.constant dense<0.000000e+00> : vector<4x8x8xf32>
    %50 = tpu.matmul %47, %48, %cst_25 {dimension_numbers = #tpu.dot_dimension_numbers<[2], [2], [1], [1], [0, 0, 0, 1, 1, 1], [0], [0]>} : vector<4x8x8xf32>, vector<4x8x8xf32>, vector<4x8x8xf32> -> vector<4x8x8xf32>
    "tpu.trace_stop"() : () -> ()
    %cst_26 = arith.constant dense<0xFF800000> : vector<4x8xf32>
    %51 = vector.multi_reduction <maximumf>, %50, %cst_26 [2] : vector<4x8x8xf32> to vector<4x8xf32>
    %52 = vector.shape_cast %51 : vector<4x8xf32> to vector<4x8x1xf32>
    %53 = vector.broadcast %52 : vector<4x8x1xf32> to vector<4x8x8xf32>
    %54 = arith.subf %50, %53 : vector<4x8x8xf32>
    %55 = math.exp %54 : vector<4x8x8xf32>
    %cst_27 = arith.constant dense<0.000000e+00> : vector<4x8xf32>
    %56 = vector.multi_reduction <add>, %55, %cst_27 [2] : vector<4x8x8xf32> to vector<4x8xf32>
    %57 = vector.shape_cast %56 : vector<4x8xf32> to vector<4x8x1xf32>
    %58 = vector.broadcast %57 : vector<4x8x1xf32> to vector<4x8x8xf32>
    %59 = arith.divf %55, %58 : vector<4x8x8xf32>
    "tpu.trace_start"() <{level = 10 : i32, message = "bqk,bkd->bqd"}> : () -> ()
    %cst_28 = arith.constant dense<0.000000e+00> : vector<4x8x8xf32>
    %60 = tpu.matmul %59, %49, %cst_28 {dimension_numbers = #tpu.dot_dimension_numbers<[2], [1], [1], [2], [0, 0, 0, 1, 1, 2], [0], [0]>} : vector<4x8x8xf32>, vector<4x8x8xf32>, vector<4x8x8xf32> -> vector<4x8x8xf32>
    "tpu.trace_stop"() : () -> ()
    %61 = vector.extract_strided_slice %28 {offsets = [0, 0, 16], sizes = [4, 8, 8], strides = [1, 1, 1]} : vector<4x8x32xf32> to vector<4x8x8xf32>
    %62 = vector.extract_strided_slice %30 {offsets = [0, 0, 16], sizes = [4, 8, 8], strides = [1, 1, 1]} : vector<4x8x32xf32> to vector<4x8x8xf32>
    %63 = vector.extract_strided_slice %32 {offsets = [0, 0, 16], sizes = [4, 8, 8], strides = [1, 1, 1]} : vector<4x8x32xf32> to vector<4x8x8xf32>
    "tpu.trace_start"() <{level = 10 : i32, message = "bqd,bkd->bqk"}> : () -> ()
    %cst_29 = arith.constant dense<0.000000e+00> : vector<4x8x8xf32>
    %64 = tpu.matmul %61, %62, %cst_29 {dimension_numbers = #tpu.dot_dimension_numbers<[2], [2], [1], [1], [0, 0, 0, 1, 1, 1], [0], [0]>} : vector<4x8x8xf32>, vector<4x8x8xf32>, vector<4x8x8xf32> -> vector<4x8x8xf32>
    "tpu.trace_stop"() : () -> ()
    %cst_30 = arith.constant dense<0xFF800000> : vector<4x8xf32>
    %65 = vector.multi_reduction <maximumf>, %64, %cst_30 [2] : vector<4x8x8xf32> to vector<4x8xf32>
    %66 = vector.shape_cast %65 : vector<4x8xf32> to vector<4x8x1xf32>
    %67 = vector.broadcast %66 : vector<4x8x1xf32> to vector<4x8x8xf32>
    %68 = arith.subf %64, %67 : vector<4x8x8xf32>
    %69 = math.exp %68 : vector<4x8x8xf32>
    %cst_31 = arith.constant dense<0.000000e+00> : vector<4x8xf32>
    %70 = vector.multi_reduction <add>, %69, %cst_31 [2] : vector<4x8x8xf32> to vector<4x8xf32>
    %71 = vector.shape_cast %70 : vector<4x8xf32> to vector<4x8x1xf32>
    %72 = vector.broadcast %71 : vector<4x8x1xf32> to vector<4x8x8xf32>
    %73 = arith.divf %69, %72 : vector<4x8x8xf32>
    "tpu.trace_start"() <{level = 10 : i32, message = "bqk,bkd->bqd"}> : () -> ()
    %cst_32 = arith.constant dense<0.000000e+00> : vector<4x8x8xf32>
    %74 = tpu.matmul %73, %63, %cst_32 {dimension_numbers = #tpu.dot_dimension_numbers<[2], [1], [1], [2], [0, 0, 0, 1, 1, 2], [0], [0]>} : vector<4x8x8xf32>, vector<4x8x8xf32>, vector<4x8x8xf32> -> vector<4x8x8xf32>
    "tpu.trace_stop"() : () -> ()
    %75 = vector.extract_strided_slice %28 {offsets = [0, 0, 24], sizes = [4, 8, 8], strides = [1, 1, 1]} : vector<4x8x32xf32> to vector<4x8x8xf32>
    %76 = vector.extract_strided_slice %30 {offsets = [0, 0, 24], sizes = [4, 8, 8], strides = [1, 1, 1]} : vector<4x8x32xf32> to vector<4x8x8xf32>
    %77 = vector.extract_strided_slice %32 {offsets = [0, 0, 24], sizes = [4, 8, 8], strides = [1, 1, 1]} : vector<4x8x32xf32> to vector<4x8x8xf32>
    "tpu.trace_start"() <{level = 10 : i32, message = "bqd,bkd->bqk"}> : () -> ()
    %cst_33 = arith.constant dense<0.000000e+00> : vector<4x8x8xf32>
    %78 = tpu.matmul %75, %76, %cst_33 {dimension_numbers = #tpu.dot_dimension_numbers<[2], [2], [1], [1], [0, 0, 0, 1, 1, 1], [0], [0]>} : vector<4x8x8xf32>, vector<4x8x8xf32>, vector<4x8x8xf32> -> vector<4x8x8xf32>
    "tpu.trace_stop"() : () -> ()
    %cst_34 = arith.constant dense<0xFF800000> : vector<4x8xf32>
    %79 = vector.multi_reduction <maximumf>, %78, %cst_34 [2] : vector<4x8x8xf32> to vector<4x8xf32>
    %80 = vector.shape_cast %79 : vector<4x8xf32> to vector<4x8x1xf32>
    %81 = vector.broadcast %80 : vector<4x8x1xf32> to vector<4x8x8xf32>
    %82 = arith.subf %78, %81 : vector<4x8x8xf32>
    %83 = math.exp %82 : vector<4x8x8xf32>
    %cst_35 = arith.constant dense<0.000000e+00> : vector<4x8xf32>
    %84 = vector.multi_reduction <add>, %83, %cst_35 [2] : vector<4x8x8xf32> to vector<4x8xf32>
    %85 = vector.shape_cast %84 : vector<4x8xf32> to vector<4x8x1xf32>
    %86 = vector.broadcast %85 : vector<4x8x1xf32> to vector<4x8x8xf32>
    %87 = arith.divf %83, %86 : vector<4x8x8xf32>
    "tpu.trace_start"() <{level = 10 : i32, message = "bqk,bkd->bqd"}> : () -> ()
    %cst_36 = arith.constant dense<0.000000e+00> : vector<4x8x8xf32>
    %88 = tpu.matmul %87, %77, %cst_36 {dimension_numbers = #tpu.dot_dimension_numbers<[2], [1], [1], [2], [0, 0, 0, 1, 1, 2], [0], [0]>} : vector<4x8x8xf32>, vector<4x8x8xf32>, vector<4x8x8xf32> -> vector<4x8x8xf32>
    "tpu.trace_stop"() : () -> ()
    %89 = tpu.concatenate %46, %60, %74, %88 in 2 : vector<4x8x8xf32>, vector<4x8x8xf32>, vector<4x8x8xf32>, vector<4x8x8xf32> -> vector<4x8x32xf32>
    %90 = vector.shape_cast %89 : vector<4x8x32xf32> to vector<32x32xf32>
    %cst_37 = arith.constant dense<0.000000e+00> : vector<32x32xf32>
    %91 = tpu.matmul %90, %13, %cst_37 {dimension_numbers = #tpu.dot_dimension_numbers<[1], [0], [0], [1], [0, 0, 1, 1], [], []>} : vector<32x32xf32>, vector<32x32xf32>, vector<32x32xf32> -> vector<32x32xf32>
    %92 = vector.broadcast %17 : vector<1x32xf32> to vector<32x32xf32>
    %93 = arith.addf %91, %92 : vector<32x32xf32>
    %94 = arith.addf %11, %93 : vector<32x32xf32>
    %cst_38 = arith.constant dense<0.000000e+00> : vector<32xf32>
    %95 = vector.multi_reduction <add>, %94, %cst_38 [1] : vector<32x32xf32> to vector<32xf32>
    %96 = vector.shape_cast %95 : vector<32xf32> to vector<32x1xf32>
    %cst_39 = arith.constant 3.200000e+01 : f32
    %97 = vector.broadcast %cst_39 : f32 to vector<32x1xf32>
    %98 = arith.divf %96, %97 : vector<32x1xf32>
    %99 = vector.broadcast %98 : vector<32x1xf32> to vector<32x32xf32>
    %100 = arith.subf %94, %99 : vector<32x32xf32>
    %101 = arith.mulf %100, %100 : vector<32x32xf32>
    %cst_40 = arith.constant dense<0.000000e+00> : vector<32xf32>
    %102 = vector.multi_reduction <add>, %101, %cst_40 [1] : vector<32x32xf32> to vector<32xf32>
    %103 = vector.shape_cast %102 : vector<32xf32> to vector<32x1xf32>
    %cst_41 = arith.constant 3.200000e+01 : f32
    %104 = vector.broadcast %cst_41 : f32 to vector<32x1xf32>
    %105 = arith.divf %103, %104 : vector<32x1xf32>
    %106 = vector.broadcast %98 : vector<32x1xf32> to vector<32x32xf32>
    %107 = arith.subf %94, %106 : vector<32x32xf32>
    %cst_42 = arith.constant 9.99999974E-6 : f32
    %108 = vector.broadcast %cst_42 : f32 to vector<32x1xf32>
    %109 = arith.addf %105, %108 : vector<32x1xf32>
    %110 = math.rsqrt %109 : vector<32x1xf32>
    %111 = vector.broadcast %110 : vector<32x1xf32> to vector<32x32xf32>
    %112 = arith.mulf %107, %111 : vector<32x32xf32>
    %113 = vector.broadcast %20 : vector<1x32xf32> to vector<32x32xf32>
    %114 = arith.mulf %112, %113 : vector<32x32xf32>
    %115 = vector.broadcast %21 : vector<1x32xf32> to vector<32x32xf32>
    %116 = arith.addf %114, %115 : vector<32x32xf32>
    %cst_43 = arith.constant dense<0.000000e+00> : vector<32x32xf32>
    %117 = tpu.matmul %116, %14, %cst_43 {dimension_numbers = #tpu.dot_dimension_numbers<[1], [0], [0], [1], [0, 0, 1, 1], [], []>} : vector<32x32xf32>, vector<32x32xf32>, vector<32x32xf32> -> vector<32x32xf32>
    %118 = vector.broadcast %18 : vector<1x32xf32> to vector<32x32xf32>
    %119 = arith.addf %117, %118 : vector<32x32xf32>
    %cst_44 = arith.constant 0.000000e+00 : f32
    %120 = vector.broadcast %cst_44 : f32 to vector<32x32xf32>
    %121 = arith.maximumf %119, %120 : vector<32x32xf32>
    %cst_45 = arith.constant dense<0.000000e+00> : vector<32x32xf32>
    %122 = tpu.matmul %121, %15, %cst_45 {dimension_numbers = #tpu.dot_dimension_numbers<[1], [0], [0], [1], [0, 0, 1, 1], [], []>} : vector<32x32xf32>, vector<32x32xf32>, vector<32x32xf32> -> vector<32x32xf32>
    %123 = vector.broadcast %19 : vector<1x32xf32> to vector<32x32xf32>
    %124 = arith.addf %122, %123 : vector<32x32xf32>
    %125 = arith.addf %116, %124 : vector<32x32xf32>
    %cst_46 = arith.constant dense<0.000000e+00> : vector<32xf32>
    %126 = vector.multi_reduction <add>, %125, %cst_46 [1] : vector<32x32xf32> to vector<32xf32>
    %127 = vector.shape_cast %126 : vector<32xf32> to vector<32x1xf32>
    %cst_47 = arith.constant 3.200000e+01 : f32
    %128 = vector.broadcast %cst_47 : f32 to vector<32x1xf32>
    %129 = arith.divf %127, %128 : vector<32x1xf32>
    %130 = vector.broadcast %129 : vector<32x1xf32> to vector<32x32xf32>
    %131 = arith.subf %125, %130 : vector<32x32xf32>
    %132 = arith.mulf %131, %131 : vector<32x32xf32>
    %cst_48 = arith.constant dense<0.000000e+00> : vector<32xf32>
    %133 = vector.multi_reduction <add>, %132, %cst_48 [1] : vector<32x32xf32> to vector<32xf32>
    %134 = vector.shape_cast %133 : vector<32xf32> to vector<32x1xf32>
    %cst_49 = arith.constant 3.200000e+01 : f32
    %135 = vector.broadcast %cst_49 : f32 to vector<32x1xf32>
    %136 = arith.divf %134, %135 : vector<32x1xf32>
    %137 = vector.broadcast %129 : vector<32x1xf32> to vector<32x32xf32>
    %138 = arith.subf %125, %137 : vector<32x32xf32>
    %cst_50 = arith.constant 9.99999974E-6 : f32
    %139 = vector.broadcast %cst_50 : f32 to vector<32x1xf32>
    %140 = arith.addf %136, %139 : vector<32x1xf32>
    %141 = math.rsqrt %140 : vector<32x1xf32>
    %142 = vector.broadcast %141 : vector<32x1xf32> to vector<32x32xf32>
    %143 = arith.mulf %138, %142 : vector<32x32xf32>
    %144 = vector.broadcast %22 : vector<1x32xf32> to vector<32x32xf32>
    %145 = arith.mulf %143, %144 : vector<32x32xf32>
    %146 = vector.broadcast %23 : vector<1x32xf32> to vector<32x32xf32>
    %147 = arith.addf %145, %146 : vector<32x32xf32>
    %c192 = arith.constant 192 : index
    %c0_51 = arith.constant 0 : index
    %148 = vector.load %arg2[%c192, %c0_51] : memref<344x128xf32, #tpu.memory_space<vmem>>, vector<32x128xf32>
    %c224 = arith.constant 224 : index
    %c0_52 = arith.constant 0 : index
    %149 = vector.load %arg2[%c224, %c0_52] : memref<344x128xf32, #tpu.memory_space<vmem>>, vector<32x32xf32>
    %c256 = arith.constant 256 : index
    %c0_53 = arith.constant 0 : index
    %150 = vector.load %arg2[%c256, %c0_53] : memref<344x128xf32, #tpu.memory_space<vmem>>, vector<32x32xf32>
    %c288 = arith.constant 288 : index
    %c0_54 = arith.constant 0 : index
    %151 = vector.load %arg2[%c288, %c0_54] : memref<344x128xf32, #tpu.memory_space<vmem>>, vector<32x32xf32>
    %c332 = arith.constant 332 : index
    %c0_55 = arith.constant 0 : index
    %152 = vector.load %arg2[%c332, %c0_55] : memref<344x128xf32, #tpu.memory_space<vmem>>, vector<1x128xf32>
    %c333 = arith.constant 333 : index
    %c0_56 = arith.constant 0 : index
    %153 = vector.load %arg2[%c333, %c0_56] : memref<344x128xf32, #tpu.memory_space<vmem>>, vector<1x32xf32>
    %c334 = arith.constant 334 : index
    %c0_57 = arith.constant 0 : index
    %154 = vector.load %arg2[%c334, %c0_57] : memref<344x128xf32, #tpu.memory_space<vmem>>, vector<1x32xf32>
    %c335 = arith.constant 335 : index
    %c0_58 = arith.constant 0 : index
    %155 = vector.load %arg2[%c335, %c0_58] : memref<344x128xf32, #tpu.memory_space<vmem>>, vector<1x32xf32>
    %c336 = arith.constant 336 : index
    %c0_59 = arith.constant 0 : index
    %156 = vector.load %arg2[%c336, %c0_59] : memref<344x128xf32, #tpu.memory_space<vmem>>, vector<1x32xf32>
    %c337 = arith.constant 337 : index
    %c0_60 = arith.constant 0 : index
    %157 = vector.load %arg2[%c337, %c0_60] : memref<344x128xf32, #tpu.memory_space<vmem>>, vector<1x32xf32>
    %c338 = arith.constant 338 : index
    %c0_61 = arith.constant 0 : index
    %158 = vector.load %arg2[%c338, %c0_61] : memref<344x128xf32, #tpu.memory_space<vmem>>, vector<1x32xf32>
    %c339 = arith.constant 339 : index
    %c0_62 = arith.constant 0 : index
    %159 = vector.load %arg2[%c339, %c0_62] : memref<344x128xf32, #tpu.memory_space<vmem>>, vector<1x32xf32>
    %cst_63 = arith.constant dense<0.000000e+00> : vector<32x128xf32>
    %160 = tpu.matmul %147, %148, %cst_63 {dimension_numbers = #tpu.dot_dimension_numbers<[1], [0], [0], [1], [0, 0, 1, 1], [], []>} : vector<32x32xf32>, vector<32x128xf32>, vector<32x128xf32> -> vector<32x128xf32>
    %161 = vector.broadcast %152 : vector<1x128xf32> to vector<32x128xf32>
    %162 = arith.addf %160, %161 : vector<32x128xf32>
    %163 = vector.extract_strided_slice %162 {offsets = [0, 0], sizes = [32, 32], strides = [1, 1]} : vector<32x128xf32> to vector<32x32xf32>
    %164 = vector.shape_cast %163 : vector<32x32xf32> to vector<4x8x32xf32>
    %165 = vector.extract_strided_slice %162 {offsets = [0, 32], sizes = [32, 32], strides = [1, 1]} : vector<32x128xf32> to vector<32x32xf32>
    %166 = vector.shape_cast %165 : vector<32x32xf32> to vector<4x8x32xf32>
    %167 = vector.extract_strided_slice %162 {offsets = [0, 64], sizes = [32, 32], strides = [1, 1]} : vector<32x128xf32> to vector<32x32xf32>
    %168 = vector.shape_cast %167 : vector<32x32xf32> to vector<4x8x32xf32>
    %169 = vector.extract_strided_slice %164 {offsets = [0, 0, 0], sizes = [4, 8, 8], strides = [1, 1, 1]} : vector<4x8x32xf32> to vector<4x8x8xf32>
    %170 = vector.extract_strided_slice %166 {offsets = [0, 0, 0], sizes = [4, 8, 8], strides = [1, 1, 1]} : vector<4x8x32xf32> to vector<4x8x8xf32>
    %171 = vector.extract_strided_slice %168 {offsets = [0, 0, 0], sizes = [4, 8, 8], strides = [1, 1, 1]} : vector<4x8x32xf32> to vector<4x8x8xf32>
    "tpu.trace_start"() <{level = 10 : i32, message = "bqd,bkd->bqk"}> : () -> ()
    %cst_64 = arith.constant dense<0.000000e+00> : vector<4x8x8xf32>
    %172 = tpu.matmul %169, %170, %cst_64 {dimension_numbers = #tpu.dot_dimension_numbers<[2], [2], [1], [1], [0, 0, 0, 1, 1, 1], [0], [0]>} : vector<4x8x8xf32>, vector<4x8x8xf32>, vector<4x8x8xf32> -> vector<4x8x8xf32>
    "tpu.trace_stop"() : () -> ()
    %cst_65 = arith.constant dense<0xFF800000> : vector<4x8xf32>
    %173 = vector.multi_reduction <maximumf>, %172, %cst_65 [2] : vector<4x8x8xf32> to vector<4x8xf32>
    %174 = vector.shape_cast %173 : vector<4x8xf32> to vector<4x8x1xf32>
    %175 = vector.broadcast %174 : vector<4x8x1xf32> to vector<4x8x8xf32>
    %176 = arith.subf %172, %175 : vector<4x8x8xf32>
    %177 = math.exp %176 : vector<4x8x8xf32>
    %cst_66 = arith.constant dense<0.000000e+00> : vector<4x8xf32>
    %178 = vector.multi_reduction <add>, %177, %cst_66 [2] : vector<4x8x8xf32> to vector<4x8xf32>
    %179 = vector.shape_cast %178 : vector<4x8xf32> to vector<4x8x1xf32>
    %180 = vector.broadcast %179 : vector<4x8x1xf32> to vector<4x8x8xf32>
    %181 = arith.divf %177, %180 : vector<4x8x8xf32>
    "tpu.trace_start"() <{level = 10 : i32, message = "bqk,bkd->bqd"}> : () -> ()
    %cst_67 = arith.constant dense<0.000000e+00> : vector<4x8x8xf32>
    %182 = tpu.matmul %181, %171, %cst_67 {dimension_numbers = #tpu.dot_dimension_numbers<[2], [1], [1], [2], [0, 0, 0, 1, 1, 2], [0], [0]>} : vector<4x8x8xf32>, vector<4x8x8xf32>, vector<4x8x8xf32> -> vector<4x8x8xf32>
    "tpu.trace_stop"() : () -> ()
    %183 = vector.extract_strided_slice %164 {offsets = [0, 0, 8], sizes = [4, 8, 8], strides = [1, 1, 1]} : vector<4x8x32xf32> to vector<4x8x8xf32>
    %184 = vector.extract_strided_slice %166 {offsets = [0, 0, 8], sizes = [4, 8, 8], strides = [1, 1, 1]} : vector<4x8x32xf32> to vector<4x8x8xf32>
    %185 = vector.extract_strided_slice %168 {offsets = [0, 0, 8], sizes = [4, 8, 8], strides = [1, 1, 1]} : vector<4x8x32xf32> to vector<4x8x8xf32>
    "tpu.trace_start"() <{level = 10 : i32, message = "bqd,bkd->bqk"}> : () -> ()
    %cst_68 = arith.constant dense<0.000000e+00> : vector<4x8x8xf32>
    %186 = tpu.matmul %183, %184, %cst_68 {dimension_numbers = #tpu.dot_dimension_numbers<[2], [2], [1], [1], [0, 0, 0, 1, 1, 1], [0], [0]>} : vector<4x8x8xf32>, vector<4x8x8xf32>, vector<4x8x8xf32> -> vector<4x8x8xf32>
    "tpu.trace_stop"() : () -> ()
    %cst_69 = arith.constant dense<0xFF800000> : vector<4x8xf32>
    %187 = vector.multi_reduction <maximumf>, %186, %cst_69 [2] : vector<4x8x8xf32> to vector<4x8xf32>
    %188 = vector.shape_cast %187 : vector<4x8xf32> to vector<4x8x1xf32>
    %189 = vector.broadcast %188 : vector<4x8x1xf32> to vector<4x8x8xf32>
    %190 = arith.subf %186, %189 : vector<4x8x8xf32>
    %191 = math.exp %190 : vector<4x8x8xf32>
    %cst_70 = arith.constant dense<0.000000e+00> : vector<4x8xf32>
    %192 = vector.multi_reduction <add>, %191, %cst_70 [2] : vector<4x8x8xf32> to vector<4x8xf32>
    %193 = vector.shape_cast %192 : vector<4x8xf32> to vector<4x8x1xf32>
    %194 = vector.broadcast %193 : vector<4x8x1xf32> to vector<4x8x8xf32>
    %195 = arith.divf %191, %194 : vector<4x8x8xf32>
    "tpu.trace_start"() <{level = 10 : i32, message = "bqk,bkd->bqd"}> : () -> ()
    %cst_71 = arith.constant dense<0.000000e+00> : vector<4x8x8xf32>
    %196 = tpu.matmul %195, %185, %cst_71 {dimension_numbers = #tpu.dot_dimension_numbers<[2], [1], [1], [2], [0, 0, 0, 1, 1, 2], [0], [0]>} : vector<4x8x8xf32>, vector<4x8x8xf32>, vector<4x8x8xf32> -> vector<4x8x8xf32>
    "tpu.trace_stop"() : () -> ()
    %197 = vector.extract_strided_slice %164 {offsets = [0, 0, 16], sizes = [4, 8, 8], strides = [1, 1, 1]} : vector<4x8x32xf32> to vector<4x8x8xf32>
    %198 = vector.extract_strided_slice %166 {offsets = [0, 0, 16], sizes = [4, 8, 8], strides = [1, 1, 1]} : vector<4x8x32xf32> to vector<4x8x8xf32>
    %199 = vector.extract_strided_slice %168 {offsets = [0, 0, 16], sizes = [4, 8, 8], strides = [1, 1, 1]} : vector<4x8x32xf32> to vector<4x8x8xf32>
    "tpu.trace_start"() <{level = 10 : i32, message = "bqd,bkd->bqk"}> : () -> ()
    %cst_72 = arith.constant dense<0.000000e+00> : vector<4x8x8xf32>
    %200 = tpu.matmul %197, %198, %cst_72 {dimension_numbers = #tpu.dot_dimension_numbers<[2], [2], [1], [1], [0, 0, 0, 1, 1, 1], [0], [0]>} : vector<4x8x8xf32>, vector<4x8x8xf32>, vector<4x8x8xf32> -> vector<4x8x8xf32>
    "tpu.trace_stop"() : () -> ()
    %cst_73 = arith.constant dense<0xFF800000> : vector<4x8xf32>
    %201 = vector.multi_reduction <maximumf>, %200, %cst_73 [2] : vector<4x8x8xf32> to vector<4x8xf32>
    %202 = vector.shape_cast %201 : vector<4x8xf32> to vector<4x8x1xf32>
    %203 = vector.broadcast %202 : vector<4x8x1xf32> to vector<4x8x8xf32>
    %204 = arith.subf %200, %203 : vector<4x8x8xf32>
    %205 = math.exp %204 : vector<4x8x8xf32>
    %cst_74 = arith.constant dense<0.000000e+00> : vector<4x8xf32>
    %206 = vector.multi_reduction <add>, %205, %cst_74 [2] : vector<4x8x8xf32> to vector<4x8xf32>
    %207 = vector.shape_cast %206 : vector<4x8xf32> to vector<4x8x1xf32>
    %208 = vector.broadcast %207 : vector<4x8x1xf32> to vector<4x8x8xf32>
    %209 = arith.divf %205, %208 : vector<4x8x8xf32>
    "tpu.trace_start"() <{level = 10 : i32, message = "bqk,bkd->bqd"}> : () -> ()
    %cst_75 = arith.constant dense<0.000000e+00> : vector<4x8x8xf32>
    %210 = tpu.matmul %209, %199, %cst_75 {dimension_numbers = #tpu.dot_dimension_numbers<[2], [1], [1], [2], [0, 0, 0, 1, 1, 2], [0], [0]>} : vector<4x8x8xf32>, vector<4x8x8xf32>, vector<4x8x8xf32> -> vector<4x8x8xf32>
    "tpu.trace_stop"() : () -> ()
    %211 = vector.extract_strided_slice %164 {offsets = [0, 0, 24], sizes = [4, 8, 8], strides = [1, 1, 1]} : vector<4x8x32xf32> to vector<4x8x8xf32>
    %212 = vector.extract_strided_slice %166 {offsets = [0, 0, 24], sizes = [4, 8, 8], strides = [1, 1, 1]} : vector<4x8x32xf32> to vector<4x8x8xf32>
    %213 = vector.extract_strided_slice %168 {offsets = [0, 0, 24], sizes = [4, 8, 8], strides = [1, 1, 1]} : vector<4x8x32xf32> to vector<4x8x8xf32>
    "tpu.trace_start"() <{level = 10 : i32, message = "bqd,bkd->bqk"}> : () -> ()
    %cst_76 = arith.constant dense<0.000000e+00> : vector<4x8x8xf32>
    %214 = tpu.matmul %211, %212, %cst_76 {dimension_numbers = #tpu.dot_dimension_numbers<[2], [2], [1], [1], [0, 0, 0, 1, 1, 1], [0], [0]>} : vector<4x8x8xf32>, vector<4x8x8xf32>, vector<4x8x8xf32> -> vector<4x8x8xf32>
    "tpu.trace_stop"() : () -> ()
    %cst_77 = arith.constant dense<0xFF800000> : vector<4x8xf32>
    %215 = vector.multi_reduction <maximumf>, %214, %cst_77 [2] : vector<4x8x8xf32> to vector<4x8xf32>
    %216 = vector.shape_cast %215 : vector<4x8xf32> to vector<4x8x1xf32>
    %217 = vector.broadcast %216 : vector<4x8x1xf32> to vector<4x8x8xf32>
    %218 = arith.subf %214, %217 : vector<4x8x8xf32>
    %219 = math.exp %218 : vector<4x8x8xf32>
    %cst_78 = arith.constant dense<0.000000e+00> : vector<4x8xf32>
    %220 = vector.multi_reduction <add>, %219, %cst_78 [2] : vector<4x8x8xf32> to vector<4x8xf32>
    %221 = vector.shape_cast %220 : vector<4x8xf32> to vector<4x8x1xf32>
    %222 = vector.broadcast %221 : vector<4x8x1xf32> to vector<4x8x8xf32>
    %223 = arith.divf %219, %222 : vector<4x8x8xf32>
    "tpu.trace_start"() <{level = 10 : i32, message = "bqk,bkd->bqd"}> : () -> ()
    %cst_79 = arith.constant dense<0.000000e+00> : vector<4x8x8xf32>
    %224 = tpu.matmul %223, %213, %cst_79 {dimension_numbers = #tpu.dot_dimension_numbers<[2], [1], [1], [2], [0, 0, 0, 1, 1, 2], [0], [0]>} : vector<4x8x8xf32>, vector<4x8x8xf32>, vector<4x8x8xf32> -> vector<4x8x8xf32>
    "tpu.trace_stop"() : () -> ()
    %225 = tpu.concatenate %182, %196, %210, %224 in 2 : vector<4x8x8xf32>, vector<4x8x8xf32>, vector<4x8x8xf32>, vector<4x8x8xf32> -> vector<4x8x32xf32>
    %226 = vector.shape_cast %225 : vector<4x8x32xf32> to vector<32x32xf32>
    %cst_80 = arith.constant dense<0.000000e+00> : vector<32x32xf32>
    %227 = tpu.matmul %226, %149, %cst_80 {dimension_numbers = #tpu.dot_dimension_numbers<[1], [0], [0], [1], [0, 0, 1, 1], [], []>} : vector<32x32xf32>, vector<32x32xf32>, vector<32x32xf32> -> vector<32x32xf32>
    %228 = vector.broadcast %153 : vector<1x32xf32> to vector<32x32xf32>
    %229 = arith.addf %227, %228 : vector<32x32xf32>
    %230 = arith.addf %147, %229 : vector<32x32xf32>
    %cst_81 = arith.constant dense<0.000000e+00> : vector<32xf32>
    %231 = vector.multi_reduction <add>, %230, %cst_81 [1] : vector<32x32xf32> to vector<32xf32>
    %232 = vector.shape_cast %231 : vector<32xf32> to vector<32x1xf32>
    %cst_82 = arith.constant 3.200000e+01 : f32
    %233 = vector.broadcast %cst_82 : f32 to vector<32x1xf32>
    %234 = arith.divf %232, %233 : vector<32x1xf32>
    %235 = vector.broadcast %234 : vector<32x1xf32> to vector<32x32xf32>
    %236 = arith.subf %230, %235 : vector<32x32xf32>
    %237 = arith.mulf %236, %236 : vector<32x32xf32>
    %cst_83 = arith.constant dense<0.000000e+00> : vector<32xf32>
    %238 = vector.multi_reduction <add>, %237, %cst_83 [1] : vector<32x32xf32> to vector<32xf32>
    %239 = vector.shape_cast %238 : vector<32xf32> to vector<32x1xf32>
    %cst_84 = arith.constant 3.200000e+01 : f32
    %240 = vector.broadcast %cst_84 : f32 to vector<32x1xf32>
    %241 = arith.divf %239, %240 : vector<32x1xf32>
    %242 = vector.broadcast %234 : vector<32x1xf32> to vector<32x32xf32>
    %243 = arith.subf %230, %242 : vector<32x32xf32>
    %cst_85 = arith.constant 9.99999974E-6 : f32
    %244 = vector.broadcast %cst_85 : f32 to vector<32x1xf32>
    %245 = arith.addf %241, %244 : vector<32x1xf32>
    %246 = math.rsqrt %245 : vector<32x1xf32>
    %247 = vector.broadcast %246 : vector<32x1xf32> to vector<32x32xf32>
    %248 = arith.mulf %243, %247 : vector<32x32xf32>
    %249 = vector.broadcast %156 : vector<1x32xf32> to vector<32x32xf32>
    %250 = arith.mulf %248, %249 : vector<32x32xf32>
    %251 = vector.broadcast %157 : vector<1x32xf32> to vector<32x32xf32>
    %252 = arith.addf %250, %251 : vector<32x32xf32>
    %cst_86 = arith.constant dense<0.000000e+00> : vector<32x32xf32>
    %253 = tpu.matmul %252, %150, %cst_86 {dimension_numbers = #tpu.dot_dimension_numbers<[1], [0], [0], [1], [0, 0, 1, 1], [], []>} : vector<32x32xf32>, vector<32x32xf32>, vector<32x32xf32> -> vector<32x32xf32>
    %254 = vector.broadcast %154 : vector<1x32xf32> to vector<32x32xf32>
    %255 = arith.addf %253, %254 : vector<32x32xf32>
    %cst_87 = arith.constant 0.000000e+00 : f32
    %256 = vector.broadcast %cst_87 : f32 to vector<32x32xf32>
    %257 = arith.maximumf %255, %256 : vector<32x32xf32>
    %cst_88 = arith.constant dense<0.000000e+00> : vector<32x32xf32>
    %258 = tpu.matmul %257, %151, %cst_88 {dimension_numbers = #tpu.dot_dimension_numbers<[1], [0], [0], [1], [0, 0, 1, 1], [], []>} : vector<32x32xf32>, vector<32x32xf32>, vector<32x32xf32> -> vector<32x32xf32>
    %259 = vector.broadcast %155 : vector<1x32xf32> to vector<32x32xf32>
    %260 = arith.addf %258, %259 : vector<32x32xf32>
    %261 = arith.addf %252, %260 : vector<32x32xf32>
    %cst_89 = arith.constant dense<0.000000e+00> : vector<32xf32>
    %262 = vector.multi_reduction <add>, %261, %cst_89 [1] : vector<32x32xf32> to vector<32xf32>
    %263 = vector.shape_cast %262 : vector<32xf32> to vector<32x1xf32>
    %cst_90 = arith.constant 3.200000e+01 : f32
    %264 = vector.broadcast %cst_90 : f32 to vector<32x1xf32>
    %265 = arith.divf %263, %264 : vector<32x1xf32>
    %266 = vector.broadcast %265 : vector<32x1xf32> to vector<32x32xf32>
    %267 = arith.subf %261, %266 : vector<32x32xf32>
    %268 = arith.mulf %267, %267 : vector<32x32xf32>
    %cst_91 = arith.constant dense<0.000000e+00> : vector<32xf32>
    %269 = vector.multi_reduction <add>, %268, %cst_91 [1] : vector<32x32xf32> to vector<32xf32>
    %270 = vector.shape_cast %269 : vector<32xf32> to vector<32x1xf32>
    %cst_92 = arith.constant 3.200000e+01 : f32
    %271 = vector.broadcast %cst_92 : f32 to vector<32x1xf32>
    %272 = arith.divf %270, %271 : vector<32x1xf32>
    %273 = vector.broadcast %265 : vector<32x1xf32> to vector<32x32xf32>
    %274 = arith.subf %261, %273 : vector<32x32xf32>
    %cst_93 = arith.constant 9.99999974E-6 : f32
    %275 = vector.broadcast %cst_93 : f32 to vector<32x1xf32>
    %276 = arith.addf %272, %275 : vector<32x1xf32>
    %277 = math.rsqrt %276 : vector<32x1xf32>
    %278 = vector.broadcast %277 : vector<32x1xf32> to vector<32x32xf32>
    %279 = arith.mulf %274, %278 : vector<32x32xf32>
    %280 = vector.broadcast %158 : vector<1x32xf32> to vector<32x32xf32>
    %281 = arith.mulf %279, %280 : vector<32x32xf32>
    %282 = vector.broadcast %159 : vector<1x32xf32> to vector<32x32xf32>
    %283 = arith.addf %281, %282 : vector<32x32xf32>
    %284 = vector.shape_cast %283 : vector<32x32xf32> to vector<4x8x32xf32>
    %285 = vector.shape_cast %4 : vector<1x32xf32> to vector<1x1x32xf32>
    %286 = vector.broadcast %285 : vector<1x1x32xf32> to vector<4x8x32xf32>
    %287 = arith.mulf %284, %286 : vector<4x8x32xf32>
    %cst_94 = arith.constant dense<0.000000e+00> : vector<4x8xf32>
    %288 = vector.multi_reduction <add>, %287, %cst_94 [2] : vector<4x8x32xf32> to vector<4x8xf32>
    %289 = vector.broadcast %5 : vector<1x1xf32> to vector<4x8xf32>
    %290 = arith.addf %288, %289 : vector<4x8xf32>
    %cst_95 = arith.constant dense<0xFF800000> : vector<4xf32>
    %291 = vector.multi_reduction <maximumf>, %290, %cst_95 [1] : vector<4x8xf32> to vector<4xf32>
    %292 = vector.shape_cast %291 : vector<4xf32> to vector<4x1xf32>
    %293 = tpu.iota {dimensions = array<i32: 1>} : vector<4x8xi32>
    %294 = vector.broadcast %292 : vector<4x1xf32> to vector<4x8xf32>
    %295 = arith.cmpf oeq, %290, %294 : vector<4x8xf32>
    %c8_i32 = arith.constant 8 : i32
    %296 = vector.broadcast %c8_i32 : i32 to vector<4x8xi32>
    %297 = arith.select %295, %293, %296 : vector<4x8xi1>, vector<4x8xi32>
    %cst_96 = arith.constant dense<2147483647> : vector<4xi32>
    %298 = vector.multi_reduction <minsi>, %297, %cst_96 [1] : vector<4x8xi32> to vector<4xi32>
    %299 = vector.shape_cast %298 : vector<4xi32> to vector<4x1xi32>
    %300 = vector.broadcast %299 : vector<4x1xi32> to vector<4x8xi32>
    %301 = arith.cmpi eq, %293, %300 : vector<4x8xi32>
    %302 = arith.extui %301 : vector<4x8xi1> to vector<4x8xi32>
    %303 = arith.sitofp %302 : vector<4x8xi32> to vector<4x8xf32>
    %304 = tpu.transpose %303, [1, 0] : vector<4x8xf32> -> vector<8x4xf32>
    %c0_97 = arith.constant 0 : index
    %c0_98 = arith.constant 0 : index
    %305 = vector.load %arg3[%c0_97, %c0_98] : memref<8x4xf32, #tpu.memory_space<vmem>>, vector<8x4xf32>
    tpu.vector_store %arg3[%c0_97, %c0_98], %304 {strides = array<i32>} : memref<8x4xf32, #tpu.memory_space<vmem>>, vector<8x4xf32>,
    return
  }
  func.func @transform_0(%arg0: i32) -> (i32, i32, i32) {
    %c0_i32 = arith.constant 0 : i32
    %c0_i32_0 = arith.constant 0 : i32
    %c0_i32_1 = arith.constant 0 : i32
    return %arg0, %c0_i32, %c0_i32_0 : i32, i32, i32
  }
  func.func @transform_1(%arg0: i32) -> (i32, i32) {
    %c0_i32 = arith.constant 0 : i32
    %c0_i32_0 = arith.constant 0 : i32
    %c0_i32_1 = arith.constant 0 : i32
    return %c0_i32, %c0_i32_0 : i32, i32
  }
  func.func @transform_2(%arg0: i32) -> (i32, i32) {
    %c0_i32 = arith.constant 0 : i32
    %c0_i32_0 = arith.constant 0 : i32
    return %c0_i32, %arg0 : i32, i32
  }
}

</mosaic_0001>

<bundles_post_ra>
// kernel: tpu_custom_call.1
= control target key start
LH: loop header
LB: loop body
LE: loop exit
PB: predicated region body
PF: predicated region fallthrough
CT: control target
= control target key end

     0   :  { %7 = vsyncpa [#allocation3], 0  ;;  %s8860_s0 = inlined_call_operand.hbm [shape: f32[4,8,64], index: 0, kind: input, shape index: {}]   ;;  %s8861_s1 = inlined_call_operand.hbm [shape: f32[344,128], index: 1, kind: input, shape index: {}]   ;;  %s8862_s2 = inlined_call_operand.vmem [shape: f32[8,4], index: 2, kind: output, shape index: {}]  }
   0x1   :  { %8 = vsyncpa [#allocation5], 0  ;;  %s8018_s9 = smov [#allocation2]   ;;  %s7970_s13 = scalar_lea.hbm %s8860_s0, 512 }
   0x2   :  { %s14_s10 = sshll.u32 %s8018_s9, 4  ;;  %p7971_p0 = scmp.ne.s32.totalorder %s8860_s0, %s7970_s13  ;;  %s15_s10 = int_to_ptr.vmem [resolvable:$true] %s14_s10 }
   0x3   :  { %p7974_p1 = scmp.lt.u32.totalorder %s7970_s13, %s8860_s0 }
   0x5   :  { %p7976_p2 = pnand %p7974_p1, %p7971_p0 }
   0x7   :  { %7979 = shalt.err (!%p7976_p2)
}
   0x8   :  { %s7980_s18 = scalar_lea.vmem %s15_s10, 512  ;;  %p7985_p4 = scmp.lt.s32.totalorder %s15_s10, %s15_s10 }
   0x9   :  { %p7981_p3 = scmp.ne.s32.totalorder %s15_s10, %s7980_s18  ;;  %p7986_p5 = scmp.lt.s32.totalorder %s7980_s18, %s7980_s18 }
   0xb   :  { %p7987_p6 = por %p7986_p5, %p7985_p4 }
   0xd   :  { %p7988_p7 = pnand %p7987_p6, %p7981_p3 }
   0xf   :  { %7991 = shalt.err (!%p7988_p7)
}
  0x10   :  { %s8019_s19 = smov 128   ;;  %s8020_s20 = smov 8  }
  0x11   :  { %20 = dma.hbm_to_vmem [thread:$0]  %s8860_s0, 512, %s15_s10, [#allocation3], %s8019_s19, %s8019_s19, %s8020_s20  }
  0x12   :  { %s8021_s23 = smov [#allocation4]   ;;  %s7992_s27 = scalar_lea.hbm %s8861_s1, 5504 }
  0x13   :  { %s26_s24 = sshll.u32 %s8021_s23, 4  ;;  %p7993_p8 = scmp.ne.s32.totalorder %s8861_s1, %s7992_s27  ;;  %s27_s24 = int_to_ptr.vmem [resolvable:$true] %s26_s24 }
  0x14   :  { %p7996_p9 = scmp.lt.u32.totalorder %s7992_s27, %s8861_s1 }
  0x16   :  { %p7998_p10 = pnand %p7996_p9, %p7993_p8 }
  0x18   :  { %8001 = shalt.err (!%p7998_p10)
}
  0x19   :  { %s8002_s4 = scalar_lea.vmem %s27_s24, 5504  ;;  %p8007_p12 = scmp.lt.s32.totalorder %s27_s24, %s27_s24 }
  0x1a   :  { %p8003_p11 = scmp.ne.s32.totalorder %s27_s24, %s8002_s4  ;;  %p8008_p13 = scmp.lt.s32.totalorder %s8002_s4, %s8002_s4 }
  0x1c   :  { %p8009_p0 = por %p8008_p13, %p8007_p12 }
  0x1e   :  { %p8010_p1 = pnand %p8009_p0, %p8003_p11 }
  0x20   :  { %8013 = shalt.err (!%p8010_p1)
}
  0x21   :  { %32 = dma.hbm_to_vmem [thread:$0]  %s8861_s1, 5504, %s27_s24, [#allocation5], %s8019_s19, %s8019_s19, %s8020_s20  }
  0x22   :  { %8014 = dma.done.wait [#allocation3], 512  }
  0x23   :  { %8015 = vsyncadd [#allocation3], 4294966784 }
  0x24   :  { %8016 = dma.done.wait [#allocation5], 5504  }
  0x25   :  { %8017 = vsyncadd [#allocation5], 4294961792  ;;  %v47_v0 = vld [vmem:[#allocation4] sm:$0xff]  ;;  %v48_v1 = vld [vmem:[#allocation4 + $0x8] sm:$0xff]  ;;  %vm59_vm0 = vcmask 523264   ;;  %vm193_vm1 = vcmask 261120  }
  0x26   :  { %v49_v2 = vld [vmem:[#allocation4 + $0x10] sm:$0xff]  ;;  %v7706_v3 = vpack.c.bf16 %v48_v1, %v47_v0  ;;  %v50_v4 = vld [vmem:[#allocation4 + $0x18] sm:$0xff]  ;;  %v51_v6 = vld [vmem:[#allocation4 + $0x20] sm:$0xff]  ;;  %v8022_v36 = vmov 0.0   ;;  %vm8023_vm2 = vmmov 0   ;;  %s8024_s1 = smov 96  }
  0x27   :  { %v7710_v5 = vpack.c.bf16 %v50_v4, %v49_v2  ;;  %v52_v7 = vld [vmem:[#allocation4 + $0x28] sm:$0xff]  ;;  %v39_v8 = vld [vmem:[#allocation2] sm:$0xff]  ;;  %v53_v13 = vld [vmem:[#allocation4 + $0x30] sm:$0xff]  ;;  %vm294_vm3 = vcmask 64512   ;;  %s8025_s6 = smov 64   ;;  %s8026_s7 = smov 88  }
  0x28   :  { %7707 = vmatprep.subr.bf16.mxu0 %v7706_v3  ;;  %7268 = vmatprep.mubr.msk.f32.mxu0 %vm59_vm0, %v39_v8  ;;  %v165_v9 = vld [vmem:[#allocation4 + $0x40] sm:$0xff]  ;;  %v166_v10 = vld [vmem:[#allocation4 + $0x48] sm:$0xff]  ;;  %v7714_v11 = vpack.c.bf16 %v52_v7, %v51_v6  ;;  %v54_v14 = vld [vmem:[#allocation4 + $0x38] sm:$0xff]  ;;  %s8027_s8 = smov 120   ;;  %s8028_s9 = smov 56   ;;  %vm2980_vm4 = vcmask 130048  }
  0x29   :  { %7709 = vmatpush3.bf16.msra.mxu0 %v7706_v3  ;;  %v7722_v12 = vpack.c.bf16 %v166_v10, %v165_v9  ;;  %v7718_v15 = vpack.c.bf16 %v54_v14, %v53_v13  ;;  %v40_v16 = vld [vmem:[#allocation2 + $0x8] sm:$0xff]  ;;  %v41_v17 = vld [vmem:[#allocation2 + $0x10] sm:$0xff]  ;;  %v42_v18 = vld [vmem:[#allocation2 + $0x18] sm:$0xff]  ;;  %s8029_s10 = smov 80   ;;  %s8030_s11 = smov 112   ;;  %vm2985_vm5 = vcmask 195584  }
  0x2a   :  { %7711 = vmatprep.subr.bf16.mxu0 %v7710_v5  ;;  %v167_v19 = vld [vmem:[#allocation4 + $0x50] sm:$0xff]  ;;  %v168_v20 = vld [vmem:[#allocation4 + $0x58] sm:$0xff]  ;;  %v6896_v22 = vld [vmem:[#allocation4 + $0x140] ss:$0 sm:$0xff]  ;;  %s8031_s12 = smov 48   ;;  %s8032_s13 = smov 72  }
  0x2b   :  { %7723 = vmatprep.subr.bf16.mxu1 %v7722_v12  ;;  %v7726_v21 = vpack.c.bf16 %v168_v20, %v167_v19  ;;  %v6901_v24 = vld [vmem:[#allocation4 + $0x141] ss:$0 sm:$0xff]  ;;  %v6902_v37 = vld [vmem:[#allocation4 + $0x144] ss:$0 sm:$0xff]  ;;  %s8033_s14 = smov 104   ;;  %s8034_s15 = smov 40  }
  0x2c   :  { %7725 = vmatpush3.bf16.msra.mxu1 %v7722_v12  ;;  %s8035_s16 = smov 16   ;;  %s8036_s17 = smov 24   ;;  %vm6764_vm6 = vcmask 1041409   ;;  %vm6766_vm7 = vcmask 1042434   ;;  %vm6768_vm8 = vcmask 1043459   ;;  %vm6771_vm9 = vcmask 60416  }
  0x2d   :  { %7713 = vmatpush3.bf16.msra.mxu0 %v7710_v5  ;;  %7727 = vmatprep.subr.bf16.mxu1 %v7726_v21 }
  0x2e   :  { %7715 = vmatprep.subr.bf16.mxu0 %v7714_v11 }
  0x30   :  { %7729 = vmatpush3.bf16.msra.mxu1 %v7726_v21 }
  0x31   :  { %7717 = vmatpush3.bf16.msra.mxu0 %v7714_v11  ;;  %7288 = vmatprep.subr.mxu1 %v8022_v36 }
  0x32   :  { %7719 = vmatprep.subr.bf16.mxu0 %v7718_v15 }
  0x35   :  { %7721 = vmatpush3.bf16.msra.mxu0 %v7718_v15 }
  0x36   :  { %7308 = vmatprep.subr.mxu0 %v8022_v36 }
  0x38   :  { %7269 = vmatmul.mubr.msk.f32.vlgmr.msra.gmra.mrb[0].mxu0 %vm59_vm0, %v40_v16 }
  0x39   :  { %7271 = vmatprep.mubr.msk.f32.mxu0 %vm59_vm0, %v41_v17 }
  0x3c   :  { %7272 = vmatmul.mubr.msk.f32.gmra.mrb[2].mxu0 %vm59_vm0, %v42_v18  ;;  %vm6888_vm0 = vcmask 31744  }
  0x3d   :  { %7310 = vmatprep.mubr.msk.f32.mxu0 %vm8023_vm2, %v8022_v36 }
 0x10b   :  { %v7270_v23 = vpop.f32.mrb[0].mxu0 }
 0x10c   :  { %v144_v25 = vadd.f32 %v7270_v23, %v6896_v22  ;;  %v138_v26 = vpop.f32.mrb[1].mxu0 }
 0x10d   :  { %v139_v27 = vadd.f32 %v6896_v22, %v138_v26 }
 0x10e   :  { %v8085_v30 = vadd.f32 %v6901_v24, %v144_v25 }
 0x10f   :  { %v7273_v28 = vpop.f32.mrb[2].mxu0  ;;  %v8083_v29 = vadd.f32 %v6901_v24, %v139_v27 }
 0x110   :  { %v154_v31 = vadd.f32 %v7273_v28, %v6896_v22  ;;  %v148_v32 = vpop.f32.mrb[3].mxu0 }
 0x111   :  { %v149_v33 = vadd.f32 %v6896_v22, %v148_v32  ;;  %7282 = vmatprep.mubr.msk.f32.mxu1 %vm193_vm1, %v8083_v29 }
 0x112   :  { %v8089_v34 = vadd.f32 %v6901_v24, %v154_v31  ;;  %7283 = vmatmul.mubr.msk.f32.vlgmr.msra.gmra.mrb[0].mxu1 %vm193_vm1, %v8085_v30 }
 0x113   :  { %v8093_v35 = vadd.f32 %v6901_v24, %v149_v33 }
 0x115   :  { %7285 = vmatprep.mubr.msk.f32.mxu1 %vm193_vm1, %v8093_v35 }
 0x116   :  { %7286 = vmatmul.mubr.msk.f32.gmra.mrb[2].mxu1 %vm193_vm1, %v8089_v34 }
 0x117   :  { %7290 = vmatprep.mubr.msk.f32.mxu1 %vm8023_vm2, %v8022_v36 }
 0x1e5   :  { %v7284_v38 = vpop.f32.mrb[0].mxu1 }
 0x1e6   :  { %v272_v39 = vpop.f32.mrb[1].mxu1  ;;  %v8109_v43 = vadd.f32 %v7284_v38, %v6902_v37 }
 0x1e7   :  { %v8105_v40 = vadd.f32 %v6902_v37, %v272_v39 }
 0x1e9   :  { %v7287_v41 = vpop.f32.mrb[2].mxu1  ;;  %292 = vrot.lane.b32.xlu0 %v8105_v40, %s8024_s1 }
 0x1ea   :  { %v282_v42 = vpop.f32.mrb[3].mxu1  ;;  %v8117_v45 = vadd.f32 %v7287_v41, %v6902_v37 }
 0x1eb   :  { %v8111_v44 = vadd.f32 %v6902_v37, %v282_v42 }
 0x1ed   :  { %447 = vrot.lane.b32.xlu1 %v8111_v44, %s8024_s1  ;;  %370 = vrot.lane.b32.xlu0 %v8109_v43, %s8024_s1 }
 0x1f1   :  { %524 = vrot.lane.b32.xlu1 %v8117_v45, %s8024_s1 }
 0x25b   :  { %v293_v46 = vpop.permute.xlu0 %292 }
 0x25c   :  { %7289 = vmatpush3.xpose.msk.msra.mxu1 %vm294_vm3, %v293_v46 }
 0x25d   :  { %7293 = vmatprep.subr.mxu1 %v8022_v36 }
 0x25f   :  { %7291 = vmatmul.mubr.msk.f32.vlgmr.msra.gmra.mrb[4].mxu1 %vm294_vm3, %v8105_v40  ;;  %v371_v47 = vpop.permute.xlu0 %370  ;;  %v448_v48 = vpop.permute.xlu1 %447 }
 0x260   :  { %7294 = vmatpush3.xpose.msk.msra.mxu1 %vm294_vm3, %v371_v47  ;;  %7295 = vmatprep.mubr.msk.f32.mxu1 %vm8023_vm2, %v8022_v36 }
 0x261   :  { %7298 = vmatprep.subr.mxu1 %v8022_v36 }
 0x263   :  { %7296 = vmatmul.mubr.msk.f32.vlgmr.msra.gmra.mrb[6].mxu1 %vm294_vm3, %v8109_v43  ;;  %v525_v49 = vpop.permute.xlu1 %524 }
 0x264   :  { %7299 = vmatpush3.xpose.msk.msra.mxu1 %vm294_vm3, %v448_v48  ;;  %7300 = vmatprep.mubr.msk.f32.mxu1 %vm8023_vm2, %v8022_v36 }
 0x265   :  { %7303 = vmatprep.subr.mxu1 %v8022_v36 }
 0x267   :  { %7301 = vmatmul.mubr.msk.f32.vlgmr.msra.gmra.mrb[8].mxu1 %vm294_vm3, %v8111_v44 }
 0x268   :  { %7304 = vmatpush3.xpose.msk.msra.mxu1 %vm294_vm3, %v525_v49  ;;  %7305 = vmatprep.mubr.msk.f32.mxu1 %vm8023_vm2, %v8022_v36 }
 0x269   :  { %7313 = vmatprep.subr.mxu1 %v8022_v36 }
 0x26b   :  { %7306 = vmatmul.mubr.msk.f32.vlgmr.msra.gmra.mrb[10].mxu1 %vm294_vm3, %v8117_v45 }
 0x26c   :  { %7315 = vmatprep.mubr.msk.f32.mxu1 %vm8023_vm2, %v8022_v36 }
 0x332   :  { %v365_v50 = vpop.f32.mrb[4].mxu1 }
 0x333   :  { %v7292_v51 = vpop.f32.mrb[5].mxu1  ;;  %v600_v52 = vsel %vm294_vm3, %v365_v50, -inf }
 0x334   :  { %601 = vmax.xlane.f32.xlu0 %v600_v52 }
 0x336   :  { %v442_v53 = vpop.f32.mrb[6].mxu1 }
 0x337   :  { %v7297_v54 = vpop.f32.mrb[7].mxu1  ;;  %v603_v55 = vsel %vm294_vm3, %v442_v53, -inf }
 0x338   :  { %604 = vmax.xlane.f32.xlu1 %v603_v55 }
 0x33a   :  { %v519_v56 = vpop.f32.mrb[8].mxu1 }
 0x33b   :  { %v7302_v57 = vpop.f32.mrb[9].mxu1  ;;  %v606_v58 = vsel %vm294_vm3, %v519_v56, -inf }
 0x33c   :  { %607 = vmax.xlane.f32.xlu0 %v606_v58 }
 0x33e   :  { %v596_v59 = vpop.f32.mrb[10].mxu1 }
 0x33f   :  { %v7307_v60 = vpop.f32.mrb[11].mxu1  ;;  %v609_v61 = vsel %vm294_vm3, %v596_v59, -inf }
 0x340   :  { %610 = vmax.xlane.f32.xlu0 %v609_v61 }
 0x349   :  { %644 = vrot.lane.b32.xlu1 %v8105_v40, %s8025_s6 }
 0x34d   :  { %796 = vrot.lane.b32.xlu1 %v8111_v44, %s8025_s6 }
 0x351   :  { %872 = vrot.lane.b32.xlu1 %v8117_v45, %s8025_s6 }
 0x355   :  { %1028 = vrot.lane.b32.xlu1 %v8109_v43, %s8026_s7 }
 0x356   :  { %720 = vrot.lane.b32.xlu0 %v8109_v43, %s8025_s6 }
 0x35a   :  { %950 = vrot.lane.b32.xlu0 %v8105_v40, %s8026_s7 }
 0x3c1   :  { %v602_v62 = vpop.xlane.xlu0 %601 }
 0x3c2   :  { %v612_v63 = vsub.f32 %v365_v50, %v602_v62 }
 0x3c4   :  { %v616_v0 = vmul.f32 1.442695, %v612_v63 }
 0x3c5   :  { %v605_v1 = vpop.xlane.xlu1 %604 }
 0x3c6   :  { %7810 = vpow2.f32 %v616_v0  ;;  %v613_v2 = vsub.f32 %v442_v53, %v605_v1 }
 0x3c8   :  { %v618_v3 = vmul.f32 1.442695, %v613_v2 }
 0x3c9   :  { %v645_v4 = vpop.permute.xlu1 %644  ;;  %v608_v5 = vpop.xlane.xlu0 %607 }
 0x3ca   :  { %7812 = vpow2.f32 %v618_v3  ;;  %v614_v6 = vsub.f32 %v519_v56, %v608_v5  ;;  %7309 = vmatpush3.msra.mxu0 %v645_v4 }
 0x3cb   :  { %7318 = vmatprep.subr.mxu0 %v8022_v36 }
 0x3cc   :  { %v620_v7 = vmul.f32 1.442695, %v614_v6 }
 0x3cd   :  { %v611_v8 = vpop.xlane.xlu0 %610  ;;  %v797_v20 = vpop.permute.xlu1 %796 }
 0x3ce   :  { %7814 = vpow2.f32 %v620_v7  ;;  %v615_v9 = vsub.f32 %v596_v59, %v611_v8 }
 0x3d0   :  { %v7811_v10 = vpop.eup %7810  ;;  %v622_v11 = vmul.f32 1.442695, %v615_v9 }
 0x3d1   :  { %v721_v12 = vpop.permute.xlu0 %720  ;;  %v624_v13 = vsel %vm294_vm3, %v7811_v10, 0.0  ;;  %v873_v21 = vpop.permute.xlu1 %872 }
 0x3d2   :  { %7816 = vpow2.f32 %v622_v11  ;;  %625 = vadd.xlane.f32.xlu1 %v624_v13  ;;  %7314 = vmatpush3.msra.mxu1 %v721_v12 }
 0x3d3   :  { %7323 = vmatprep.subr.mxu1 %v8022_v36 }
 0x3d4   :  { %v7813_v14 = vpop.eup %7812 }
 0x3d5   :  { %v627_v15 = vsel %vm294_vm3, %v7813_v14, 0.0  ;;  %v1029_v22 = vpop.permute.xlu1 %1028  ;;  %v951_v23 = vpop.permute.xlu0 %950 }
 0x3d6   :  { %628 = vadd.xlane.f32.xlu0 %v627_v15 }
 0x3d8   :  { %v7815_v16 = vpop.eup %7814 }
 0x3d9   :  { %v630_v17 = vsel %vm294_vm3, %v7815_v16, 0.0 }
 0x3da   :  { %631 = vadd.xlane.f32.xlu1 %v630_v17 }
 0x3dc   :  { %v7817_v18 = vpop.eup %7816 }
 0x3dd   :  { %v633_v19 = vsel %vm294_vm3, %v7817_v18, 0.0 }
 0x3de   :  { %634 = vadd.xlane.f32.xlu0 %v633_v19 }
 0x3eb   :  { %1026 = vrot.lane.b32.xlu1 %v8109_v43, %s8027_s8 }
 0x3ef   :  { %1184 = vrot.lane.b32.xlu1 %v8117_v45, %s8026_s7 }
 0x3f3   :  { %1182 = vrot.lane.b32.xlu1 %v8117_v45, %s8027_s8 }
 0x3f4   :  { %948 = vrot.lane.b32.xlu0 %v8105_v40, %s8027_s8 }
 0x3f8   :  { %1106 = vrot.lane.b32.xlu0 %v8111_v44, %s8026_s7 }
 0x3fc   :  { %1104 = vrot.lane.b32.xlu0 %v8111_v44, %s8027_s8 }
 0x45f   :  { %v626_v24 = vpop.xlane.xlu1 %625 }
 0x460   :  { %7818 = vrcp.f32 %v626_v24 }
 0x463   :  { %v629_v25 = vpop.xlane.xlu0 %628 }
 0x464   :  { %7820 = vrcp.f32 %v629_v25 }
 0x467   :  { %v632_v26 = vpop.xlane.xlu1 %631 }
 0x468   :  { %7822 = vrcp.f32 %v632_v26 }
 0x46a   :  { %v7819_v27 = vpop.eup %7818 }
 0x46b   :  { %v637_v28 = vmul.f32 %v7819_v27, %v7811_v10  ;;  %v635_v31 = vpop.xlane.xlu0 %634  ;;  %v1027_v41 = vpop.permute.xlu1 %1026 }
 0x46c   :  { %7824 = vrcp.f32 %v635_v31 }
 0x46d   :  { %7311 = vmatmul.mubr.msk.f32.vlgmr.msra.gmra.mrb[4].mxu0 %vm294_vm3, %v637_v28 }
 0x46e   :  { %v7821_v32 = vpop.eup %7820  ;;  %7319 = vmatpush3.msra.mxu0 %v797_v20  ;;  %7320 = vmatprep.mubr.msk.f32.mxu0 %vm8023_vm2, %v8022_v36 }
 0x46f   :  { %v639_v33 = vmul.f32 %v7821_v32, %v7813_v14  ;;  %7328 = vmatprep.subr.mxu0 %v8022_v36  ;;  %v949_v37 = vpop.permute.xlu0 %948  ;;  %v1185_v48 = vpop.permute.xlu1 %1184 }
 0x471   :  { %7316 = vmatmul.mubr.msk.f32.vlgmr.msra.gmra.mrb[12].mxu1 %vm294_vm3, %v639_v33 }
 0x472   :  { %v7823_v38 = vpop.eup %7822  ;;  %7324 = vmatpush3.msra.mxu1 %v873_v21  ;;  %7325 = vmatprep.mubr.msk.f32.mxu1 %vm8023_vm2, %v8022_v36 }
 0x473   :  { %v641_v39 = vmul.f32 %v7823_v38, %v7815_v16  ;;  %7333 = vmatprep.subr.mxu1 %v8022_v36  ;;  %v1107_v46 = vpop.permute.xlu0 %1106  ;;  %v1183_v50 = vpop.permute.xlu1 %1182 }
 0x475   :  { %7321 = vmatmul.mubr.msk.f32.vlgmr.msra.gmra.mrb[6].mxu0 %vm294_vm3, %v641_v39 }
 0x476   :  { %v7825_v42 = vpop.eup %7824  ;;  %7329 = vmatpush3.xpose.msk.msra.mxu0 %vm294_vm3, %v951_v23  ;;  %7330 = vmatprep.mubr.msk.f32.mxu0 %vm8023_vm2, %v8022_v36 }
 0x477   :  { %7338 = vmatprep.subr.mxu0 %v8022_v36  ;;  %v643_v47 = vmul.f32 %v7825_v42, %v7817_v18  ;;  %v1105_v49 = vpop.permute.xlu0 %1104 }
 0x479   :  { %7326 = vmatmul.mubr.msk.f32.vlgmr.msra.gmra.mrb[14].mxu1 %vm294_vm3, %v643_v47  ;;  %7331 = vmatmul.mubr.msk.f32.vlgmr.msra.gmra.mrb[8].mxu0 %vm294_vm3, %v949_v37 }
 0x47a   :  { %7334 = vmatpush3.xpose.msk.msra.mxu1 %vm294_vm3, %v1029_v22  ;;  %7339 = vmatpush3.xpose.msk.msra.mxu0 %vm294_vm3, %v1107_v46 }
 0x47b   :  { %7335 = vmatprep.mubr.msk.f32.mxu1 %vm8023_vm2, %v8022_v36  ;;  %7340 = vmatprep.mubr.msk.f32.mxu0 %vm8023_vm2, %v8022_v36 }
 0x47c   :  { %7343 = vmatprep.subr.mxu1 %v8022_v36  ;;  %7348 = vmatprep.subr.mxu0 %v8022_v36 }
 0x47d   :  { %7336 = vmatmul.mubr.msk.f32.vlgmr.msra.gmra.mrb[16].mxu1 %vm294_vm3, %v1027_v41  ;;  %7341 = vmatmul.mubr.msk.f32.vlgmr.msra.gmra.mrb[10].mxu0 %vm294_vm3, %v1105_v49 }
 0x47e   :  { %7344 = vmatpush3.xpose.msk.msra.mxu1 %vm294_vm3, %v1185_v48  ;;  %7345 = vmatprep.mubr.msk.f32.mxu1 %vm8023_vm2, %v8022_v36 }
 0x47f   :  { %7353 = vmatprep.subr.mxu1 %v8022_v36  ;;  %7350 = vmatprep.mubr.msk.f32.mxu0 %vm8023_vm2, %v8022_v36 }
 0x481   :  { %7346 = vmatmul.mubr.msk.f32.vlgmr.msra.gmra.mrb[18].mxu1 %vm294_vm3, %v1183_v50 }
 0x482   :  { %7355 = vmatprep.mubr.msk.f32.mxu1 %vm8023_vm2, %v8022_v36 }
 0x540   :  { %v8213_v51 = vpop.f32.mrb[4].mxu0 }
 0x541   :  { %v7312_v52 = vpop.f32.mrb[5].mxu0 }
 0x544   :  { %v8215_v53 = vpop.f32.mrb[12].mxu1 }
 0x545   :  { %v7317_v54 = vpop.f32.mrb[13].mxu1 }
 0x548   :  { %v8217_v55 = vpop.f32.mrb[6].mxu0 }
 0x549   :  { %v7322_v56 = vpop.f32.mrb[7].mxu0 }
 0x54c   :  { %v8219_v57 = vpop.f32.mrb[14].mxu1  ;;  %v1022_v58 = vpop.f32.mrb[8].mxu0 }
 0x54d   :  { %v7327_v59 = vpop.f32.mrb[15].mxu1  ;;  %v7332_v60 = vpop.f32.mrb[9].mxu0  ;;  %v1260_v61 = vsel %vm294_vm3, %v1022_v58, -inf }
 0x54e   :  { %1261 = vmax.xlane.f32.xlu0 %v1260_v61 }
 0x550   :  { %v1100_v62 = vpop.f32.mrb[16].mxu1  ;;  %v1178_v63 = vpop.f32.mrb[10].mxu0 }
 0x551   :  { %v7337_v0 = vpop.f32.mrb[17].mxu1  ;;  %v7342_v1 = vpop.f32.mrb[11].mxu0  ;;  %v1263_v2 = vsel %vm294_vm3, %v1100_v62, -inf  ;;  %v1266_v3 = vsel %vm294_vm3, %v1178_v63, -inf }
 0x552   :  { %1264 = vmax.xlane.f32.xlu1 %v1263_v2  ;;  %1267 = vmax.xlane.f32.xlu0 %v1266_v3 }
 0x554   :  { %v1256_v4 = vpop.f32.mrb[18].mxu1 }
 0x555   :  { %v7347_v5 = vpop.f32.mrb[19].mxu1  ;;  %v1269_v6 = vsel %vm294_vm3, %v1256_v4, -inf }
 0x556   :  { %1270 = vmax.xlane.f32.xlu0 %v1269_v6 }
 0x563   :  { %1304 = vrot.lane.b32.xlu1 %v8105_v40, %s8028_s9 }
 0x567   :  { %1456 = vrot.lane.b32.xlu1 %v8111_v44, %s8028_s9 }
 0x56b   :  { %1532 = vrot.lane.b32.xlu1 %v8117_v45, %s8028_s9 }
 0x56c   :  { %1380 = vrot.lane.b32.xlu0 %v8109_v43, %s8028_s9 }
 0x56f   :  { %1688 = vrot.lane.b32.xlu1 %v8109_v43, %s8029_s10 }
 0x570   :  { %1610 = vrot.lane.b32.xlu0 %v8105_v40, %s8029_s10 }
 0x5db   :  { %v1262_v7 = vpop.xlane.xlu0 %1261 }
 0x5dc   :  { %v1272_v8 = vsub.f32 %v1022_v58, %v1262_v7 }
 0x5de   :  { %v1276_v9 = vmul.f32 1.442695, %v1272_v8 }
 0x5df   :  { %v1265_v10 = vpop.xlane.xlu1 %1264  ;;  %v1268_v11 = vpop.xlane.xlu0 %1267 }
 0x5e0   :  { %7826 = vpow2.f32 %v1276_v9  ;;  %v1273_v12 = vsub.f32 %v1100_v62, %v1265_v10  ;;  %v1274_v13 = vsub.f32 %v1178_v63, %v1268_v11 }
 0x5e2   :  { %v1278_v14 = vmul.f32 1.442695, %v1273_v12  ;;  %v1280_v15 = vmul.f32 1.442695, %v1274_v13 }
 0x5e3   :  { %v1305_v16 = vpop.permute.xlu1 %1304  ;;  %v1271_v17 = vpop.xlane.xlu0 %1270 }
 0x5e4   :  { %7828 = vpow2.f32 %v1278_v14  ;;  %v1275_v18 = vsub.f32 %v1256_v4, %v1271_v17  ;;  %7349 = vmatpush3.msra.mxu0 %v1305_v16 }
 0x5e5   :  { %7830 = vpow2.f32 %v1280_v15  ;;  %7358 = vmatprep.subr.mxu0 %v8022_v36 }
 0x5e6   :  { %v1282_v19 = vmul.f32 1.442695, %v1275_v18 }
 0x5e7   :  { %v1381_v20 = vpop.permute.xlu0 %1380  ;;  %v1457_v31 = vpop.permute.xlu1 %1456 }
 0x5e8   :  { %7832 = vpow2.f32 %v1282_v19  ;;  %7354 = vmatpush3.msra.mxu1 %v1381_v20 }
 0x5e9   :  { %7363 = vmatprep.subr.mxu1 %v8022_v36 }
 0x5ea   :  { %v7827_v21 = vpop.eup %7826 }
 0x5eb   :  { %v1284_v22 = vsel %vm294_vm3, %v7827_v21, 0.0  ;;  %v1533_v32 = vpop.permute.xlu1 %1532  ;;  %v1611_v37 = vpop.permute.xlu0 %1610 }
 0x5ec   :  { %1285 = vadd.xlane.f32.xlu1 %v1284_v22 }
 0x5ee   :  { %v7829_v23 = vpop.eup %7828 }
 0x5ef   :  { %v7831_v24 = vpop.eup %7830  ;;  %v1287_v25 = vsel %vm294_vm3, %v7829_v23, 0.0  ;;  %v1689_v33 = vpop.permute.xlu1 %1688 }
 0x5f0   :  { %1288 = vadd.xlane.f32.xlu0 %v1287_v25  ;;  %v1290_v26 = vsel %vm294_vm3, %v7831_v24, 0.0 }
 0x5f1   :  { %1291 = vadd.xlane.f32.xlu1 %v1290_v26 }
 0x5f2   :  { %v7833_v27 = vpop.eup %7832 }
 0x5f3   :  { %v1293_v28 = vsel %vm294_vm3, %v7833_v27, 0.0 }
 0x5f4   :  { %1294 = vadd.xlane.f32.xlu0 %v1293_v28 }
 0x602   :  { %1686 = vrot.lane.b32.xlu1 %v8109_v43, %s8030_s11 }
 0x606   :  { %1844 = vrot.lane.b32.xlu1 %v8117_v45, %s8029_s10 }
 0x60a   :  { %1842 = vrot.lane.b32.xlu1 %v8117_v45, %s8030_s11  ;;  %1608 = vrot.lane.b32.xlu0 %v8105_v40, %s8030_s11 }
 0x60e   :  { %1766 = vrot.lane.b32.xlu0 %v8111_v44, %s8029_s10 }
 0x612   :  { %1764 = vrot.lane.b32.xlu0 %v8111_v44, %s8030_s11 }
 0x679   :  { %v1286_v38 = vpop.xlane.xlu1 %1285 }
 0x67a   :  { %7834 = vrcp.f32 %v1286_v38 }
 0x67d   :  { %v1289_v39 = vpop.xlane.xlu0 %1288 }
 0x67e   :  { %v1292_v41 = vpop.xlane.xlu1 %1291  ;;  %7836 = vrcp.f32 %v1289_v39 }
 0x67f   :  { %7838 = vrcp.f32 %v1292_v41 }
 0x681   :  { %v1295_v42 = vpop.xlane.xlu0 %1294 }
 0x682   :  { %7840 = vrcp.f32 %v1295_v42  ;;  %v1687_v58 = vpop.permute.xlu1 %1686 }
 0x684   :  { %v7835_v46 = vpop.eup %7834 }
 0x685   :  { %v1297_v47 = vmul.f32 %v7835_v46, %v7827_v21  ;;  %v1609_v50 = vpop.permute.xlu0 %1608 }
 0x686   :  { %v1845_v61 = vpop.permute.xlu1 %1844 }
 0x687   :  { %7351 = vmatmul.mubr.msk.f32.vlgmr.msra.gmra.mrb[12].mxu0 %vm294_vm3, %v1297_v47 }
 0x688   :  { %v7837_v48 = vpop.eup %7836  ;;  %7359 = vmatpush3.msra.mxu0 %v1457_v31  ;;  %7360 = vmatprep.mubr.msk.f32.mxu0 %vm8023_vm2, %v8022_v36 }
 0x689   :  { %v7839_v49 = vpop.eup %7838  ;;  %v1299_v52 = vmul.f32 %v7837_v48, %v7829_v23  ;;  %7368 = vmatprep.subr.mxu0 %v8022_v36  ;;  %v1767_v60 = vpop.permute.xlu0 %1766 }
 0x68a   :  { %v1301_v54 = vmul.f32 %v7839_v49, %v7831_v24  ;;  %v1843_v63 = vpop.permute.xlu1 %1842 }
 0x68b   :  { %7356 = vmatmul.mubr.msk.f32.vlgmr.msra.gmra.mrb[20].mxu1 %vm294_vm3, %v1299_v52 }
 0x68c   :  { %v7841_v56 = vpop.eup %7840  ;;  %7361 = vmatmul.mubr.msk.f32.vlgmr.msra.gmra.mrb[14].mxu0 %vm294_vm3, %v1301_v54  ;;  %7364 = vmatpush3.msra.mxu1 %v1533_v32 }
 0x68d   :  { %7365 = vmatprep.mubr.msk.f32.mxu1 %vm8023_vm2, %v8022_v36  ;;  %v1303_v59 = vmul.f32 %v7841_v56, %v7833_v27  ;;  %7370 = vmatprep.mubr.msk.f32.mxu0 %vm8023_vm2, %v8022_v36  ;;  %v1765_v62 = vpop.permute.xlu0 %1764 }
 0x68e   :  { %7373 = vmatprep.subr.mxu1 %v8022_v36 }
 0x68f   :  { %7369 = vmatpush3.xpose.msk.msra.mxu0 %vm294_vm3, %v1611_v37  ;;  %7366 = vmatmul.mubr.msk.f32.vlgmr.msra.gmra.mrb[22].mxu1 %vm294_vm3, %v1303_v59 }
 0x690   :  { %7378 = vmatprep.subr.mxu0 %v8022_v36  ;;  %7375 = vmatprep.mubr.msk.f32.mxu1 %vm8023_vm2, %v8022_v36 }
 0x692   :  { %7371 = vmatmul.mubr.msk.f32.vlgmr.msra.gmra.mrb[16].mxu0 %vm294_vm3, %v1609_v50 }
 0x693   :  { %7374 = vmatpush3.xpose.msk.msra.mxu1 %vm294_vm3, %v1689_v33  ;;  %7379 = vmatpush3.xpose.msk.msra.mxu0 %vm294_vm3, %v1767_v60 }
 0x694   :  { %7380 = vmatprep.mubr.msk.f32.mxu0 %vm8023_vm2, %v8022_v36  ;;  %7383 = vmatprep.subr.mxu1 %v8022_v36 }
 0x695   :  { %7388 = vmatprep.subr.mxu0 %v8022_v36 }
 0x696   :  { %7376 = vmatmul.mubr.msk.f32.vlgmr.msra.gmra.mrb[24].mxu1 %vm294_vm3, %v1687_v58  ;;  %7381 = vmatmul.mubr.msk.f32.vlgmr.msra.gmra.mrb[18].mxu0 %vm294_vm3, %v1765_v62 }
 0x697   :  { %7384 = vmatpush3.xpose.msk.msra.mxu1 %vm294_vm3, %v1845_v61  ;;  %7385 = vmatprep.mubr.msk.f32.mxu1 %vm8023_vm2, %v8022_v36 }
 0x698   :  { %7393 = vmatprep.subr.mxu1 %v8022_v36  ;;  %7390 = vmatprep.mubr.msk.f32.mxu0 %vm8023_vm2, %v8022_v36 }
 0x69a   :  { %7386 = vmatmul.mubr.msk.f32.vlgmr.msra.gmra.mrb[26].mxu1 %vm294_vm3, %v1843_v63 }
 0x69b   :  { %7395 = vmatprep.mubr.msk.f32.mxu1 %vm8023_vm2, %v8022_v36 }
 0x75a   :  { %v8289_v0 = vpop.f32.mrb[12].mxu0 }
 0x75b   :  { %v7352_v1 = vpop.f32.mrb[13].mxu0 }
 0x75e   :  { %v8291_v2 = vpop.f32.mrb[20].mxu1 }
 0x75f   :  { %v8293_v3 = vpop.f32.mrb[14].mxu0  ;;  %v7357_v4 = vpop.f32.mrb[21].mxu1 }
 0x760   :  { %v7362_v5 = vpop.f32.mrb[15].mxu0 }
 0x762   :  { %v8295_v6 = vpop.f32.mrb[22].mxu1 }
 0x763   :  { %v7367_v7 = vpop.f32.mrb[23].mxu1 }
 0x765   :  { %v1682_v8 = vpop.f32.mrb[16].mxu0 }
 0x766   :  { %v7372_v9 = vpop.f32.mrb[17].mxu0  ;;  %v1920_v10 = vsel %vm294_vm3, %v1682_v8, -inf }
 0x767   :  { %1921 = vmax.xlane.f32.xlu0 %v1920_v10 }
 0x769   :  { %v1760_v11 = vpop.f32.mrb[24].mxu1  ;;  %v1838_v12 = vpop.f32.mrb[18].mxu0 }
 0x76a   :  { %v7377_v13 = vpop.f32.mrb[25].mxu1  ;;  %v7382_v14 = vpop.f32.mrb[19].mxu0  ;;  %v1923_v15 = vsel %vm294_vm3, %v1760_v11, -inf  ;;  %v1926_v16 = vsel %vm294_vm3, %v1838_v12, -inf }
 0x76b   :  { %1924 = vmax.xlane.f32.xlu1 %v1923_v15  ;;  %1927 = vmax.xlane.f32.xlu0 %v1926_v16 }
 0x76d   :  { %v1916_v17 = vpop.f32.mrb[26].mxu1 }
 0x76e   :  { %v7387_v18 = vpop.f32.mrb[27].mxu1  ;;  %v1929_v19 = vsel %vm294_vm3, %v1916_v17, -inf }
 0x76f   :  { %1930 = vmax.xlane.f32.xlu0 %v1929_v19 }
 0x77c   :  { %1964 = vrot.lane.b32.xlu1 %v8105_v40, %s8031_s12 }
 0x780   :  { %2116 = vrot.lane.b32.xlu1 %v8111_v44, %s8031_s12 }
 0x784   :  { %2192 = vrot.lane.b32.xlu1 %v8117_v45, %s8031_s12 }
 0x785   :  { %2040 = vrot.lane.b32.xlu0 %v8109_v43, %s8031_s12 }
 0x788   :  { %2348 = vrot.lane.b32.xlu1 %v8109_v43, %s8032_s13 }
 0x789   :  { %2270 = vrot.lane.b32.xlu0 %v8105_v40, %s8032_s13 }
 0x7f4   :  { %v1922_v20 = vpop.xlane.xlu0 %1921 }
 0x7f5   :  { %v1932_v21 = vsub.f32 %v1682_v8, %v1922_v20 }
 0x7f7   :  { %v1936_v22 = vmul.f32 1.442695, %v1932_v21 }
 0x7f8   :  { %v1925_v23 = vpop.xlane.xlu1 %1924  ;;  %v1928_v24 = vpop.xlane.xlu0 %1927 }
 0x7f9   :  { %7842 = vpow2.f32 %v1936_v22  ;;  %v1933_v25 = vsub.f32 %v1760_v11, %v1925_v23  ;;  %v1934_v26 = vsub.f32 %v1838_v12, %v1928_v24 }
 0x7fb   :  { %v1938_v27 = vmul.f32 1.442695, %v1933_v25  ;;  %v1940_v28 = vmul.f32 1.442695, %v1934_v26 }
 0x7fc   :  { %v1965_v31 = vpop.permute.xlu1 %1964  ;;  %v1931_v32 = vpop.xlane.xlu0 %1930 }
 0x7fd   :  { %7844 = vpow2.f32 %v1938_v27  ;;  %v1935_v33 = vsub.f32 %v1916_v17, %v1931_v32  ;;  %7389 = vmatpush3.msra.mxu0 %v1965_v31 }
 0x7fe   :  { %7846 = vpow2.f32 %v1940_v28  ;;  %7398 = vmatprep.subr.mxu0 %v8022_v36 }
 0x7ff   :  { %v1942_v37 = vmul.f32 1.442695, %v1935_v33 }
 0x800   :  { %v2041_v38 = vpop.permute.xlu0 %2040  ;;  %v2117_v52 = vpop.permute.xlu1 %2116 }
 0x801   :  { %7848 = vpow2.f32 %v1942_v37  ;;  %7394 = vmatpush3.msra.mxu1 %v2041_v38 }
 0x802   :  { %7403 = vmatprep.subr.mxu1 %v8022_v36 }
 0x803   :  { %v7843_v39 = vpop.eup %7842 }
 0x804   :  { %v1944_v41 = vsel %vm294_vm3, %v7843_v39, 0.0  ;;  %v2193_v54 = vpop.permute.xlu1 %2192  ;;  %v2271_v58 = vpop.permute.xlu0 %2270 }
 0x805   :  { %1945 = vadd.xlane.f32.xlu1 %v1944_v41 }
 0x807   :  { %v7845_v42 = vpop.eup %7844 }
 0x808   :  { %v7847_v46 = vpop.eup %7846  ;;  %v1947_v47 = vsel %vm294_vm3, %v7845_v42, 0.0  ;;  %v2349_v56 = vpop.permute.xlu1 %2348 }
 0x809   :  { %1948 = vadd.xlane.f32.xlu0 %v1947_v47  ;;  %v1950_v48 = vsel %vm294_vm3, %v7847_v46, 0.0 }
 0x80a   :  { %1951 = vadd.xlane.f32.xlu1 %v1950_v48 }
 0x80b   :  { %v7849_v49 = vpop.eup %7848 }
 0x80c   :  { %v1953_v50 = vsel %vm294_vm3, %v7849_v49, 0.0 }
 0x80d   :  { %1954 = vadd.xlane.f32.xlu0 %v1953_v50 }
 0x81b   :  { %2346 = vrot.lane.b32.xlu1 %v8109_v43, %s8033_s14 }
 0x81f   :  { %2504 = vrot.lane.b32.xlu1 %v8117_v45, %s8032_s13 }
 0x823   :  { %2502 = vrot.lane.b32.xlu1 %v8117_v45, %s8033_s14  ;;  %2268 = vrot.lane.b32.xlu0 %v8105_v40, %s8033_s14 }
 0x827   :  { %2426 = vrot.lane.b32.xlu0 %v8111_v44, %s8032_s13 }
 0x82b   :  { %2424 = vrot.lane.b32.xlu0 %v8111_v44, %s8033_s14 }
 0x892   :  { %v1946_v59 = vpop.xlane.xlu1 %1945 }
 0x893   :  { %7850 = vrcp.f32 %v1946_v59 }
 0x896   :  { %v1949_v60 = vpop.xlane.xlu0 %1948 }
 0x897   :  { %v1952_v61 = vpop.xlane.xlu1 %1951  ;;  %7852 = vrcp.f32 %v1949_v60 }
 0x898   :  { %7854 = vrcp.f32 %v1952_v61 }
 0x89a   :  { %v1955_v62 = vpop.xlane.xlu0 %1954 }
 0x89b   :  { %7856 = vrcp.f32 %v1955_v62  ;;  %v2347_v11 = vpop.permute.xlu1 %2346 }
 0x89d   :  { %v7851_v63 = vpop.eup %7850 }
 0x89e   :  { %v1957_v1 = vmul.f32 %v7851_v63, %v7843_v39  ;;  %v2269_v7 = vpop.permute.xlu0 %2268 }
 0x89f   :  { %v2505_v14 = vpop.permute.xlu1 %2504 }
 0x8a0   :  { %7391 = vmatmul.mubr.msk.f32.vlgmr.msra.gmra.mrb[20].mxu0 %vm294_vm3, %v1957_v1 }
 0x8a1   :  { %v7853_v4 = vpop.eup %7852  ;;  %7399 = vmatpush3.msra.mxu0 %v2117_v52  ;;  %7400 = vmatprep.mubr.msk.f32.mxu0 %vm8023_vm2, %v8022_v36 }
 0x8a2   :  { %v7855_v5 = vpop.eup %7854  ;;  %v1959_v8 = vmul.f32 %v7853_v4, %v7845_v42  ;;  %7408 = vmatprep.subr.mxu0 %v8022_v36  ;;  %v2427_v13 = vpop.permute.xlu0 %2426 }
 0x8a3   :  { %v1961_v9 = vmul.f32 %v7855_v5, %v7847_v46  ;;  %v2503_v16 = vpop.permute.xlu1 %2502 }
 0x8a4   :  { %7396 = vmatmul.mubr.msk.f32.vlgmr.msra.gmra.mrb[28].mxu1 %vm294_vm3, %v1959_v8 }
 0x8a5   :  { %v7857_v10 = vpop.eup %7856  ;;  %7401 = vmatmul.mubr.msk.f32.vlgmr.msra.gmra.mrb[22].mxu0 %vm294_vm3, %v1961_v9  ;;  %7404 = vmatpush3.msra.mxu1 %v2193_v54 }
 0x8a6   :  { %7405 = vmatprep.mubr.msk.f32.mxu1 %vm8023_vm2, %v8022_v36  ;;  %v1963_v12 = vmul.f32 %v7857_v10, %v7849_v49  ;;  %7410 = vmatprep.mubr.msk.f32.mxu0 %vm8023_vm2, %v8022_v36  ;;  %v2425_v15 = vpop.permute.xlu0 %2424 }
 0x8a7   :  { %7413 = vmatprep.subr.mxu1 %v8022_v36 }
 0x8a8   :  { %7409 = vmatpush3.xpose.msk.msra.mxu0 %vm294_vm3, %v2271_v58  ;;  %7406 = vmatmul.mubr.msk.f32.vlgmr.msra.gmra.mrb[30].mxu1 %vm294_vm3, %v1963_v12 }
 0x8a9   :  { %7418 = vmatprep.subr.mxu0 %v8022_v36  ;;  %7415 = vmatprep.mubr.msk.f32.mxu1 %vm8023_vm2, %v8022_v36 }
 0x8ab   :  { %7411 = vmatmul.mubr.msk.f32.vlgmr.msra.gmra.mrb[24].mxu0 %vm294_vm3, %v2269_v7 }
 0x8ac   :  { %7414 = vmatpush3.xpose.msk.msra.mxu1 %vm294_vm3, %v2349_v56  ;;  %7419 = vmatpush3.xpose.msk.msra.mxu0 %vm294_vm3, %v2427_v13 }
 0x8ad   :  { %7420 = vmatprep.mubr.msk.f32.mxu0 %vm8023_vm2, %v8022_v36  ;;  %7423 = vmatprep.subr.mxu1 %v8022_v36 }
 0x8ae   :  { %7428 = vmatprep.subr.mxu0 %v8022_v36 }
 0x8af   :  { %7416 = vmatmul.mubr.msk.f32.vlgmr.msra.gmra.mrb[32].mxu1 %vm294_vm3, %v2347_v11  ;;  %7421 = vmatmul.mubr.msk.f32.vlgmr.msra.gmra.mrb[26].mxu0 %vm294_vm3, %v2425_v15 }
 0x8b0   :  { %7424 = vmatpush3.xpose.msk.msra.mxu1 %vm294_vm3, %v2505_v14  ;;  %7425 = vmatprep.mubr.msk.f32.mxu1 %vm8023_vm2, %v8022_v36 }
 0x8b1   :  { %7433 = vmatprep.subr.mxu1 %v8022_v36  ;;  %7430 = vmatprep.mubr.msk.f32.mxu0 %vm8023_vm2, %v8022_v36 }
 0x8b3   :  { %7426 = vmatmul.mubr.msk.f32.vlgmr.msra.gmra.mrb[34].mxu1 %vm294_vm3, %v2503_v16 }
 0x8b4   :  { %7435 = vmatprep.mubr.msk.f32.mxu1 %vm8023_vm2, %v8022_v36 }
 0x973   :  { %v8365_v17 = vpop.f32.mrb[20].mxu0 }
 0x974   :  { %v7392_v18 = vpop.f32.mrb[21].mxu0 }
 0x975   :  { %v169_v18 = vld [vmem:[#allocation4 + $0x60] sm:$0xff] }
 0x977   :  { %v2112_v19 = vpop.f32.mrb[28].mxu1 }
 0x978   :  { %v8367_v20 = vpop.f32.mrb[22].mxu0  ;;  %v7397_v21 = vpop.f32.mrb[29].mxu1 }
 0x979   :  { %v7402_v22 = vpop.f32.mrb[23].mxu0 }
 0x97a   :  { %v171_v22 = vld [vmem:[#allocation4 + $0x70] sm:$0xff] }
 0x97b   :  { %v8369_v23 = vpop.f32.mrb[30].mxu1 }
 0x97c   :  { %v7407_v24 = vpop.f32.mrb[31].mxu1 }
 0x97d   :  { %v172_v24 = vld [vmem:[#allocation4 + $0x78] sm:$0xff] }
 0x97e   :  { %v2342_v25 = vpop.f32.mrb[24].mxu0 }
 0x97f   :  { %v7412_v26 = vpop.f32.mrb[25].mxu0  ;;  %v2580_v27 = vsel %vm294_vm3, %v2342_v25, -inf }
 0x980   :  { %2581 = vmax.xlane.f32.xlu0 %v2580_v27 }
 0x982   :  { %v2420_v28 = vpop.f32.mrb[32].mxu1  ;;  %v2498_v31 = vpop.f32.mrb[26].mxu0 }
 0x983   :  { %v7417_v32 = vpop.f32.mrb[33].mxu1  ;;  %v7422_v33 = vpop.f32.mrb[27].mxu0  ;;  %v2583_v37 = vsel %vm294_vm3, %v2420_v28, -inf  ;;  %v2586_v38 = vsel %vm294_vm3, %v2498_v31, -inf }
 0x984   :  { %2584 = vmax.xlane.f32.xlu1 %v2583_v37  ;;  %2587 = vmax.xlane.f32.xlu0 %v2586_v38 }
 0x986   :  { %v2576_v39 = vpop.f32.mrb[34].mxu1 }
 0x987   :  { %v7427_v41 = vpop.f32.mrb[35].mxu1  ;;  %v2589_v42 = vsel %vm294_vm3, %v2576_v39, -inf }
 0x988   :  { %2590 = vmax.xlane.f32.xlu0 %v2589_v42 }
 0x995   :  { %2624 = vrot.lane.b32.xlu1 %v8105_v40, %s8034_s15 }
 0xa0d   :  { %v2582_v46 = vpop.xlane.xlu0 %2581 }
 0xa0e   :  { %v2592_v47 = vsub.f32 %v2342_v25, %v2582_v46  ;;  %v7734_v25 = vpack.c.bf16 %v172_v24, %v171_v22 }
 0xa10   :  { %v2596_v48 = vmul.f32 1.442695, %v2592_v47 }
 0xa11   :  { %v2585_v49 = vpop.xlane.xlu1 %2584  ;;  %v2588_v50 = vpop.xlane.xlu0 %2587 }
 0xa12   :  { %7858 = vpow2.f32 %v2596_v48  ;;  %v2593_v52 = vsub.f32 %v2420_v28, %v2585_v49  ;;  %v2594_v54 = vsub.f32 %v2498_v31, %v2588_v50 }
 0xa14   :  { %v2598_v56 = vmul.f32 1.442695, %v2593_v52  ;;  %v2600_v58 = vmul.f32 1.442695, %v2594_v54 }
 0xa15   :  { %v2625_v59 = vpop.permute.xlu1 %2624  ;;  %v2591_v60 = vpop.xlane.xlu0 %2590 }
 0xa16   :  { %7860 = vpow2.f32 %v2598_v56  ;;  %v2595_v61 = vsub.f32 %v2576_v39, %v2591_v60  ;;  %7429 = vmatpush3.msra.mxu0 %v2625_v59 }
 0xa17   :  { %7862 = vpow2.f32 %v2600_v58  ;;  %7438 = vmatprep.subr.mxu0 %v8022_v36 }
 0xa18   :  { %v2602_v62 = vmul.f32 1.442695, %v2595_v61 }
 0xa1a   :  { %7864 = vpow2.f32 %v2602_v62 }
 0xa1c   :  { %v7859_v40 = vpop.eup %7858 }
 0xa1d   :  { %v2604_v63 = vsel %vm294_vm3, %v7859_v40, 0.0 }
 0xa1e   :  { %2605 = vadd.xlane.f32.xlu1 %v2604_v63 }
 0xa20   :  { %v7861_v1 = vpop.eup %7860 }
 0xa21   :  { %v7863_v4 = vpop.eup %7862  ;;  %v2607_v5 = vsel %vm294_vm3, %v7861_v1, 0.0 }
 0xa22   :  { %2608 = vadd.xlane.f32.xlu0 %v2607_v5  ;;  %v2610_v7 = vsel %vm294_vm3, %v7863_v4, 0.0  ;;  %v6955_v5 = vld [vmem:[#allocation4 + $0x145] ss:$0 sm:$0xff] }
 0xa23   :  { %2611 = vadd.xlane.f32.xlu1 %v2610_v7 }
 0xa24   :  { %v7865_v8 = vpop.eup %7864 }
 0xa25   :  { %v2613_v9 = vsel %vm294_vm3, %v7865_v8, 0.0 }
 0xa26   :  { %2614 = vadd.xlane.f32.xlu0 %v2613_v9 }
 0xa34   :  { %2776 = vrot.lane.b32.xlu1 %v8111_v44, %s8034_s15 }
 0xa38   :  { %2852 = vrot.lane.b32.xlu1 %v8117_v45, %s8034_s15 }
 0xa3c   :  { %2934 = vrot.lane.b32.xlu1 %v8291_v2, %s8020_s20  ;;  %2700 = vrot.lane.b32.xlu0 %v8109_v43, %s8034_s15 }
 0xa40   :  { %2950 = vrot.lane.b32.xlu1 %v2112_v19, %s8035_s16  ;;  %2932 = vrot.lane.b32.xlu0 %v8289_v0, %s8020_s20  ;;  %v170_v19 = vld [vmem:[#allocation4 + $0x68] sm:$0xff] }
 0xa41   :  { %v7730_v21 = vpack.c.bf16 %v170_v19, %v169_v18 }
 0xa44   :  { %2938 = vrot.lane.b32.xlu1 %v8295_v6, %s8020_s20  ;;  %2948 = vrot.lane.b32.xlu0 %v8365_v17, %s8035_s16 }
 0xa48   :  { %2936 = vrot.lane.b32.xlu0 %v8293_v3, %s8020_s20 }
 0xaab   :  { %v2606_v44 = vpop.xlane.xlu1 %2605 }
 0xaac   :  { %7866 = vrcp.f32 %v2606_v44 }
 0xaaf   :  { %v2609_v45 = vpop.xlane.xlu0 %2608 }
 0xab0   :  { %v2612_v2 = vpop.xlane.xlu1 %2611  ;;  %7868 = vrcp.f32 %v2609_v45 }
 0xab1   :  { %7870 = vrcp.f32 %v2612_v2 }
 0xab3   :  { %v2615_v43 = vpop.xlane.xlu0 %2614 }
 0xab4   :  { %7872 = vrcp.f32 %v2615_v43  ;;  %v2777_v11 = vpop.permute.xlu1 %2776 }
 0xab6   :  { %v7867_v10 = vpop.eup %7866 }
 0xab7   :  { %v2701_v0 = vpop.permute.xlu0 %2700  ;;  %v2617_v12 = vmul.f32 %v7867_v10, %v7859_v40 }
 0xab8   :  { %7434 = vmatpush3.msra.mxu1 %v2701_v0  ;;  %v2853_v15 = vpop.permute.xlu1 %2852 }
 0xab9   :  { %7431 = vmatmul.mubr.msk.f32.vlgmr.msra.gmra.mrb[28].mxu0 %vm294_vm3, %v2617_v12  ;;  %7443 = vmatprep.subr.mxu1 %v8022_v36 }
 0xaba   :  { %v7869_v6 = vpop.eup %7868  ;;  %7439 = vmatpush3.msra.mxu0 %v2777_v11  ;;  %7440 = vmatprep.mubr.msk.f32.mxu0 %vm8023_vm2, %v8022_v36 }
 0xabb   :  { %v7871_v3 = vpop.eup %7870  ;;  %v2619_v13 = vmul.f32 %v7869_v6, %v7861_v1  ;;  %7731 = vmatprep.subr.bf16.mxu0 %v7730_v21  ;;  %v2933_v39 = vpop.permute.xlu0 %2932 }
 0xabc   :  { %v2621_v14 = vmul.f32 %v7871_v3, %v7863_v4  ;;  %v2935_v41 = vpop.permute.xlu1 %2934 }
 0xabd   :  { %7436 = vmatmul.mubr.msk.f32.vlgmr.msra.gmra.mrb[36].mxu1 %vm294_vm3, %v2619_v13 }
 0xabe   :  { %v7873_v16 = vpop.eup %7872  ;;  %7441 = vmatmul.mubr.msk.f32.vlgmr.msra.gmra.mrb[30].mxu0 %vm294_vm3, %v2621_v14  ;;  %7444 = vmatpush3.msra.mxu1 %v2853_v15 }
 0xabf   :  { %7445 = vmatprep.mubr.msk.f32.mxu1 %vm8023_vm2, %v8022_v36  ;;  %v2623_v17 = vmul.f32 %v7873_v16, %v7865_v8  ;;  %7733 = vmatpush3.bf16.msra.mxu0 %v7730_v21  ;;  %v2949_v42 = vpop.permute.xlu0 %2948 }
 0xac0   :  { %7735 = vmatprep.subr.bf16.mxu0 %v7734_v25  ;;  %v2951_v46 = vpop.permute.xlu1 %2950 }
 0xac1   :  { %7446 = vmatmul.mubr.msk.f32.vlgmr.msra.gmra.mrb[38].mxu1 %vm294_vm3, %v2623_v17 }
 0xac3   :  { %7737 = vmatpush3.bf16.msra.mxu0 %v7734_v25  ;;  %v2937_v47 = vpop.permute.xlu0 %2936 }
 0xac4   :  { %v2939_v49 = vpop.permute.xlu1 %2938 }
 0xb8c   :  { %v2696_v26 = vpop.f32.mrb[28].mxu0 }
 0xb8d   :  { %v7432_v27 = vpop.f32.mrb[29].mxu0  ;;  %2964 = vrot.lane.b32.xlu0 %v2696_v26, %s8036_s17 }
 0xb90   :  { %v2772_v28 = vpop.f32.mrb[36].mxu1 }
 0xb91   :  { %v2848_v31 = vpop.f32.mrb[30].mxu0  ;;  %2952 = vrot.lane.b32.xlu0 %v8367_v20, %s8035_s16  ;;  %2966 = vrot.lane.b32.xlu1 %v2772_v28, %s8036_s17  ;;  %v7437_v32 = vpop.f32.mrb[37].mxu1  ;;  %v2976_v20 = vsel %vm294_vm3, %v8213_v51, %v2933_v39  ;;  %v2978_v51 = vsel %vm294_vm3, %v8217_v55, %v2937_v47  ;;  %v177_v47 = vld [vmem:[#allocation4 + $0xa0] sm:$0xff] }
 0xb92   :  { %v7442_v33 = vpop.f32.mrb[31].mxu0  ;;  %v2981_v48 = vsel %vm2980_vm4, %v2976_v20, %v2949_v42  ;;  %v176_v42 = vld [vmem:[#allocation4 + $0x98] sm:$0xff]  ;;  %v178_v20 = vld [vmem:[#allocation4 + $0xa8] sm:$0xff] }
 0xb94   :  { %v2924_v37 = vpop.f32.mrb[38].mxu1 }
 0xb95   :  { %2968 = vrot.lane.b32.xlu0 %v2848_v31, %s8036_s17  ;;  %2954 = vrot.lane.b32.xlu1 %v8369_v23, %s8035_s16  ;;  %v7447_v38 = vpop.f32.mrb[39].mxu1  ;;  %v2977_v23 = vsel %vm294_vm3, %v8215_v53, %v2935_v41  ;;  %v2979_v53 = vsel %vm294_vm3, %v8219_v57, %v2939_v49  ;;  %v175_v41 = vld [vmem:[#allocation4 + $0x90] sm:$0xff] }
 0xb96   :  { %v2982_v54 = vsel %vm2980_vm4, %v2977_v23, %v2951_v46  ;;  %v174_v38 = vld [vmem:[#allocation4 + $0x88] sm:$0xff]  ;;  %v7742_v46 = vpack.c.bf16 %v176_v42, %v175_v41 }
 0xb99   :  { %2970 = vrot.lane.b32.xlu1 %v2924_v37, %s8036_s17  ;;  %v173_v37 = vld [vmem:[#allocation4 + $0x80] sm:$0xff] }
 0xb9a   :  { %v7738_v39 = vpack.c.bf16 %v174_v38, %v173_v37 }
 0xb9c   :  { %7739 = vmatprep.subr.bf16.mxu1 %v7738_v39 }
 0xb9d   :  { %7741 = vmatpush3.bf16.msra.mxu1 %v7738_v39 }
 0xb9e   :  { %7743 = vmatprep.subr.bf16.mxu1 %v7742_v46 }
 0xba1   :  { %7745 = vmatpush3.bf16.msra.mxu1 %v7742_v46 }
 0xbff   :  { %v2965_v50 = vpop.permute.xlu0 %2964 }
 0xc00   :  { %v2986_v52 = vsel %vm2985_vm5, %v2981_v48, %v2965_v50  ;;  %v7746_v48 = vpack.c.bf16 %v178_v20, %v177_v47 }
 0xc01   :  { %7456 = vmatprep.mubr.msk.f32.mxu0 %vm193_vm1, %v2986_v52 }
 0xc02   :  { %7747 = vmatprep.subr.bf16.mxu0 %v7746_v48 }
 0xc03   :  { %v2967_v56 = vpop.permute.xlu1 %2966  ;;  %v2953_v58 = vpop.permute.xlu0 %2952 }
 0xc04   :  { %v2987_v59 = vsel %vm2985_vm5, %v2982_v54, %v2967_v56  ;;  %v2983_v60 = vsel %vm2980_vm4, %v2978_v51, %v2953_v58 }
 0xc05   :  { %7457 = vmatmul.mubr.msk.f32.vlgmr.msra.gmra.mrb[32].mxu0 %vm193_vm1, %v2987_v59 }
 0xc06   :  { %7749 = vmatpush3.bf16.msra.mxu0 %v7746_v48 }
 0xc07   :  { %v2955_v61 = vpop.permute.xlu1 %2954  ;;  %v2969_v62 = vpop.permute.xlu0 %2968 }
 0xc08   :  { %v2988_v40 = vsel %vm2985_vm5, %v2983_v60, %v2969_v62  ;;  %v2984_v63 = vsel %vm2980_vm4, %v2979_v53, %v2955_v61 }
 0xc09   :  { %7459 = vmatprep.mubr.msk.f32.mxu0 %vm193_vm1, %v2988_v40  ;;  %v6960_v40 = vld [vmem:[#allocation4 + $0x148] ss:$0 sm:$0xff] }
 0xc0b   :  { %v2971_v1 = vpop.permute.xlu1 %2970 }
 0xc0c   :  { %v2989_v4 = vsel %vm2985_vm5, %v2984_v63, %v2971_v1 }
 0xc0d   :  { %7460 = vmatmul.mubr.msk.f32.gmra.mrb[34].mxu0 %vm193_vm1, %v2989_v4 }
 0xcd8   :  { %v7458_v55 = vpop.f32.mrb[32].mxu0 }
 0xcd9   :  { %v3078_v7 = vadd.f32 %v7458_v55, %v6955_v5  ;;  %v3072_v8 = vpop.f32.mrb[33].mxu0 }
 0xcda   :  { %v3073_v9 = vadd.f32 %v6955_v5, %v3072_v8 }
 0xcdb   :  { %v3092_v44 = vadd.f32 %v3078_v7, %v8085_v30 }
 0xcdc   :  { %v3091_v45 = vadd.f32 %v3073_v9, %v8083_v29 }
 0xcdd   :  { %v3098_v2 = vsel %vm193_vm1, %v3092_v44, 0.0 }
 0xcde   :  { %3099 = vadd.xlane.f32.xlu1 %v3098_v2  ;;  %v3095_v57 = vsel %vm193_vm1, %v3091_v45, 0.0 }
 0xcdf   :  { %3096 = vadd.xlane.f32.xlu0 %v3095_v57 }
 0xce0   :  { %v7461_v43 = vpop.f32.mrb[34].mxu0 }
 0xce1   :  { %v3082_v10 = vpop.f32.mrb[35].mxu0  ;;  %v3088_v11 = vadd.f32 %v7461_v43, %v6955_v5 }
 0xce2   :  { %v3083_v0 = vadd.f32 %v6955_v5, %v3082_v10  ;;  %v6961_v5 = vld [vmem:[#allocation4 + $0x149] ss:$0 sm:$0xff] }
 0xce3   :  { %v3094_v3 = vadd.f32 %v3088_v11, %v8089_v34 }
 0xce4   :  { %v3093_v12 = vadd.f32 %v3083_v0, %v8093_v35 }
 0xce5   :  { %v3104_v30 = vsel %vm193_vm1, %v3094_v3, 0.0 }
 0xce6   :  { %v3101_v6 = vsel %vm193_vm1, %v3093_v12, 0.0 }
 0xce7   :  { %3102 = vadd.xlane.f32.xlu0 %v3101_v6  ;;  %v180_v6 = vld [vmem:[#allocation4 + $0xb8] sm:$0xff] }
 0xceb   :  { %3105 = vadd.xlane.f32.xlu0 %v3104_v30  ;;  %v6962_v30 = vld [vmem:[#allocation4 + $0x146] ss:$0 sm:$0xff] }
 0xd6b   :  { %v3100_v29 = vpop.xlane.xlu1 %3099 }
 0xd6c   :  { %v3109_v13 = vmul.f32 0.03125, %v3100_v29  ;;  %v3097_v14 = vpop.xlane.xlu0 %3096 }
 0xd6d   :  { %v3108_v15 = vmul.f32 0.03125, %v3097_v14 }
 0xd6e   :  { %v3113_v16 = vsub.f32 %v3092_v44, %v3109_v13 }
 0xd6f   :  { %v3112_v17 = vsub.f32 %v3091_v45, %v3108_v15 }
 0xd70   :  { %v3117_v18 = vmul.f32 %v3113_v16, %v3113_v16 }
 0xd71   :  { %v3116_v19 = vmul.f32 %v3112_v17, %v3112_v17 }
 0xd72   :  { %v3123_v21 = vsel %vm193_vm1, %v3117_v18, 0.0 }
 0xd73   :  { %3124 = vadd.xlane.f32.xlu0 %v3123_v21  ;;  %v3120_v35 = vsel %vm193_vm1, %v3116_v19, 0.0 }
 0xd74   :  { %3121 = vadd.xlane.f32.xlu1 %v3120_v35  ;;  %v3103_v22 = vpop.xlane.xlu0 %3102 }
 0xd75   :  { %v3110_v34 = vmul.f32 0.03125, %v3103_v22 }
 0xd77   :  { %v3114_v24 = vsub.f32 %v3093_v12, %v3110_v34  ;;  %v179_v12 = vld [vmem:[#allocation4 + $0xb0] sm:$0xff] }
 0xd78   :  { %v3106_v25 = vpop.xlane.xlu0 %3105 }
 0xd79   :  { %v3111_v26 = vmul.f32 0.03125, %v3106_v25  ;;  %v3118_v27 = vmul.f32 %v3114_v24, %v3114_v24 }
 0xd7b   :  { %v3115_v28 = vsub.f32 %v3094_v3, %v3111_v26  ;;  %v3126_v31 = vsel %vm193_vm1, %v3118_v27, 0.0  ;;  %v7750_v3 = vpack.c.bf16 %v180_v6, %v179_v12 }
 0xd7c   :  { %3127 = vadd.xlane.f32.xlu1 %v3126_v31 }
 0xd7d   :  { %v3119_v32 = vmul.f32 %v3115_v28, %v3115_v28  ;;  %7751 = vmatprep.subr.bf16.mxu0 %v7750_v3 }
 0xd7e   :  { %7753 = vmatpush3.bf16.msra.mxu0 %v7750_v3 }
 0xd7f   :  { %v3129_v33 = vsel %vm193_vm1, %v3119_v32, 0.0  ;;  %7504 = vmatprep.subr.mxu0 %v8022_v36 }
 0xd80   :  { %3130 = vadd.xlane.f32.xlu0 %v3129_v33 }
 0xe00   :  { %v3125_v49 = vpop.xlane.xlu0 %3124 }
 0xe01   :  { %v3133_v50 = vmul.f32 0.03125, %v3125_v49  ;;  %v3122_v52 = vpop.xlane.xlu1 %3121 }
 0xe02   :  { %v3132_v23 = vmul.f32 0.03125, %v3122_v52 }
 0xe03   :  { %v3137_v54 = vadd.f32 1e-05, %v3133_v50 }
 0xe04   :  { %v3136_v56 = vadd.f32 1e-05, %v3132_v23 }
 0xe05   :  { %7874 = vrsqrt.f32 %v3137_v54 }
 0xe06   :  { %7876 = vrsqrt.f32 %v3136_v56 }
 0xe09   :  { %v3128_v58 = vpop.xlane.xlu1 %3127 }
 0xe0a   :  { %v3134_v59 = vmul.f32 0.03125, %v3128_v58 }
 0xe0c   :  { %v3138_v51 = vadd.f32 1e-05, %v3134_v59 }
 0xe0d   :  { %v3131_v60 = vpop.xlane.xlu0 %3130 }
 0xe0e   :  { %7878 = vrsqrt.f32 %v3138_v51  ;;  %v3135_v61 = vmul.f32 0.03125, %v3131_v60 }
 0xe0f   :  { %v7875_v62 = vpop.eup %7874 }
 0xe10   :  { %v7877_v53 = vpop.eup %7876  ;;  %v3145_v63 = vmul.f32 %v7875_v62, %v3113_v16  ;;  %v3139_v1 = vadd.f32 1e-05, %v3135_v61 }
 0xe11   :  { %v3144_v4 = vmul.f32 %v7877_v53, %v3112_v17 }
 0xe12   :  { %7880 = vrsqrt.f32 %v3139_v1  ;;  %v3153_v55 = vmul.f32 %v6960_v40, %v3145_v63 }
 0xe13   :  { %v3152_v7 = vmul.f32 %v6960_v40, %v3144_v4 }
 0xe14   :  { %v3161_v9 = vadd.f32 %v6961_v5, %v3153_v55 }
 0xe15   :  { %v3160_v8 = vadd.f32 %v6961_v5, %v3152_v7 }
 0xe17   :  { %7470 = vmatprep.mubr.msk.f32.mxu1 %vm193_vm1, %v3160_v8 }
 0xe18   :  { %v7879_v44 = vpop.eup %7878  ;;  %7471 = vmatmul.mubr.msk.f32.vlgmr.msra.gmra.mrb[40].mxu1 %vm193_vm1, %v3161_v9 }
 0xe19   :  { %v3146_v45 = vmul.f32 %v7879_v44, %v3114_v24  ;;  %v6967_v24 = vld [vmem:[#allocation4 + $0x147] ss:$0 sm:$0xff] }
 0xe1b   :  { %v3154_v2 = vmul.f32 %v6960_v40, %v3146_v45  ;;  %v3444_v45 = vld [vmem:[#allocation4 + $0xd0] sm:$0xff] }
 0xe1c   :  { %v7881_v57 = vpop.eup %7880 }
 0xe1d   :  { %v3162_v43 = vadd.f32 %v6961_v5, %v3154_v2  ;;  %v3147_v10 = vmul.f32 %v7881_v57, %v3115_v28  ;;  %v3445_v2 = vld [vmem:[#allocation4 + $0xd8] sm:$0xff] }
 0xe1e   :  { %v7758_v57 = vpack.c.bf16 %v3445_v2, %v3444_v45 }
 0xe1f   :  { %7473 = vmatprep.mubr.msk.f32.mxu1 %vm193_vm1, %v3162_v43  ;;  %v3155_v11 = vmul.f32 %v6960_v40, %v3147_v10 }
 0xe21   :  { %v3163_v0 = vadd.f32 %v6961_v5, %v3155_v11 }
 0xe23   :  { %7474 = vmatmul.mubr.msk.f32.gmra.mrb[42].mxu1 %vm193_vm1, %v3163_v0 }
 0xeeb   :  { %v7472_v29 = vpop.f32.mrb[40].mxu1 }
 0xeec   :  { %v3252_v13 = vadd.f32 %v7472_v29, %v6962_v30  ;;  %v3246_v14 = vpop.f32.mrb[41].mxu1 }
 0xeed   :  { %v3247_v15 = vadd.f32 %v6962_v30, %v3246_v14 }
 0xeee   :  { %v3266_v17 = vmax.f32 %v3252_v13, 0.0 }
 0xeef   :  { %v3265_v16 = vmax.f32 %v3247_v15, 0.0 }
 0xef1   :  { %7484 = vmatprep.mubr.msk.f32.mxu0 %vm193_vm1, %v3265_v16 }
 0xef2   :  { %7485 = vmatmul.mubr.msk.f32.vlgmr.msra.gmra.mrb[36].mxu0 %vm193_vm1, %v3266_v17  ;;  %v6972_v17 = vld [vmem:[#allocation4 + $0x14a] ss:$0 sm:$0xff] }
 0xef6   :  { %v7475_v18 = vpop.f32.mrb[42].mxu1 }
 0xef7   :  { %v3262_v19 = vadd.f32 %v7475_v18, %v6962_v30  ;;  %v3256_v21 = vpop.f32.mrb[43].mxu1 }
 0xef8   :  { %v3257_v35 = vadd.f32 %v6962_v30, %v3256_v21 }
 0xef9   :  { %v3268_v34 = vmax.f32 %v3262_v19, 0.0 }
 0xefa   :  { %v3267_v22 = vmax.f32 %v3257_v35, 0.0  ;;  %v6973_v35 = vld [vmem:[#allocation4 + $0x14b] ss:$0 sm:$0xff] }
 0xefc   :  { %7487 = vmatprep.mubr.msk.f32.mxu0 %vm193_vm1, %v3267_v22 }
 0xefd   :  { %7488 = vmatmul.mubr.msk.f32.gmra.mrb[38].mxu0 %vm193_vm1, %v3268_v34 }
 0xefe   :  { %7506 = vmatprep.mubr.msk.f32.mxu0 %vm8023_vm2, %v8022_v36 }
 0xfc5   :  { %v7486_v25 = vpop.f32.mrb[36].mxu0 }
 0xfc6   :  { %v3357_v26 = vadd.f32 %v7486_v25, %v6967_v24  ;;  %v3351_v27 = vpop.f32.mrb[37].mxu0 }
 0xfc7   :  { %v3352_v28 = vadd.f32 %v6967_v24, %v3351_v27 }
 0xfc8   :  { %v3371_v31 = vadd.f32 %v3357_v26, %v3161_v9  ;;  %v3443_v9 = vld [vmem:[#allocation4 + $0xc8] sm:$0xff] }
 0xfc9   :  { %v3370_v32 = vadd.f32 %v3352_v28, %v3160_v8  ;;  %v3442_v8 = vld [vmem:[#allocation4 + $0xc0] sm:$0xff] }
 0xfca   :  { %v3377_v33 = vsel %vm193_vm1, %v3371_v31, 0.0  ;;  %v7754_v44 = vpack.c.bf16 %v3443_v9, %v3442_v8 }
 0xfcb   :  { %3378 = vadd.xlane.f32.xlu0 %v3377_v33  ;;  %v3374_v37 = vsel %vm193_vm1, %v3370_v32, 0.0 }
 0xfcc   :  { %3375 = vadd.xlane.f32.xlu1 %v3374_v37  ;;  %7755 = vmatprep.subr.bf16.mxu1 %v7754_v44 }
 0xfcd   :  { %7757 = vmatpush3.bf16.msra.mxu1 %v7754_v44 }
 0xfce   :  { %7759 = vmatprep.subr.bf16.mxu1 %v7758_v57 }
 0xfd0   :  { %v7489_v38 = vpop.f32.mrb[38].mxu0 }
 0xfd1   :  { %v3367_v39 = vadd.f32 %v7489_v38, %v6967_v24  ;;  %v3361_v41 = vpop.f32.mrb[39].mxu0  ;;  %7761 = vmatpush3.bf16.msra.mxu1 %v7758_v57 }
 0xfd2   :  { %v3362_v42 = vadd.f32 %v6967_v24, %v3361_v41  ;;  %7509 = vmatprep.subr.mxu1 %v8022_v36 }
 0xfd3   :  { %v3373_v46 = vadd.f32 %v3367_v39, %v3163_v0  ;;  %v6974_v39 = vld [vmem:[#allocation4 + $0x14c] ss:$0 sm:$0xff] }
 0xfd4   :  { %v3372_v47 = vadd.f32 %v3362_v42, %v3162_v43 }
 0xfd5   :  { %v3383_v20 = vsel %vm193_vm1, %v3373_v46, 0.0 }
 0xfd6   :  { %3384 = vadd.xlane.f32.xlu0 %v3383_v20  ;;  %v3380_v48 = vsel %vm193_vm1, %v3372_v47, 0.0 }
 0xfd7   :  { %3381 = vadd.xlane.f32.xlu1 %v3380_v48 }
0x1058   :  { %v3379_v49 = vpop.xlane.xlu0 %3378 }
0x1059   :  { %v3387_v50 = vmul.f32 0.03125, %v3379_v49  ;;  %v3376_v52 = vpop.xlane.xlu1 %3375 }
0x105a   :  { %v3386_v23 = vmul.f32 0.03125, %v3376_v52 }
0x105b   :  { %v3391_v54 = vsub.f32 %v3371_v31, %v3387_v50 }
0x105c   :  { %v3390_v56 = vsub.f32 %v3370_v32, %v3386_v23 }
0x105d   :  { %v3395_v58 = vmul.f32 %v3391_v54, %v3391_v54 }
0x105e   :  { %v3394_v59 = vmul.f32 %v3390_v56, %v3390_v56 }
0x105f   :  { %v3401_v51 = vsel %vm193_vm1, %v3395_v58, 0.0 }
0x1060   :  { %3402 = vadd.xlane.f32.xlu0 %v3401_v51  ;;  %v3398_v60 = vsel %vm193_vm1, %v3394_v59, 0.0 }
0x1061   :  { %3399 = vadd.xlane.f32.xlu1 %v3398_v60 }
0x1063   :  { %v3385_v61 = vpop.xlane.xlu0 %3384 }
0x1064   :  { %v3389_v62 = vmul.f32 0.03125, %v3385_v61  ;;  %v3382_v40 = vpop.xlane.xlu1 %3381 }
0x1065   :  { %v3388_v53 = vmul.f32 0.03125, %v3382_v40 }
0x1066   :  { %v3393_v63 = vsub.f32 %v3373_v46, %v3389_v62 }
0x1067   :  { %v3392_v1 = vsub.f32 %v3372_v47, %v3388_v53 }
0x1068   :  { %v3397_v4 = vmul.f32 %v3393_v63, %v3393_v63 }
0x1069   :  { %v3396_v5 = vmul.f32 %v3392_v1, %v3392_v1 }
0x106a   :  { %v3407_v55 = vsel %vm193_vm1, %v3397_v4, 0.0 }
0x106b   :  { %3408 = vadd.xlane.f32.xlu0 %v3407_v55  ;;  %v3404_v7 = vsel %vm193_vm1, %v3396_v5, 0.0 }
0x106c   :  { %3405 = vadd.xlane.f32.xlu1 %v3404_v7 }
0x10ed   :  { %v3403_v43 = vpop.xlane.xlu0 %3402 }
0x10ee   :  { %v3411_v10 = vmul.f32 0.03125, %v3403_v43  ;;  %v3400_v11 = vpop.xlane.xlu1 %3399 }
0x10ef   :  { %v3410_v0 = vmul.f32 0.03125, %v3400_v11 }
0x10f0   :  { %v3415_v12 = vadd.f32 1e-05, %v3411_v10 }
0x10f1   :  { %v3414_v6 = vadd.f32 1e-05, %v3410_v0 }
0x10f2   :  { %7882 = vrsqrt.f32 %v3415_v12 }
0x10f3   :  { %7884 = vrsqrt.f32 %v3414_v6 }
0x10f8   :  { %v3409_v3 = vpop.xlane.xlu0 %3408 }
0x10f9   :  { %v3413_v30 = vmul.f32 0.03125, %v3409_v3  ;;  %v3406_v29 = vpop.xlane.xlu1 %3405 }
0x10fa   :  { %v3412_v13 = vmul.f32 0.03125, %v3406_v29 }
0x10fb   :  { %v3417_v14 = vadd.f32 1e-05, %v3413_v30 }
0x10fc   :  { %v7883_v15 = vpop.eup %7882  ;;  %v3416_v16 = vadd.f32 1e-05, %v3412_v13 }
0x10fd   :  { %v7885_v18 = vpop.eup %7884  ;;  %v3423_v19 = vmul.f32 %v7883_v15, %v3391_v54  ;;  %7886 = vrsqrt.f32 %v3417_v14 }
0x10fe   :  { %7888 = vrsqrt.f32 %v3416_v16  ;;  %v3422_v21 = vmul.f32 %v7885_v18, %v3390_v56 }
0x10ff   :  { %v3431_v22 = vmul.f32 %v6972_v17, %v3423_v19 }
0x1100   :  { %v3430_v34 = vmul.f32 %v6972_v17, %v3422_v21 }
0x1101   :  { %v8470_v25 = vadd.f32 %v6973_v35, %v3431_v22 }
0x1102   :  { %v8468_v24 = vadd.f32 %v6973_v35, %v3430_v34 }
0x1104   :  { %7498 = vmatprep.mubr.msk.f32.mxu1 %vm193_vm1, %v8468_v24 }
0x1105   :  { %7499 = vmatmul.mubr.msk.f32.vlgmr.msra.gmra.mrb[44].mxu1 %vm193_vm1, %v8470_v25 }
0x1107   :  { %v7887_v26 = vpop.eup %7886 }
0x1108   :  { %v7889_v27 = vpop.eup %7888  ;;  %v3425_v28 = vmul.f32 %v7887_v26, %v3393_v63 }
0x1109   :  { %v3424_v31 = vmul.f32 %v7889_v27, %v3392_v1 }
0x110a   :  { %v3433_v32 = vmul.f32 %v6972_v17, %v3425_v28 }
0x110b   :  { %v3432_v33 = vmul.f32 %v6972_v17, %v3424_v31 }
0x110c   :  { %v8478_v38 = vadd.f32 %v6973_v35, %v3433_v32 }
0x110d   :  { %v8476_v37 = vadd.f32 %v6973_v35, %v3432_v33 }
0x110f   :  { %7501 = vmatprep.mubr.msk.f32.mxu1 %vm193_vm1, %v8476_v37 }
0x1110   :  { %7502 = vmatmul.mubr.msk.f32.gmra.mrb[46].mxu1 %vm193_vm1, %v8478_v38 }
0x1111   :  { %7511 = vmatprep.mubr.msk.f32.mxu1 %vm8023_vm2, %v8022_v36 }
0x11d8   :  { %v7500_v41 = vpop.f32.mrb[44].mxu1 }
0x11d9   :  { %v8486_v42 = vadd.f32 %v7500_v41, %v6974_v39  ;;  %v3548_v46 = vpop.f32.mrb[45].mxu1 }
0x11da   :  { %v8488_v47 = vadd.f32 %v6974_v39, %v3548_v46 }
0x11db   :  { %3645 = vrot.lane.b32.xlu0 %v8486_v42, %s8024_s1 }
0x11dc   :  { %3568 = vrot.lane.b32.xlu1 %v8488_v47, %s8024_s1 }
0x11e3   :  { %v7503_v20 = vpop.f32.mrb[46].mxu1 }
0x11e4   :  { %v3558_v48 = vpop.f32.mrb[47].mxu1  ;;  %v8498_v50 = vadd.f32 %v7503_v20, %v6974_v39 }
0x11e5   :  { %v8494_v49 = vadd.f32 %v6974_v39, %v3558_v48 }
0x11e7   :  { %3722 = vrot.lane.b32.xlu1 %v8494_v49, %s8024_s1 }
0x11eb   :  { %3799 = vrot.lane.b32.xlu1 %v8498_v50, %s8024_s1 }
0x124d   :  { %v3646_v52 = vpop.permute.xlu0 %3645 }
0x124e   :  { %v3569_v23 = vpop.permute.xlu1 %3568  ;;  %7510 = vmatpush3.xpose.msk.msra.mxu1 %vm294_vm3, %v3646_v52 }
0x124f   :  { %7505 = vmatpush3.xpose.msk.msra.mxu0 %vm294_vm3, %v3569_v23  ;;  %7519 = vmatprep.subr.mxu1 %v8022_v36 }
0x1250   :  { %7514 = vmatprep.subr.mxu0 %v8022_v36 }
0x1251   :  { %7512 = vmatmul.mubr.msk.f32.vlgmr.msra.gmra.mrb[48].mxu1 %vm294_vm3, %v8486_v42 }
0x1252   :  { %7507 = vmatmul.mubr.msk.f32.vlgmr.msra.gmra.mrb[40].mxu0 %vm294_vm3, %v8488_v47  ;;  %7521 = vmatprep.mubr.msk.f32.mxu1 %vm8023_vm2, %v8022_v36 }
0x1253   :  { %7516 = vmatprep.mubr.msk.f32.mxu0 %vm8023_vm2, %v8022_v36 }
0x1259   :  { %v3723_v54 = vpop.permute.xlu1 %3722 }
0x125a   :  { %7515 = vmatpush3.xpose.msk.msra.mxu0 %vm294_vm3, %v3723_v54 }
0x125b   :  { %7524 = vmatprep.subr.mxu0 %v8022_v36 }
0x125d   :  { %7517 = vmatmul.mubr.msk.f32.vlgmr.msra.gmra.mrb[42].mxu0 %vm294_vm3, %v8494_v49  ;;  %v3800_v56 = vpop.permute.xlu1 %3799 }
0x125e   :  { %7520 = vmatpush3.xpose.msk.msra.mxu1 %vm294_vm3, %v3800_v56  ;;  %7526 = vmatprep.mubr.msk.f32.mxu0 %vm8023_vm2, %v8022_v36 }
0x125f   :  { %7529 = vmatprep.subr.mxu1 %v8022_v36 }
0x1261   :  { %7522 = vmatmul.mubr.msk.f32.vlgmr.msra.gmra.mrb[50].mxu1 %vm294_vm3, %v8498_v50 }
0x1262   :  { %7531 = vmatprep.mubr.msk.f32.mxu1 %vm8023_vm2, %v8022_v36 }
0x1324   :  { %v3717_v58 = vpop.f32.mrb[48].mxu1 }
0x1325   :  { %v3640_v59 = vpop.f32.mrb[40].mxu0  ;;  %v7513_v51 = vpop.f32.mrb[49].mxu1  ;;  %v3878_v60 = vsel %vm294_vm3, %v3717_v58, -inf }
0x1326   :  { %v7508_v61 = vpop.f32.mrb[41].mxu0  ;;  %3879 = vmax.xlane.f32.xlu1 %v3878_v60  ;;  %v3875_v62 = vsel %vm294_vm3, %v3640_v59, -inf }
0x1327   :  { %3876 = vmax.xlane.f32.xlu0 %v3875_v62 }
0x1330   :  { %v3794_v40 = vpop.f32.mrb[42].mxu0 }
0x1331   :  { %v7518_v53 = vpop.f32.mrb[43].mxu0  ;;  %v3881_v63 = vsel %vm294_vm3, %v3794_v40, -inf }
0x1332   :  { %3882 = vmax.xlane.f32.xlu0 %v3881_v63 }
0x1334   :  { %v3871_v1 = vpop.f32.mrb[50].mxu1 }
0x1335   :  { %v7523_v4 = vpop.f32.mrb[51].mxu1  ;;  %v3884_v5 = vsel %vm294_vm3, %v3871_v1, -inf }
0x1336   :  { %3885 = vmax.xlane.f32.xlu0 %v3884_v5 }
0x1337   :  { %3919 = vrot.lane.b32.xlu1 %v8488_v47, %s8025_s6 }
0x133b   :  { %4071 = vrot.lane.b32.xlu1 %v8494_v49, %s8025_s6 }
0x133f   :  { %4147 = vrot.lane.b32.xlu1 %v8498_v50, %s8025_s6 }
0x1343   :  { %4303 = vrot.lane.b32.xlu1 %v8486_v42, %s8026_s7 }
0x134c   :  { %3995 = vrot.lane.b32.xlu0 %v8486_v42, %s8025_s6 }
0x1350   :  { %4225 = vrot.lane.b32.xlu0 %v8488_v47, %s8026_s7 }
0x13b3   :  { %v3880_v55 = vpop.xlane.xlu1 %3879 }
0x13b4   :  { %v3888_v7 = vsub.f32 %v3717_v58, %v3880_v55  ;;  %v3877_v8 = vpop.xlane.xlu0 %3876 }
0x13b5   :  { %v3887_v9 = vsub.f32 %v3640_v59, %v3877_v8 }
0x13b6   :  { %v3893_v44 = vmul.f32 1.442695, %v3888_v7 }
0x13b7   :  { %v3891_v45 = vmul.f32 1.442695, %v3887_v9  ;;  %v3920_v2 = vpop.permute.xlu1 %3919 }
0x13b8   :  { %7890 = vpow2.f32 %v3893_v44  ;;  %7525 = vmatpush3.msra.mxu0 %v3920_v2 }
0x13b9   :  { %7892 = vpow2.f32 %v3891_v45  ;;  %7534 = vmatprep.subr.mxu0 %v8022_v36 }
0x13bb   :  { %v4072_v18 = vpop.permute.xlu1 %4071 }
0x13bf   :  { %v3883_v57 = vpop.xlane.xlu0 %3882  ;;  %v4148_v19 = vpop.permute.xlu1 %4147 }
0x13c0   :  { %v3889_v14 = vsub.f32 %v3794_v40, %v3883_v57 }
0x13c2   :  { %v7891_v43 = vpop.eup %7890  ;;  %v3895_v15 = vmul.f32 1.442695, %v3889_v14 }
0x13c3   :  { %v7893_v10 = vpop.eup %7892  ;;  %v3886_v11 = vpop.xlane.xlu0 %3885  ;;  %v3902_v0 = vsel %vm294_vm3, %v7891_v43, 0.0 }
0x13c4   :  { %v3890_v12 = vsub.f32 %v3871_v1, %v3886_v11  ;;  %3903 = vadd.xlane.f32.xlu0 %v3902_v0  ;;  %v3899_v6 = vsel %vm294_vm3, %v7893_v10, 0.0  ;;  %v4304_v35 = vpop.permute.xlu1 %4303 }
0x13c5   :  { %3900 = vadd.xlane.f32.xlu1 %v3899_v6 }
0x13c6   :  { %v3897_v3 = vmul.f32 1.442695, %v3890_v12 }
0x13c7   :  { %v3996_v30 = vpop.permute.xlu0 %3995 }
0x13c8   :  { %7894 = vpow2.f32 %v3897_v3  ;;  %7530 = vmatpush3.msra.mxu1 %v3996_v30 }
0x13c9   :  { %7539 = vmatprep.subr.mxu1 %v8022_v36  ;;  %7896 = vpow2.f32 %v3895_v15 }
0x13cb   :  { %v4226_v21 = vpop.permute.xlu0 %4225 }
0x13d2   :  { %v7895_v29 = vpop.eup %7894 }
0x13d3   :  { %v3908_v13 = vsel %vm294_vm3, %v7895_v29, 0.0  ;;  %v7897_v16 = vpop.eup %7896 }
0x13d4   :  { %3909 = vadd.xlane.f32.xlu0 %v3908_v13  ;;  %v3905_v17 = vsel %vm294_vm3, %v7897_v16, 0.0 }
0x13d6   :  { %4301 = vrot.lane.b32.xlu1 %v8486_v42, %s8027_s8 }
0x13ea   :  { %4223 = vrot.lane.b32.xlu0 %v8488_v47, %s8027_s8 }
0x13ee   :  { %4381 = vrot.lane.b32.xlu0 %v8494_v49, %s8026_s7 }
0x13f2   :  { %4379 = vrot.lane.b32.xlu0 %v8494_v49, %s8027_s8 }
0x13fa   :  { %3906 = vadd.xlane.f32.xlu1 %v3905_v17 }
0x140b   :  { %4459 = vrot.lane.b32.xlu1 %v8498_v50, %s8026_s7 }
0x140f   :  { %4457 = vrot.lane.b32.xlu1 %v8498_v50, %s8027_s8 }
0x1451   :  { %v3904_v22 = vpop.xlane.xlu0 %3903 }
0x1452   :  { %7898 = vrcp.f32 %v3904_v22  ;;  %v3901_v34 = vpop.xlane.xlu1 %3900 }
0x1453   :  { %7900 = vrcp.f32 %v3901_v34 }
0x1456   :  { %v4302_v41 = vpop.permute.xlu1 %4301 }
0x145c   :  { %v7899_v26 = vpop.eup %7898 }
0x145d   :  { %v7901_v27 = vpop.eup %7900  ;;  %v3914_v28 = vmul.f32 %v7899_v26, %v7891_v43 }
0x145e   :  { %v3912_v31 = vmul.f32 %v7901_v27, %v7893_v10 }
0x145f   :  { %7532 = vmatmul.mubr.msk.f32.vlgmr.msra.gmra.mrb[52].mxu1 %vm294_vm3, %v3914_v28 }
0x1460   :  { %7540 = vmatpush3.msra.mxu1 %v4148_v19  ;;  %7527 = vmatmul.mubr.msk.f32.vlgmr.msra.gmra.mrb[44].mxu0 %vm294_vm3, %v3912_v31 }
0x1461   :  { %7535 = vmatpush3.msra.mxu0 %v4072_v18  ;;  %v3910_v32 = vpop.xlane.xlu0 %3909  ;;  %7541 = vmatprep.mubr.msk.f32.mxu1 %vm8023_vm2, %v8022_v36 }
0x1462   :  { %7902 = vrcp.f32 %v3910_v32  ;;  %7549 = vmatprep.subr.mxu1 %v8022_v36  ;;  %7536 = vmatprep.mubr.msk.f32.mxu0 %vm8023_vm2, %v8022_v36 }
0x1463   :  { %7544 = vmatprep.subr.mxu0 %v8022_v36 }
0x1465   :  { %v4224_v52 = vpop.permute.xlu0 %4223 }
0x1469   :  { %v4382_v56 = vpop.permute.xlu0 %4381 }
0x146c   :  { %v7903_v33 = vpop.eup %7902 }
0x146d   :  { %v3918_v39 = vmul.f32 %v7903_v33, %v7895_v29  ;;  %v4380_v58 = vpop.permute.xlu0 %4379 }
0x146f   :  { %7542 = vmatmul.mubr.msk.f32.vlgmr.msra.gmra.mrb[54].mxu1 %vm294_vm3, %v3918_v39 }
0x1470   :  { %7550 = vmatpush3.xpose.msk.msra.mxu1 %vm294_vm3, %v4304_v35  ;;  %7551 = vmatprep.mubr.msk.f32.mxu1 %vm8023_vm2, %v8022_v36 }
0x1471   :  { %7559 = vmatprep.subr.mxu1 %v8022_v36 }
0x1473   :  { %7552 = vmatmul.mubr.msk.f32.vlgmr.msra.gmra.mrb[56].mxu1 %vm294_vm3, %v4302_v41 }
0x1474   :  { %7561 = vmatprep.mubr.msk.f32.mxu1 %vm8023_vm2, %v8022_v36 }
0x1487   :  { %v3907_v46 = vpop.xlane.xlu1 %3906 }
0x1488   :  { %7904 = vrcp.f32 %v3907_v46 }
0x148b   :  { %v4460_v20 = vpop.permute.xlu1 %4459 }
0x148c   :  { %7560 = vmatpush3.xpose.msk.msra.mxu1 %vm294_vm3, %v4460_v20 }
0x148d   :  { %7569 = vmatprep.subr.mxu1 %v8022_v36 }
0x148f   :  { %v4458_v48 = vpop.permute.xlu1 %4457 }
0x1490   :  { %7562 = vmatmul.mubr.msk.f32.vlgmr.msra.gmra.mrb[58].mxu1 %vm294_vm3, %v4458_v48 }
0x1491   :  { %7571 = vmatprep.mubr.msk.f32.mxu1 %vm8023_vm2, %v8022_v36 }
0x1492   :  { %v7905_v23 = vpop.eup %7904 }
0x1493   :  { %v3916_v54 = vmul.f32 %v7905_v23, %v7897_v16 }
0x1495   :  { %7537 = vmatmul.mubr.msk.f32.vlgmr.msra.gmra.mrb[46].mxu0 %vm294_vm3, %v3916_v54 }
0x1496   :  { %7545 = vmatpush3.xpose.msk.msra.mxu0 %vm294_vm3, %v4226_v21  ;;  %7546 = vmatprep.mubr.msk.f32.mxu0 %vm8023_vm2, %v8022_v36 }
0x1497   :  { %7554 = vmatprep.subr.mxu0 %v8022_v36 }
0x1499   :  { %7547 = vmatmul.mubr.msk.f32.vlgmr.msra.gmra.mrb[48].mxu0 %vm294_vm3, %v4224_v52 }
0x149a   :  { %7555 = vmatpush3.xpose.msk.msra.mxu0 %vm294_vm3, %v4382_v56  ;;  %7556 = vmatprep.mubr.msk.f32.mxu0 %vm8023_vm2, %v8022_v36 }
0x149b   :  { %7564 = vmatprep.subr.mxu0 %v8022_v36 }
0x149d   :  { %7557 = vmatmul.mubr.msk.f32.vlgmr.msra.gmra.mrb[50].mxu0 %vm294_vm3, %v4380_v58 }
0x149e   :  { %7566 = vmatprep.mubr.msk.f32.mxu0 %vm8023_vm2, %v8022_v36 }
0x1532   :  { %v8594_v59 = vpop.f32.mrb[52].mxu1 }
0x1533   :  { %v8596_v51 = vpop.f32.mrb[44].mxu0  ;;  %v7533_v60 = vpop.f32.mrb[53].mxu1 }
0x1534   :  { %v7528_v61 = vpop.f32.mrb[45].mxu0 }
0x1542   :  { %v8598_v62 = vpop.f32.mrb[54].mxu1 }
0x1543   :  { %v7543_v40 = vpop.f32.mrb[55].mxu1 }
0x1546   :  { %v4375_v53 = vpop.f32.mrb[56].mxu1 }
0x1547   :  { %v7553_v63 = vpop.f32.mrb[57].mxu1  ;;  %v4538_v1 = vsel %vm294_vm3, %v4375_v53, -inf }
0x1548   :  { %4539 = vmax.xlane.f32.xlu1 %v4538_v1 }
0x1559   :  { %4579 = vrot.lane.b32.xlu1 %v8488_v47, %s8028_s9 }
0x155d   :  { %4731 = vrot.lane.b32.xlu1 %v8494_v49, %s8028_s9 }
0x1561   :  { %4807 = vrot.lane.b32.xlu1 %v8498_v50, %s8028_s9 }
0x1563   :  { %v4531_v4 = vpop.f32.mrb[58].mxu1 }
0x1564   :  { %v7563_v5 = vpop.f32.mrb[59].mxu1  ;;  %v4544_v43 = vsel %vm294_vm3, %v4531_v4, -inf }
0x1565   :  { %4963 = vrot.lane.b32.xlu1 %v8486_v42, %s8029_s10 }
0x1568   :  { %v8609_v55 = vpop.f32.mrb[46].mxu0 }
0x1569   :  { %v7538_v7 = vpop.f32.mrb[47].mxu0 }
0x156c   :  { %v4297_v8 = vpop.f32.mrb[48].mxu0 }
0x156d   :  { %v7548_v9 = vpop.f32.mrb[49].mxu0  ;;  %v4535_v44 = vsel %vm294_vm3, %v4297_v8, -inf }
0x156e   :  { %4536 = vmax.xlane.f32.xlu0 %v4535_v44 }
0x1570   :  { %v4453_v45 = vpop.f32.mrb[50].mxu0 }
0x1571   :  { %v7558_v2 = vpop.f32.mrb[51].mxu0  ;;  %v4541_v57 = vsel %vm294_vm3, %v4453_v45, -inf }
0x1572   :  { %4542 = vmax.xlane.f32.xlu0 %v4541_v57 }
0x1576   :  { %4545 = vmax.xlane.f32.xlu0 %v4544_v43 }
0x158c   :  { %4655 = vrot.lane.b32.xlu0 %v8486_v42, %s8028_s9 }
0x1590   :  { %4885 = vrot.lane.b32.xlu0 %v8488_v47, %s8029_s10 }
0x15d5   :  { %v4540_v10 = vpop.xlane.xlu1 %4539 }
0x15d6   :  { %v4548_v11 = vsub.f32 %v4375_v53, %v4540_v10 }
0x15d8   :  { %v4553_v0 = vmul.f32 1.442695, %v4548_v11 }
0x15d9   :  { %v4580_v12 = vpop.permute.xlu1 %4579 }
0x15da   :  { %7906 = vpow2.f32 %v4553_v0  ;;  %7565 = vmatpush3.msra.mxu0 %v4580_v12 }
0x15db   :  { %7574 = vmatprep.subr.mxu0 %v8022_v36 }
0x15dd   :  { %v4732_v33 = vpop.permute.xlu1 %4731 }
0x15e1   :  { %v4808_v46 = vpop.permute.xlu1 %4807 }
0x15e4   :  { %v7907_v6 = vpop.eup %7906 }
0x15e5   :  { %v4562_v3 = vsel %vm294_vm3, %v7907_v6, 0.0  ;;  %v4964_v20 = vpop.permute.xlu1 %4963 }
0x15e6   :  { %4563 = vadd.xlane.f32.xlu0 %v4562_v3 }
0x15fb   :  { %v4537_v30 = vpop.xlane.xlu0 %4536 }
0x15fc   :  { %v4547_v29 = vsub.f32 %v4297_v8, %v4537_v30 }
0x15fe   :  { %v4551_v13 = vmul.f32 1.442695, %v4547_v29 }
0x15ff   :  { %v4543_v14 = vpop.xlane.xlu0 %4542 }
0x1600   :  { %7908 = vpow2.f32 %v4551_v13  ;;  %v4549_v34 = vsub.f32 %v4453_v45, %v4543_v14 }
0x1602   :  { %v4555_v26 = vmul.f32 1.442695, %v4549_v34 }
0x1603   :  { %v4546_v15 = vpop.xlane.xlu0 %4545 }
0x1604   :  { %v4550_v16 = vsub.f32 %v4531_v4, %v4546_v15 }
0x1606   :  { %v4557_v17 = vmul.f32 1.442695, %v4550_v16 }
0x1607   :  { %v4656_v18 = vpop.permute.xlu0 %4655 }
0x1608   :  { %7910 = vpow2.f32 %v4557_v17  ;;  %7570 = vmatpush3.msra.mxu1 %v4656_v18 }
0x1609   :  { %7579 = vmatprep.subr.mxu1 %v8022_v36  ;;  %7912 = vpow2.f32 %v4555_v26 }
0x160a   :  { %v7909_v19 = vpop.eup %7908 }
0x160b   :  { %v4559_v21 = vsel %vm294_vm3, %v7909_v19, 0.0  ;;  %v4886_v31 = vpop.permute.xlu0 %4885 }
0x160c   :  { %4560 = vadd.xlane.f32.xlu1 %v4559_v21 }
0x1612   :  { %v7911_v35 = vpop.eup %7910 }
0x1613   :  { %v4568_v22 = vsel %vm294_vm3, %v7911_v35, 0.0  ;;  %v7913_v27 = vpop.eup %7912 }
0x1614   :  { %4569 = vadd.xlane.f32.xlu0 %v4568_v22  ;;  %v4565_v28 = vsel %vm294_vm3, %v7913_v27, 0.0 }
0x161d   :  { %4961 = vrot.lane.b32.xlu1 %v8486_v42, %s8030_s11 }
0x162a   :  { %4883 = vrot.lane.b32.xlu0 %v8488_v47, %s8030_s11 }
0x162e   :  { %5041 = vrot.lane.b32.xlu0 %v8494_v49, %s8029_s10 }
0x1632   :  { %5039 = vrot.lane.b32.xlu0 %v8494_v49, %s8030_s11 }
0x1636   :  { %5315 = vrot.lane.b32.xlu0 %v8486_v42, %s8031_s12 }
0x1641   :  { %4566 = vadd.xlane.f32.xlu1 %v4565_v28 }
0x1652   :  { %5119 = vrot.lane.b32.xlu1 %v8498_v50, %s8029_s10 }
0x1656   :  { %5117 = vrot.lane.b32.xlu1 %v8498_v50, %s8030_s11 }
0x165a   :  { %5239 = vrot.lane.b32.xlu1 %v8488_v47, %s8031_s12 }
0x165e   :  { %5391 = vrot.lane.b32.xlu1 %v8494_v49, %s8031_s12 }
0x1662   :  { %5467 = vrot.lane.b32.xlu1 %v8498_v50, %s8031_s12 }
0x1673   :  { %v4564_v32 = vpop.xlane.xlu0 %4563 }
0x1674   :  { %7914 = vrcp.f32 %v4564_v32 }
0x167e   :  { %v7915_v39 = vpop.eup %7914 }
0x167f   :  { %v4574_v41 = vmul.f32 %v7915_v39, %v7907_v6 }
0x1681   :  { %7572 = vmatmul.mubr.msk.f32.vlgmr.msra.gmra.mrb[60].mxu1 %vm294_vm3, %v4574_v41 }
0x1682   :  { %7580 = vmatpush3.msra.mxu1 %v4808_v46  ;;  %7581 = vmatprep.mubr.msk.f32.mxu1 %vm8023_vm2, %v8022_v36 }
0x1683   :  { %7589 = vmatprep.subr.mxu1 %v8022_v36 }
0x1699   :  { %v4561_v48 = vpop.xlane.xlu1 %4560 }
0x169a   :  { %7916 = vrcp.f32 %v4561_v48 }
0x169d   :  { %v4962_v60 = vpop.permute.xlu1 %4961 }
0x16a1   :  { %v4570_v52 = vpop.xlane.xlu0 %4569 }
0x16a2   :  { %7918 = vrcp.f32 %v4570_v52 }
0x16a4   :  { %v7917_v23 = vpop.eup %7916 }
0x16a5   :  { %v4572_v54 = vmul.f32 %v7917_v23, %v7909_v19  ;;  %v4884_v61 = vpop.permute.xlu0 %4883 }
0x16a7   :  { %7567 = vmatmul.mubr.msk.f32.vlgmr.msra.gmra.mrb[52].mxu0 %vm294_vm3, %v4572_v54 }
0x16a8   :  { %7575 = vmatpush3.msra.mxu0 %v4732_v33  ;;  %7576 = vmatprep.mubr.msk.f32.mxu0 %vm8023_vm2, %v8022_v36 }
0x16a9   :  { %7584 = vmatprep.subr.mxu0 %v8022_v36  ;;  %v5042_v40 = vpop.permute.xlu0 %5041 }
0x16ac   :  { %v7919_v56 = vpop.eup %7918 }
0x16ad   :  { %v4578_v58 = vmul.f32 %v7919_v56, %v7911_v35  ;;  %v5040_v63 = vpop.permute.xlu0 %5039 }
0x16af   :  { %7582 = vmatmul.mubr.msk.f32.vlgmr.msra.gmra.mrb[62].mxu1 %vm294_vm3, %v4578_v58 }
0x16b0   :  { %7590 = vmatpush3.xpose.msk.msra.mxu1 %vm294_vm3, %v4964_v20  ;;  %7591 = vmatprep.mubr.msk.f32.mxu1 %vm8023_vm2, %v8022_v36 }
0x16b1   :  { %7599 = vmatprep.subr.mxu1 %v8022_v36  ;;  %v5316_v5 = vpop.permute.xlu0 %5315 }
0x16b3   :  { %7592 = vmatmul.mubr.msk.f32.vlgmr.msra.gmra.mrb[64].mxu1 %vm294_vm3, %v4962_v60 }
0x16b4   :  { %7601 = vmatprep.mubr.msk.f32.mxu1 %vm8023_vm2, %v8022_v36 }
0x16ce   :  { %v4567_v53 = vpop.xlane.xlu1 %4566 }
0x16cf   :  { %7920 = vrcp.f32 %v4567_v53 }
0x16d2   :  { %v5120_v1 = vpop.permute.xlu1 %5119 }
0x16d3   :  { %7600 = vmatpush3.xpose.msk.msra.mxu1 %vm294_vm3, %v5120_v1 }
0x16d4   :  { %7609 = vmatprep.subr.mxu1 %v8022_v36 }
0x16d6   :  { %v5118_v4 = vpop.permute.xlu1 %5117 }
0x16d7   :  { %7602 = vmatmul.mubr.msk.f32.vlgmr.msra.gmra.mrb[66].mxu1 %vm294_vm3, %v5118_v4 }
0x16d8   :  { %7610 = vmatpush3.msra.mxu1 %v5316_v5  ;;  %7611 = vmatprep.mubr.msk.f32.mxu1 %vm8023_vm2, %v8022_v36 }
0x16d9   :  { %v7921_v7 = vpop.eup %7920  ;;  %7619 = vmatprep.subr.mxu1 %v8022_v36 }
0x16da   :  { %v4576_v8 = vmul.f32 %v7921_v7, %v7913_v27  ;;  %v5240_v9 = vpop.permute.xlu1 %5239 }
0x16dc   :  { %7577 = vmatmul.mubr.msk.f32.vlgmr.msra.gmra.mrb[54].mxu0 %vm294_vm3, %v4576_v8 }
0x16dd   :  { %7585 = vmatpush3.xpose.msk.msra.mxu0 %vm294_vm3, %v4886_v31  ;;  %7586 = vmatprep.mubr.msk.f32.mxu0 %vm8023_vm2, %v8022_v36 }
0x16de   :  { %7594 = vmatprep.subr.mxu0 %v8022_v36  ;;  %v5392_v21 = vpop.permute.xlu1 %5391 }
0x16e0   :  { %7587 = vmatmul.mubr.msk.f32.vlgmr.msra.gmra.mrb[56].mxu0 %vm294_vm3, %v4884_v61 }
0x16e1   :  { %7595 = vmatpush3.xpose.msk.msra.mxu0 %vm294_vm3, %v5042_v40  ;;  %7596 = vmatprep.mubr.msk.f32.mxu0 %vm8023_vm2, %v8022_v36 }
0x16e2   :  { %7604 = vmatprep.subr.mxu0 %v8022_v36  ;;  %v5468_v35 = vpop.permute.xlu1 %5467 }
0x16e4   :  { %7597 = vmatmul.mubr.msk.f32.vlgmr.msra.gmra.mrb[58].mxu0 %vm294_vm3, %v5040_v63 }
0x16e5   :  { %7605 = vmatpush3.msra.mxu0 %v5240_v9  ;;  %7606 = vmatprep.mubr.msk.f32.mxu0 %vm8023_vm2, %v8022_v36 }
0x16e6   :  { %7614 = vmatprep.subr.mxu0 %v8022_v36 }
0x1754   :  { %v8680_v44 = vpop.f32.mrb[60].mxu1 }
0x1755   :  { %v7573_v45 = vpop.f32.mrb[61].mxu1 }
0x177a   :  { %v8682_v2 = vpop.f32.mrb[52].mxu0 }
0x177b   :  { %v7568_v57 = vpop.f32.mrb[53].mxu0 }
0x1782   :  { %v8684_v43 = vpop.f32.mrb[62].mxu1 }
0x1783   :  { %v7583_v10 = vpop.f32.mrb[63].mxu1 }
0x1786   :  { %v5035_v11 = vpop.f32.mrb[64].mxu1 }
0x1787   :  { %v7593_v0 = vpop.f32.mrb[65].mxu1  ;;  %v5198_v12 = vsel %vm294_vm3, %v5035_v11, -inf }
0x1788   :  { %5199 = vmax.xlane.f32.xlu1 %v5198_v12 }
0x1799   :  { %5623 = vrot.lane.b32.xlu1 %v8486_v42, %s8032_s13 }
0x179d   :  { %5621 = vrot.lane.b32.xlu1 %v8486_v42, %s8033_s14 }
0x17aa   :  { %v5191_v6 = vpop.f32.mrb[66].mxu1 }
0x17ab   :  { %v7603_v3 = vpop.f32.mrb[67].mxu1  ;;  %v5204_v18 = vsel %vm294_vm3, %v5191_v6, -inf }
0x17af   :  { %v8691_v30 = vpop.f32.mrb[54].mxu0 }
0x17b0   :  { %v7578_v29 = vpop.f32.mrb[55].mxu0 }
0x17b3   :  { %v4957_v13 = vpop.f32.mrb[56].mxu0 }
0x17b4   :  { %v7588_v14 = vpop.f32.mrb[57].mxu0  ;;  %v5195_v15 = vsel %vm294_vm3, %v4957_v13, -inf }
0x17b5   :  { %5196 = vmax.xlane.f32.xlu0 %v5195_v15 }
0x17b7   :  { %v5113_v16 = vpop.f32.mrb[58].mxu0 }
0x17b8   :  { %v7598_v17 = vpop.f32.mrb[59].mxu0  ;;  %v5201_v19 = vsel %vm294_vm3, %v5113_v16, -inf }
0x17b9   :  { %5205 = vmax.xlane.f32.xlu0 %v5204_v18 }
0x17bd   :  { %5202 = vmax.xlane.f32.xlu0 %v5201_v19 }
0x17d3   :  { %5545 = vrot.lane.b32.xlu0 %v8488_v47, %s8032_s13 }
0x1815   :  { %v5200_v22 = vpop.xlane.xlu1 %5199 }
0x1816   :  { %v5208_v34 = vsub.f32 %v5035_v11, %v5200_v22 }
0x1818   :  { %v5213_v26 = vmul.f32 1.442695, %v5208_v34 }
0x1819   :  { %v5624_v4 = vpop.permute.xlu1 %5623 }
0x181a   :  { %7922 = vpow2.f32 %v5213_v26 }
0x181d   :  { %v5622_v5 = vpop.permute.xlu1 %5621 }
0x1824   :  { %v7923_v27 = vpop.eup %7922 }
0x1825   :  { %v5222_v28 = vsel %vm294_vm3, %v7923_v27, 0.0 }
0x1826   :  { %5223 = vadd.xlane.f32.xlu0 %v5222_v28 }
0x183c   :  { %5543 = vrot.lane.b32.xlu0 %v8488_v47, %s8033_s14 }
0x1842   :  { %v5197_v31 = vpop.xlane.xlu0 %5196 }
0x1843   :  { %v5207_v32 = vsub.f32 %v4957_v13, %v5197_v31 }
0x1845   :  { %v5211_v33 = vmul.f32 1.442695, %v5207_v32 }
0x1846   :  { %v5206_v39 = vpop.xlane.xlu0 %5205 }
0x1847   :  { %7924 = vpow2.f32 %v5211_v33  ;;  %v5210_v41 = vsub.f32 %v5191_v6, %v5206_v39 }
0x1849   :  { %v5217_v46 = vmul.f32 1.442695, %v5210_v41 }
0x184a   :  { %v5203_v54 = vpop.xlane.xlu0 %5202 }
0x184b   :  { %7926 = vpow2.f32 %v5217_v46  ;;  %v5209_v56 = vsub.f32 %v5113_v16, %v5203_v54 }
0x184d   :  { %v5215_v58 = vmul.f32 1.442695, %v5209_v56 }
0x184e   :  { %v5546_v40 = vpop.permute.xlu0 %5545 }
0x184f   :  { %7928 = vpow2.f32 %v5215_v58 }
0x1851   :  { %v7925_v20 = vpop.eup %7924 }
0x1852   :  { %v5219_v48 = vsel %vm294_vm3, %v7925_v20, 0.0 }
0x1853   :  { %5220 = vadd.xlane.f32.xlu1 %v5219_v48 }
0x1855   :  { %v7927_v52 = vpop.eup %7926 }
0x1856   :  { %v5228_v23 = vsel %vm294_vm3, %v7927_v52, 0.0 }
0x1859   :  { %v7929_v60 = vpop.eup %7928 }
0x185a   :  { %v5225_v61 = vsel %vm294_vm3, %v7929_v60, 0.0 }
0x185b   :  { %5229 = vadd.xlane.f32.xlu0 %v5228_v23 }
0x1864   :  { %5779 = vrot.lane.b32.xlu1 %v8498_v50, %s8032_s13 }
0x1871   :  { %5701 = vrot.lane.b32.xlu0 %v8494_v49, %s8032_s13 }
0x1875   :  { %5699 = vrot.lane.b32.xlu0 %v8494_v49, %s8033_s14 }
0x1888   :  { %5226 = vadd.xlane.f32.xlu1 %v5225_v61 }
0x1899   :  { %5777 = vrot.lane.b32.xlu1 %v8498_v50, %s8033_s14 }
0x18b3   :  { %v5224_v53 = vpop.xlane.xlu0 %5223 }
0x18b4   :  { %7930 = vrcp.f32 %v5224_v53 }
0x18b7   :  { %v5544_v8 = vpop.permute.xlu0 %5543 }
0x18be   :  { %v7931_v63 = vpop.eup %7930 }
0x18bf   :  { %v5234_v1 = vmul.f32 %v7931_v63, %v7923_v27 }
0x18c1   :  { %7612 = vmatmul.mubr.msk.f32.vlgmr.msra.gmra.mrb[68].mxu1 %vm294_vm3, %v5234_v1 }
0x18c2   :  { %7620 = vmatpush3.msra.mxu1 %v5468_v35  ;;  %7621 = vmatprep.mubr.msk.f32.mxu1 %vm8023_vm2, %v8022_v36 }
0x18c3   :  { %7629 = vmatprep.subr.mxu1 %v8022_v36 }
0x18e0   :  { %v5221_v7 = vpop.xlane.xlu1 %5220 }
0x18e1   :  { %7932 = vrcp.f32 %v5221_v7 }
0x18e4   :  { %v5780_v0 = vpop.permute.xlu1 %5779 }
0x18e8   :  { %v5230_v9 = vpop.xlane.xlu0 %5229 }
0x18e9   :  { %7934 = vrcp.f32 %v5230_v9 }
0x18eb   :  { %v7933_v45 = vpop.eup %7932 }
0x18ec   :  { %v5232_v57 = vmul.f32 %v7933_v45, %v7925_v20  ;;  %v5702_v13 = vpop.permute.xlu0 %5701 }
0x18ee   :  { %7607 = vmatmul.mubr.msk.f32.vlgmr.msra.gmra.mrb[60].mxu0 %vm294_vm3, %v5232_v57 }
0x18ef   :  { %7615 = vmatpush3.msra.mxu0 %v5392_v21  ;;  %7616 = vmatprep.mubr.msk.f32.mxu0 %vm8023_vm2, %v8022_v36 }
0x18f0   :  { %7624 = vmatprep.subr.mxu0 %v8022_v36  ;;  %v5700_v14 = vpop.permute.xlu0 %5699 }
0x18f3   :  { %v7935_v10 = vpop.eup %7934 }
0x18f4   :  { %v5238_v11 = vmul.f32 %v7935_v10, %v7927_v52 }
0x18f6   :  { %7622 = vmatmul.mubr.msk.f32.vlgmr.msra.gmra.mrb[70].mxu1 %vm294_vm3, %v5238_v11 }
0x18f7   :  { %7630 = vmatpush3.xpose.msk.msra.mxu1 %vm294_vm3, %v5624_v4  ;;  %7631 = vmatprep.mubr.msk.f32.mxu1 %vm8023_vm2, %v8022_v36 }
0x18f8   :  { %7639 = vmatprep.subr.mxu1 %v8022_v36 }
0x18fa   :  { %7632 = vmatmul.mubr.msk.f32.vlgmr.msra.gmra.mrb[72].mxu1 %vm294_vm3, %v5622_v5 }
0x18fb   :  { %7640 = vmatpush3.xpose.msk.msra.mxu1 %vm294_vm3, %v5780_v0  ;;  %7641 = vmatprep.mubr.msk.f32.mxu1 %vm8023_vm2, %v8022_v36 }
0x18fc   :  { %7649 = vmatprep.subr.mxu1 %v8022_v36 }
0x1915   :  { %v5227_v12 = vpop.xlane.xlu1 %5226 }
0x1916   :  { %7936 = vrcp.f32 %v5227_v12 }
0x1919   :  { %v5778_v6 = vpop.permute.xlu1 %5777 }
0x191a   :  { %7642 = vmatmul.mubr.msk.f32.vlgmr.msra.gmra.mrb[74].mxu1 %vm294_vm3, %v5778_v6 }
0x191b   :  { %7651 = vmatprep.mubr.msk.f32.mxu1 %vm8023_vm2, %v8022_v36 }
0x1920   :  { %v7937_v3 = vpop.eup %7936 }
0x1921   :  { %v5236_v29 = vmul.f32 %v7937_v3, %v7929_v60 }
0x1923   :  { %7617 = vmatmul.mubr.msk.f32.vlgmr.msra.gmra.mrb[62].mxu0 %vm294_vm3, %v5236_v29 }
0x1924   :  { %7625 = vmatpush3.xpose.msk.msra.mxu0 %vm294_vm3, %v5546_v40  ;;  %7626 = vmatprep.mubr.msk.f32.mxu0 %vm8023_vm2, %v8022_v36 }
0x1925   :  { %7634 = vmatprep.subr.mxu0 %v8022_v36 }
0x1927   :  { %7627 = vmatmul.mubr.msk.f32.vlgmr.msra.gmra.mrb[64].mxu0 %vm294_vm3, %v5544_v8 }
0x1928   :  { %7635 = vmatpush3.xpose.msk.msra.mxu0 %vm294_vm3, %v5702_v13  ;;  %7636 = vmatprep.mubr.msk.f32.mxu0 %vm8023_vm2, %v8022_v36 }
0x1929   :  { %7644 = vmatprep.subr.mxu0 %v8022_v36 }
0x192b   :  { %7637 = vmatmul.mubr.msk.f32.vlgmr.msra.gmra.mrb[66].mxu0 %vm294_vm3, %v5700_v14 }
0x192c   :  { %7646 = vmatprep.mubr.msk.f32.mxu0 %vm8023_vm2, %v8022_v36 }
0x1994   :  { %v8746_v15 = vpop.f32.mrb[68].mxu1 }
0x1995   :  { %v7613_v16 = vpop.f32.mrb[69].mxu1 }
0x1996   :  { %v3446_v16 = vld [vmem:[#allocation4 + $0xe0] sm:$0xff] }
0x19c1   :  { %v5311_v17 = vpop.f32.mrb[60].mxu0 }
0x19c2   :  { %v7608_v18 = vpop.f32.mrb[61].mxu0 }
0x19c3   :  { %v3448_v18 = vld [vmem:[#allocation4 + $0xf0] sm:$0xff] }
0x19c9   :  { %v5539_v19 = vpop.f32.mrb[70].mxu1 }
0x19ca   :  { %v7623_v21 = vpop.f32.mrb[71].mxu1 }
0x19cb   :  { %v3449_v21 = vld [vmem:[#allocation4 + $0xf8] sm:$0xff] }
0x19cd   :  { %v5695_v35 = vpop.f32.mrb[72].mxu1 }
0x19ce   :  { %v7633_v22 = vpop.f32.mrb[73].mxu1  ;;  %v5858_v34 = vsel %vm294_vm3, %v5695_v35, -inf }
0x19cf   :  { %5859 = vmax.xlane.f32.xlu1 %v5858_v34 }
0x19e0   :  { %5899 = vrot.lane.b32.xlu1 %v8488_v47, %s8034_s15 }
0x19ed   :  { %v5851_v26 = vpop.f32.mrb[74].mxu1 }
0x19ee   :  { %v7643_v27 = vpop.f32.mrb[75].mxu1  ;;  %v5864_v48 = vsel %vm294_vm3, %v5851_v26, -inf }
0x19f6   :  { %v5463_v28 = vpop.f32.mrb[62].mxu0 }
0x19f7   :  { %v7618_v31 = vpop.f32.mrb[63].mxu0 }
0x19fa   :  { %v5617_v32 = vpop.f32.mrb[64].mxu0 }
0x19fb   :  { %v7628_v33 = vpop.f32.mrb[65].mxu0  ;;  %v5855_v39 = vsel %vm294_vm3, %v5617_v32, -inf }
0x19fc   :  { %5856 = vmax.xlane.f32.xlu0 %v5855_v39 }
0x19fe   :  { %v5773_v41 = vpop.f32.mrb[66].mxu0 }
0x19ff   :  { %v7638_v46 = vpop.f32.mrb[67].mxu0  ;;  %v5861_v20 = vsel %vm294_vm3, %v5773_v41, -inf }
0x1a00   :  { %5862 = vmax.xlane.f32.xlu0 %v5861_v20 }
0x1a04   :  { %5865 = vmax.xlane.f32.xlu0 %v5864_v48 }
0x1a5c   :  { %v5860_v52 = vpop.xlane.xlu1 %5859 }
0x1a5d   :  { %v5868_v23 = vsub.f32 %v5695_v35, %v5860_v52  ;;  %v7766_v35 = vpack.c.bf16 %v3449_v21, %v3448_v18 }
0x1a5f   :  { %v5873_v47 = vmul.f32 1.442695, %v5868_v23 }
0x1a60   :  { %v5900_v54 = vpop.permute.xlu1 %5899 }
0x1a61   :  { %7938 = vpow2.f32 %v5873_v47  ;;  %7645 = vmatpush3.msra.mxu0 %v5900_v54 }
0x1a62   :  { %7654 = vmatprep.subr.mxu0 %v8022_v36 }
0x1a6b   :  { %v7939_v56 = vpop.eup %7938 }
0x1a6c   :  { %v5882_v58 = vsel %vm294_vm3, %v7939_v56, 0.0 }
0x1a6d   :  { %5883 = vadd.xlane.f32.xlu0 %v5882_v58 }
0x1a89   :  { %v5857_v60 = vpop.xlane.xlu0 %5856 }
0x1a8a   :  { %v5867_v61 = vsub.f32 %v5617_v32, %v5857_v60 }
0x1a8c   :  { %v5871_v40 = vmul.f32 1.442695, %v5867_v61 }
0x1a8d   :  { %v5863_v53 = vpop.xlane.xlu0 %5862 }
0x1a8e   :  { %7940 = vpow2.f32 %v5871_v40  ;;  %v5869_v45 = vsub.f32 %v5773_v41, %v5863_v53 }
0x1a90   :  { %v5875_v57 = vmul.f32 1.442695, %v5869_v45  ;;  %v7027_v45 = vld [vmem:[#allocation4 + $0x14d] ss:$0 sm:$0xff] }
0x1a91   :  { %v5866_v63 = vpop.xlane.xlu0 %5865 }
0x1a92   :  { %v5870_v1 = vsub.f32 %v5851_v26, %v5866_v63 }
0x1a94   :  { %v5877_v4 = vmul.f32 1.442695, %v5870_v1 }
0x1a96   :  { %7942 = vpow2.f32 %v5877_v4 }
0x1a97   :  { %7944 = vpow2.f32 %v5875_v57 }
0x1a98   :  { %v7941_v5 = vpop.eup %7940 }
0x1a99   :  { %v5879_v7 = vsel %vm294_vm3, %v7941_v5, 0.0 }
0x1a9a   :  { %5880 = vadd.xlane.f32.xlu1 %v5879_v7 }
0x1aa0   :  { %v7943_v8 = vpop.eup %7942 }
0x1aa1   :  { %v5888_v9 = vsel %vm294_vm3, %v7943_v8, 0.0  ;;  %v7945_v10 = vpop.eup %7944 }
0x1aa2   :  { %5889 = vadd.xlane.f32.xlu0 %v5888_v9  ;;  %v5885_v11 = vsel %vm294_vm3, %v7945_v10, 0.0 }
0x1aab   :  { %6051 = vrot.lane.b32.xlu1 %v8494_v49, %s8034_s15 }
0x1ab8   :  { %5975 = vrot.lane.b32.xlu0 %v8486_v42, %s8034_s15 }
0x1abc   :  { %6207 = vrot.lane.b32.xlu0 %v8682_v2, %s8020_s20 }
0x1ac0   :  { %6223 = vrot.lane.b32.xlu0 %v5311_v17, %s8035_s16  ;;  %v3447_v17 = vld [vmem:[#allocation4 + $0xe8] sm:$0xff] }
0x1ac4   :  { %6211 = vrot.lane.b32.xlu0 %v8691_v30, %s8020_s20 }
0x1ac8   :  { %6227 = vrot.lane.b32.xlu0 %v5463_v28, %s8035_s16 }
0x1acf   :  { %5886 = vadd.xlane.f32.xlu1 %v5885_v11 }
0x1ae0   :  { %6127 = vrot.lane.b32.xlu1 %v8498_v50, %s8034_s15 }
0x1ae4   :  { %6209 = vrot.lane.b32.xlu1 %v8680_v44, %s8020_s20 }
0x1ae8   :  { %6225 = vrot.lane.b32.xlu1 %v8746_v15, %s8035_s16 }
0x1aec   :  { %6213 = vrot.lane.b32.xlu1 %v8684_v43, %s8020_s20 }
0x1af0   :  { %6229 = vrot.lane.b32.xlu1 %v5539_v19, %s8035_s16  ;;  %v7762_v19 = vpack.c.bf16 %v3447_v17, %v3446_v16 }
0x1afa   :  { %v5884_v42 = vpop.xlane.xlu0 %5883 }
0x1afb   :  { %7946 = vrcp.f32 %v5884_v42 }
0x1b05   :  { %v7947_v30 = vpop.eup %7946 }
0x1b06   :  { %v5894_v12 = vmul.f32 %v7947_v30, %v7939_v56 }
0x1b27   :  { %v5881_v49 = vpop.xlane.xlu1 %5880 }
0x1b28   :  { %7948 = vrcp.f32 %v5881_v49 }
0x1b2b   :  { %v6052_v44 = vpop.permute.xlu1 %6051 }
0x1b2f   :  { %v5890_v2 = vpop.xlane.xlu0 %5889 }
0x1b30   :  { %7950 = vrcp.f32 %v5890_v2 }
0x1b32   :  { %v7949_v0 = vpop.eup %7948 }
0x1b33   :  { %v5892_v50 = vmul.f32 %v7949_v0, %v7941_v5  ;;  %v5976_v6 = vpop.permute.xlu0 %5975 }
0x1b34   :  { %7650 = vmatpush3.msra.mxu1 %v5976_v6 }
0x1b35   :  { %7647 = vmatmul.mubr.msk.f32.vlgmr.msra.gmra.mrb[68].mxu0 %vm294_vm3, %v5892_v50  ;;  %7652 = vmatmul.mubr.msk.f32.vlgmr.msra.gmra.mrb[76].mxu1 %vm294_vm3, %v5894_v12 }
0x1b36   :  { %7655 = vmatpush3.msra.mxu0 %v6052_v44  ;;  %7659 = vmatprep.subr.mxu1 %v8022_v36 }
0x1b37   :  { %7661 = vmatprep.mubr.msk.f32.mxu1 %vm8023_vm2, %v8022_v36  ;;  %7656 = vmatprep.mubr.msk.f32.mxu0 %vm8023_vm2, %v8022_v36  ;;  %v6208_v39 = vpop.permute.xlu0 %6207 }
0x1b38   :  { %7763 = vmatprep.subr.bf16.mxu0 %v7762_v19  ;;  %v6251_v54 = vsel %vm294_vm3, %v8596_v51, %v6208_v39 }
0x1b3a   :  { %v7951_v3 = vpop.eup %7950 }
0x1b3b   :  { %v5898_v29 = vmul.f32 %v7951_v3, %v7943_v8  ;;  %v6224_v46 = vpop.permute.xlu0 %6223 }
0x1b3c   :  { %v6255_v58 = vsel %vm2980_vm4, %v6251_v54, %v6224_v46 }
0x1b3f   :  { %v6212_v48 = vpop.permute.xlu0 %6211 }
0x1b40   :  { %v6253_v51 = vsel %vm294_vm3, %v8609_v55, %v6212_v48  ;;  %v3454_v48 = vld [vmem:[#allocation4 + $0x120] sm:$0xff] }
0x1b43   :  { %v6228_v23 = vpop.permute.xlu0 %6227 }
0x1b5c   :  { %v5887_v43 = vpop.xlane.xlu1 %5886 }
0x1b5d   :  { %7952 = vrcp.f32 %v5887_v43 }
0x1b60   :  { %v6128_v13 = vpop.permute.xlu1 %6127 }
0x1b61   :  { %7660 = vmatpush3.msra.mxu1 %v6128_v13 }
0x1b62   :  { %7662 = vmatmul.mubr.msk.f32.vlgmr.msra.gmra.mrb[78].mxu1 %vm294_vm3, %v5898_v29 }
0x1b64   :  { %v6210_v41 = vpop.permute.xlu1 %6209 }
0x1b65   :  { %v6252_v56 = vsel %vm294_vm3, %v8594_v59, %v6210_v41  ;;  %v6257_v59 = vsel %vm2980_vm4, %v6253_v51, %v6228_v23 }
0x1b67   :  { %v7953_v14 = vpop.eup %7952 }
0x1b68   :  { %v5896_v15 = vmul.f32 %v7953_v14, %v7945_v10  ;;  %v6226_v20 = vpop.permute.xlu1 %6225 }
0x1b69   :  { %v6256_v60 = vsel %vm2980_vm4, %v6252_v56, %v6226_v20 }
0x1b6a   :  { %7657 = vmatmul.mubr.msk.f32.vlgmr.msra.gmra.mrb[70].mxu0 %vm294_vm3, %v5896_v15 }
0x1b6b   :  { %7765 = vmatpush3.bf16.msra.mxu0 %v7762_v19  ;;  %v3451_v19 = vld [vmem:[#allocation4 + $0x108] sm:$0xff] }
0x1b6c   :  { %7767 = vmatprep.subr.bf16.mxu0 %v7766_v35  ;;  %v6214_v52 = vpop.permute.xlu1 %6213 }
0x1b6d   :  { %v6254_v4 = vsel %vm294_vm3, %v8598_v62, %v6214_v52  ;;  %v3455_v52 = vld [vmem:[#allocation4 + $0x128] sm:$0xff] }
0x1b6e   :  { %v7778_v23 = vpack.c.bf16 %v3455_v52, %v3454_v48 }
0x1b6f   :  { %7769 = vmatpush3.bf16.msra.mxu0 %v7766_v35  ;;  %v3452_v35 = vld [vmem:[#allocation4 + $0x110] sm:$0xff] }
0x1b70   :  { %v6230_v47 = vpop.permute.xlu1 %6229  ;;  %7779 = vmatprep.subr.bf16.mxu0 %v7778_v23 }
0x1b71   :  { %v6258_v7 = vsel %vm2980_vm4, %v6254_v4, %v6230_v47 }
0x1c08   :  { %v5971_v22 = vpop.f32.mrb[68].mxu0  ;;  %v6047_v34 = vpop.f32.mrb[76].mxu1 }
0x1c09   :  { %v7648_v26 = vpop.f32.mrb[69].mxu0  ;;  %6239 = vrot.lane.b32.xlu0 %v5971_v22, %s8036_s17  ;;  %6241 = vrot.lane.b32.xlu1 %v6047_v34, %s8036_s17  ;;  %v7653_v27 = vpop.f32.mrb[77].mxu1  ;;  %v3453_v22 = vld [vmem:[#allocation4 + $0x118] sm:$0xff] }
0x1c0a   :  { %v7774_v34 = vpack.c.bf16 %v3453_v22, %v3452_v35 }
0x1c35   :  { %v6199_v28 = vpop.f32.mrb[78].mxu1 }
0x1c36   :  { %6245 = vrot.lane.b32.xlu1 %v6199_v28, %s8036_s17  ;;  %v7663_v31 = vpop.f32.mrb[79].mxu1 }
0x1c3d   :  { %v6123_v32 = vpop.f32.mrb[70].mxu0 }
0x1c3e   :  { %v7658_v33 = vpop.f32.mrb[71].mxu0  ;;  %6243 = vrot.lane.b32.xlu0 %v6123_v32, %s8036_s17 }
0x1c7b   :  { %v6242_v61 = vpop.permute.xlu1 %6241  ;;  %v6240_v40 = vpop.permute.xlu0 %6239 }
0x1c7c   :  { %v6260_v53 = vsel %vm2985_vm5, %v6256_v60, %v6242_v61  ;;  %v6259_v63 = vsel %vm2985_vm5, %v6255_v58, %v6240_v40 }
0x1c7d   :  { %7672 = vmatprep.mubr.msk.f32.mxu0 %vm193_vm1, %v6259_v63 }
0x1c7e   :  { %7673 = vmatmul.mubr.msk.f32.vlgmr.msra.gmra.mrb[72].mxu0 %vm193_vm1, %v6260_v53  ;;  %v7032_v53 = vld [vmem:[#allocation4 + $0x150] ss:$0 sm:$0xff] }
0x1c7f   :  { %7781 = vmatpush3.bf16.msra.mxu0 %v7778_v23 }
0x1ca8   :  { %v6246_v1 = vpop.permute.xlu1 %6245 }
0x1ca9   :  { %v6262_v9 = vsel %vm2985_vm5, %v6258_v7, %v6246_v1 }
0x1cb0   :  { %v6244_v5 = vpop.permute.xlu0 %6243 }
0x1cb1   :  { %v6261_v8 = vsel %vm2985_vm5, %v6257_v59, %v6244_v5  ;;  %v7033_v59 = vld [vmem:[#allocation4 + $0x151] ss:$0 sm:$0xff] }
0x1cb2   :  { %7675 = vmatprep.mubr.msk.f32.mxu0 %vm193_vm1, %v6261_v8 }
0x1cb3   :  { %7676 = vmatmul.mubr.msk.f32.gmra.mrb[74].mxu0 %vm193_vm1, %v6262_v9 }
0x1d51   :  { %v7674_v57 = vpop.f32.mrb[72].mxu0 }
0x1d52   :  { %v6351_v55 = vadd.f32 %v7674_v57, %v7027_v45  ;;  %v6345_v10 = vpop.f32.mrb[73].mxu0 }
0x1d53   :  { %v6346_v11 = vadd.f32 %v7027_v45, %v6345_v10 }
0x1d54   :  { %v6365_v42 = vadd.f32 %v6351_v55, %v8470_v25 }
0x1d55   :  { %v6364_v62 = vadd.f32 %v6346_v11, %v8468_v24 }
0x1d56   :  { %v6371_v49 = vsel %vm193_vm1, %v6365_v42, 0.0 }
0x1d57   :  { %6372 = vadd.xlane.f32.xlu1 %v6371_v49  ;;  %v6368_v2 = vsel %vm193_vm1, %v6364_v62, 0.0 }
0x1d58   :  { %6369 = vadd.xlane.f32.xlu0 %v6368_v2 }
0x1d86   :  { %v7677_v30 = vpop.f32.mrb[74].mxu0 }
0x1d87   :  { %v6355_v0 = vpop.f32.mrb[75].mxu0  ;;  %v6361_v12 = vadd.f32 %v7677_v30, %v7027_v45 }
0x1d88   :  { %v6356_v50 = vadd.f32 %v7027_v45, %v6355_v0 }
0x1d89   :  { %v6367_v44 = vadd.f32 %v6361_v12, %v8478_v38  ;;  %v3450_v38 = vld [vmem:[#allocation4 + $0x100] sm:$0xff] }
0x1d8a   :  { %v6366_v6 = vadd.f32 %v6356_v50, %v8476_v37  ;;  %v7770_v21 = vpack.c.bf16 %v3451_v19, %v3450_v38 }
0x1d8b   :  { %v6377_v25 = vsel %vm193_vm1, %v6367_v44, 0.0 }
0x1d8c   :  { %v6374_v43 = vsel %vm193_vm1, %v6366_v6, 0.0  ;;  %7771 = vmatprep.subr.bf16.mxu1 %v7770_v21 }
0x1d8d   :  { %6375 = vadd.xlane.f32.xlu0 %v6374_v43  ;;  %7773 = vmatpush3.bf16.msra.mxu1 %v7770_v21  ;;  %v7039_v21 = vld [vmem:[#allocation4 + $0x14f] ss:$0 sm:$0xff] }
0x1d8e   :  { %7775 = vmatprep.subr.bf16.mxu1 %v7774_v34 }
0x1d91   :  { %6378 = vadd.xlane.f32.xlu0 %v6377_v25  ;;  %7777 = vmatpush3.bf16.msra.mxu1 %v7774_v34  ;;  %v7034_v25 = vld [vmem:[#allocation4 + $0x14e] ss:$0 sm:$0xff] }
0x1de4   :  { %v6373_v24 = vpop.xlane.xlu1 %6372 }
0x1de5   :  { %v6381_v3 = vmul.f32 0.03125, %v6373_v24  ;;  %v6370_v29 = vpop.xlane.xlu0 %6369 }
0x1de6   :  { %v6380_v13 = vmul.f32 0.03125, %v6370_v29 }
0x1de7   :  { %v6385_v14 = vsub.f32 %v6365_v42, %v6381_v3 }
0x1de8   :  { %v6384_v15 = vsub.f32 %v6364_v62, %v6380_v13 }
0x1de9   :  { %v6389_v16 = vmul.f32 %v6385_v14, %v6385_v14 }
0x1dea   :  { %v6388_v17 = vmul.f32 %v6384_v15, %v6384_v15 }
0x1deb   :  { %v6395_v18 = vsel %vm193_vm1, %v6389_v16, 0.0 }
0x1dec   :  { %6396 = vadd.xlane.f32.xlu0 %v6395_v18  ;;  %v6392_v37 = vsel %vm193_vm1, %v6388_v17, 0.0 }
0x1ded   :  { %6393 = vadd.xlane.f32.xlu1 %v6392_v37 }
0x1e1a   :  { %v6376_v26 = vpop.xlane.xlu0 %6375 }
0x1e1b   :  { %v6382_v27 = vmul.f32 0.03125, %v6376_v26 }
0x1e1d   :  { %v6386_v28 = vsub.f32 %v6366_v6, %v6382_v27  ;;  %v3456_v6 = vld [vmem:[#allocation4 + $0x130] sm:$0xff] }
0x1e1e   :  { %v6379_v31 = vpop.xlane.xlu0 %6378 }
0x1e1f   :  { %v6383_v32 = vmul.f32 0.03125, %v6379_v31  ;;  %v6390_v33 = vmul.f32 %v6386_v28, %v6386_v28 }
0x1e21   :  { %v6387_v39 = vsub.f32 %v6367_v44, %v6383_v32  ;;  %v6398_v41 = vsel %vm193_vm1, %v6390_v33, 0.0  ;;  %v3457_v44 = vld [vmem:[#allocation4 + $0x138] sm:$0xff] }
0x1e22   :  { %6399 = vadd.xlane.f32.xlu1 %v6398_v41  ;;  %v7782_v43 = vpack.c.bf16 %v3457_v44, %v3456_v6  ;;  %v7045_v44 = vld [vmem:[#allocation4 + $0x153] ss:$0 sm:$0xff] }
0x1e23   :  { %v6391_v46 = vmul.f32 %v6387_v39, %v6387_v39 }
0x1e24   :  { %7783 = vmatprep.subr.bf16.mxu0 %v7782_v43 }
0x1e25   :  { %v6401_v20 = vsel %vm193_vm1, %v6391_v46, 0.0  ;;  %7785 = vmatpush3.bf16.msra.mxu0 %v7782_v43 }
0x1e26   :  { %6402 = vadd.xlane.f32.xlu0 %v6401_v20 }
0x1e79   :  { %v6397_v47 = vpop.xlane.xlu0 %6396 }
0x1e7a   :  { %v6405_v54 = vmul.f32 0.03125, %v6397_v47  ;;  %v6394_v56 = vpop.xlane.xlu1 %6393 }
0x1e7b   :  { %v6404_v58 = vmul.f32 0.03125, %v6394_v56 }
0x1e7c   :  { %v6409_v60 = vadd.f32 1e-05, %v6405_v54 }
0x1e7d   :  { %v6408_v61 = vadd.f32 1e-05, %v6404_v58 }
0x1e7e   :  { %7954 = vrsqrt.f32 %v6409_v60 }
0x1e7f   :  { %7956 = vrsqrt.f32 %v6408_v61 }
0x1e88   :  { %v7955_v40 = vpop.eup %7954 }
0x1e89   :  { %v7957_v63 = vpop.eup %7956  ;;  %v6417_v51 = vmul.f32 %v7955_v40, %v6385_v14 }
0x1e8a   :  { %v6416_v1 = vmul.f32 %v7957_v63, %v6384_v15 }
0x1e8b   :  { %v6425_v4 = vmul.f32 %v7032_v53, %v6417_v51 }
0x1e8c   :  { %v6424_v5 = vmul.f32 %v7032_v53, %v6416_v1 }
0x1e8d   :  { %v6433_v8 = vadd.f32 %v7033_v59, %v6425_v4 }
0x1e8e   :  { %v6432_v7 = vadd.f32 %v7033_v59, %v6424_v5 }
0x1e90   :  { %7686 = vmatprep.mubr.msk.f32.mxu1 %vm193_vm1, %v6432_v7 }
0x1e91   :  { %7687 = vmatmul.mubr.msk.f32.vlgmr.msra.gmra.mrb[80].mxu1 %vm193_vm1, %v6433_v8 }
0x1eaf   :  { %v6400_v9 = vpop.xlane.xlu1 %6399 }
0x1eb0   :  { %v6406_v45 = vmul.f32 0.03125, %v6400_v9 }
0x1eb2   :  { %v6410_v57 = vadd.f32 1e-05, %v6406_v45 }
0x1eb3   :  { %v6403_v55 = vpop.xlane.xlu0 %6402 }
0x1eb4   :  { %7958 = vrsqrt.f32 %v6410_v57  ;;  %v6407_v10 = vmul.f32 0.03125, %v6403_v55 }
0x1eb6   :  { %v6411_v11 = vadd.f32 1e-05, %v6407_v10  ;;  %v46_v10 = vld [vmem:[#allocation4 + $0x143] sm:$0x1] }
0x1eb7   :  { %7786 = vpush %v46_v10 }
0x1eb8   :  { %7960 = vrsqrt.f32 %v6411_v11 }
0x1ebe   :  { %v7959_v42 = vpop.eup %7958 }
0x1ebf   :  { %v6418_v62 = vmul.f32 %v7959_v42, %v6386_v28 }
0x1ec1   :  { %v6426_v49 = vmul.f32 %v7032_v53, %v6418_v62 }
0x1ec2   :  { %v7961_v2 = vpop.eup %7960 }
0x1ec3   :  { %v6434_v30 = vadd.f32 %v7033_v59, %v6426_v49  ;;  %v6419_v0 = vmul.f32 %v7961_v2, %v6387_v39 }
0x1ec5   :  { %7689 = vmatprep.mubr.msk.f32.mxu1 %vm193_vm1, %v6434_v30  ;;  %v6427_v12 = vmul.f32 %v7032_v53, %v6419_v0 }
0x1ec7   :  { %v6435_v50 = vadd.f32 %v7033_v59, %v6427_v12  ;;  %v7044_v12 = vld [vmem:[#allocation4 + $0x152] ss:$0 sm:$0xff] }
0x1ec9   :  { %7690 = vmatmul.mubr.msk.f32.gmra.mrb[82].mxu1 %vm193_vm1, %v6435_v50 }
0x1ee8   :  { %s7787_s18 = spop %7786 }
0x1f64   :  { %v7688_v24 = vpop.f32.mrb[80].mxu1 }
0x1f65   :  { %v6524_v3 = vadd.f32 %v7688_v24, %v7034_v25  ;;  %v6518_v29 = vpop.f32.mrb[81].mxu1  ;;  %v7046_v24 = vld [vmem:[#allocation4 + $0x142] ss:$0 sm:$0xff] }
0x1f66   :  { %v6519_v13 = vadd.f32 %v7034_v25, %v6518_v29 }
0x1f67   :  { %v6538_v15 = vmax.f32 %v6524_v3, 0.0 }
0x1f68   :  { %v6537_v14 = vmax.f32 %v6519_v13, 0.0 }
0x1f6a   :  { %7700 = vmatprep.mubr.msk.f32.mxu0 %vm193_vm1, %v6537_v14 }
0x1f6b   :  { %7701 = vmatmul.mubr.msk.f32.vlgmr.msra.gmra.mrb[76].mxu0 %vm193_vm1, %v6538_v15 }
0x1f9c   :  { %v7691_v16 = vpop.f32.mrb[82].mxu1 }
0x1f9d   :  { %v6534_v17 = vadd.f32 %v7691_v16, %v7034_v25  ;;  %v6528_v18 = vpop.f32.mrb[83].mxu1 }
0x1f9e   :  { %v6529_v37 = vadd.f32 %v7034_v25, %v6528_v18 }
0x1f9f   :  { %v6540_v19 = vmax.f32 %v6534_v17, 0.0 }
0x1fa0   :  { %v6539_v38 = vmax.f32 %v6529_v37, 0.0 }
0x1fa2   :  { %7703 = vmatprep.mubr.msk.f32.mxu0 %vm193_vm1, %v6539_v38 }
0x1fa3   :  { %7704 = vmatmul.mubr.msk.f32.gmra.mrb[78].mxu0 %vm193_vm1, %v6540_v19 }
0x203e   :  { %v7702_v35 = vpop.f32.mrb[76].mxu0 }
0x203f   :  { %v6629_v22 = vadd.f32 %v7702_v35, %v7039_v21  ;;  %v6623_v34 = vpop.f32.mrb[77].mxu0 }
0x2040   :  { %v6624_v26 = vadd.f32 %v7039_v21, %v6623_v34 }
0x2041   :  { %v6643_v27 = vadd.f32 %v6629_v22, %v6433_v8 }
0x2042   :  { %v6642_v28 = vadd.f32 %v6624_v26, %v6432_v7 }
0x2043   :  { %v6649_v31 = vsel %vm193_vm1, %v6643_v27, 0.0 }
0x2044   :  { %6650 = vadd.xlane.f32.xlu0 %v6649_v31  ;;  %v6646_v32 = vsel %vm193_vm1, %v6642_v28, 0.0 }
0x2045   :  { %6647 = vadd.xlane.f32.xlu1 %v6646_v32 }
0x2076   :  { %v7705_v33 = vpop.f32.mrb[78].mxu0 }
0x2077   :  { %v6639_v39 = vadd.f32 %v7705_v33, %v7039_v21  ;;  %v6633_v41 = vpop.f32.mrb[79].mxu0 }
0x2078   :  { %v6634_v46 = vadd.f32 %v7039_v21, %v6633_v41 }
0x2079   :  { %v6645_v20 = vadd.f32 %v6639_v39, %v6435_v50 }
0x207a   :  { %v6644_v48 = vadd.f32 %v6634_v46, %v6434_v30 }
0x207b   :  { %v6655_v52 = vsel %vm193_vm1, %v6645_v20, 0.0 }
0x207c   :  { %6656 = vadd.xlane.f32.xlu0 %v6655_v52  ;;  %v6652_v23 = vsel %vm193_vm1, %v6644_v48, 0.0 }
0x207d   :  { %6653 = vadd.xlane.f32.xlu1 %v6652_v23 }
0x20d1   :  { %v6651_v47 = vpop.xlane.xlu0 %6650 }
0x20d2   :  { %v6659_v54 = vmul.f32 0.03125, %v6651_v47  ;;  %v6648_v56 = vpop.xlane.xlu1 %6647  ;;  %v6736_v47 = vstv %s7787_s18 }
0x20d3   :  { %v6658_v58 = vmul.f32 0.03125, %v6648_v56 }
0x20d4   :  { %v6663_v60 = vsub.f32 %v6643_v27, %v6659_v54 }
0x20d5   :  { %v6662_v61 = vsub.f32 %v6642_v28, %v6658_v58 }
0x20d6   :  { %v6667_v40 = vmul.f32 %v6663_v60, %v6663_v60 }
0x20d7   :  { %v6666_v53 = vmul.f32 %v6662_v61, %v6662_v61 }
0x20d8   :  { %v6673_v63 = vsel %vm193_vm1, %v6667_v40, 0.0 }
0x20d9   :  { %6674 = vadd.xlane.f32.xlu0 %v6673_v63  ;;  %v6670_v51 = vsel %vm193_vm1, %v6666_v53, 0.0 }
0x20da   :  { %6671 = vadd.xlane.f32.xlu1 %v6670_v51 }
0x2109   :  { %v6657_v1 = vpop.xlane.xlu0 %6656 }
0x210a   :  { %v6661_v59 = vmul.f32 0.03125, %v6657_v1  ;;  %v6654_v4 = vpop.xlane.xlu1 %6653 }
0x210b   :  { %v6660_v5 = vmul.f32 0.03125, %v6654_v4 }
0x210c   :  { %v6665_v7 = vsub.f32 %v6645_v20, %v6661_v59 }
0x210d   :  { %v6664_v8 = vsub.f32 %v6644_v48, %v6660_v5  ;;  %v6746_v48 = vlaneseq }
0x210e   :  { %v6669_v9 = vmul.f32 %v6665_v7, %v6665_v7 }
0x210f   :  { %v6668_v45 = vmul.f32 %v6664_v8, %v6664_v8  ;;  %v8843_v52 = vand.u32 127, %v6746_v48  ;;  %v6749_v23 = vshrl.u32 %v6746_v48, 7 }
0x2110   :  { %v6679_v57 = vsel %vm193_vm1, %v6669_v9, 0.0 }
0x2111   :  { %6680 = vadd.xlane.f32.xlu0 %v6679_v57  ;;  %v6676_v55 = vsel %vm193_vm1, %v6668_v45, 0.0  ;;  %v6750_v58 = vsub.s32 %v8843_v52, %v6749_v23  ;;  %v8037_v57 = vmov 0   ;;  %v6782_v10 = vsub.s32 1, %v6749_v23 }
0x2112   :  { %6677 = vadd.xlane.f32.xlu1 %v6676_v55  ;;  %7809 = vset.pattern.permute.xlu0 %v8037_v57  ;;  %v6778_v55 = vsub.s32 0, %v6749_v23 }
0x2113   :  { %7808 = vset.pattern.permute.xlu1 %v8037_v57 }
0x2166   :  { %v6675_v11 = vpop.xlane.xlu0 %6674 }
0x2167   :  { %v6683_v42 = vmul.f32 0.03125, %v6675_v11  ;;  %v6672_v62 = vpop.xlane.xlu1 %6671  ;;  %v6786_v11 = vsub.s32 2, %v6749_v23 }
0x2168   :  { %v6682_v49 = vmul.f32 0.03125, %v6672_v62  ;;  %v6790_v62 = vsub.s32 3, %v6749_v23 }
0x2169   :  { %v6687_v2 = vadd.f32 1e-05, %v6683_v42 }
0x216a   :  { %v6686_v30 = vadd.f32 1e-05, %v6682_v49 }
0x216b   :  { %7962 = vrsqrt.f32 %v6687_v2 }
0x216c   :  { %7964 = vrsqrt.f32 %v6686_v30 }
0x2175   :  { %v7963_v0 = vpop.eup %7962 }
0x2176   :  { %v7965_v50 = vpop.eup %7964  ;;  %v6695_v6 = vmul.f32 %v7963_v0, %v6663_v60 }
0x2177   :  { %v6694_v43 = vmul.f32 %v7965_v50, %v6662_v61 }
0x2178   :  { %v6703_v25 = vmul.f32 %v7044_v12, %v6695_v6 }
0x2179   :  { %v6702_v3 = vmul.f32 %v7044_v12, %v6694_v43 }
0x217a   :  { %v6711_v29 = vadd.f32 %v7045_v44, %v6703_v25 }
0x217b   :  { %v6710_v13 = vadd.f32 %v7045_v44, %v6702_v3 }
0x217c   :  { %v6719_v14 = vmul.f32 %v7046_v24, %v6711_v29 }
0x217d   :  { %v6718_v15 = vmul.f32 %v7046_v24, %v6710_v13 }
0x217e   :  { %v6725_v16 = vsel %vm193_vm1, %v6719_v14, 0.0 }
0x217f   :  { %6726 = vadd.xlane.f32.xlu0 %v6725_v16  ;;  %v6722_v17 = vsel %vm193_vm1, %v6718_v15, 0.0 }
0x2180   :  { %6723 = vadd.xlane.f32.xlu1 %v6722_v17 }
0x219e   :  { %v6681_v18 = vpop.xlane.xlu0 %6680 }
0x219f   :  { %v6685_v37 = vmul.f32 0.03125, %v6681_v18  ;;  %v6678_v38 = vpop.xlane.xlu1 %6677 }
0x21a0   :  { %v6684_v19 = vmul.f32 0.03125, %v6678_v38 }
0x21a1   :  { %v6689_v21 = vadd.f32 1e-05, %v6685_v37 }
0x21a2   :  { %v6688_v35 = vadd.f32 1e-05, %v6684_v19 }
0x21a3   :  { %7966 = vrsqrt.f32 %v6689_v21 }
0x21a4   :  { %7968 = vrsqrt.f32 %v6688_v35 }
0x21ad   :  { %v7967_v22 = vpop.eup %7966 }
0x21ae   :  { %v7969_v34 = vpop.eup %7968  ;;  %v6697_v26 = vmul.f32 %v7967_v22, %v6665_v7 }
0x21af   :  { %v6696_v27 = vmul.f32 %v7969_v34, %v6664_v8 }
0x21b0   :  { %v6705_v28 = vmul.f32 %v7044_v12, %v6697_v26 }
0x21b1   :  { %v6704_v31 = vmul.f32 %v7044_v12, %v6696_v27 }
0x21b2   :  { %v6713_v32 = vadd.f32 %v7045_v44, %v6705_v28 }
0x21b3   :  { %v6712_v33 = vadd.f32 %v7045_v44, %v6704_v31 }
0x21b4   :  { %v6721_v39 = vmul.f32 %v7046_v24, %v6713_v32 }
0x21b5   :  { %v6720_v41 = vmul.f32 %v7046_v24, %v6712_v33 }
0x21b6   :  { %v6731_v46 = vsel %vm193_vm1, %v6721_v39, 0.0 }
0x21b7   :  { %6732 = vadd.xlane.f32.xlu0 %v6731_v46  ;;  %v6728_v20 = vsel %vm193_vm1, %v6720_v41, 0.0 }
0x21b8   :  { %6729 = vadd.xlane.f32.xlu1 %v6728_v20 }
0x21cd   :  { %6801 = vbcast.lane.b32.xlu0 %v8843_v52, 256 }
0x220c   :  { %v6727_v54 = vpop.xlane.xlu0 %6726 }
0x220d   :  { %v6724_v56 = vpop.xlane.xlu1 %6723  ;;  %v6739_v60 = vadd.f32 %v6736_v47, %v6727_v54 }
0x220e   :  { %v6738_v61 = vadd.f32 %v6736_v47, %v6724_v56 }
0x220f   :  { %v6755_v53 = vrot.slane %v6739_v60, %v6750_v58 }
0x2210   :  { %v6751_v63 = vrot.slane %v6738_v61, %v6750_v58 }
0x2212   :  { %v6765_v5 = vsel %vm6764_vm6, %v6755_v53, %v6751_v63 }
0x2244   :  { %v6733_v40 = vpop.xlane.xlu0 %6732 }
0x2245   :  { %v6741_v51 = vadd.f32 %v6736_v47, %v6733_v40  ;;  %v6730_v1 = vpop.xlane.xlu1 %6729 }
0x2246   :  { %v6740_v59 = vadd.f32 %v6736_v47, %v6730_v1 }
0x2247   :  { %v6763_v7 = vrot.slane %v6741_v51, %v6750_v58 }
0x2248   :  { %v6759_v4 = vrot.slane %v6740_v59, %v6750_v58  ;;  %v6802_v0 = vpop.permute.xlu0 %6801 }
0x224a   :  { %v6767_v8 = vsel %vm6766_vm7, %v6759_v4, %v6765_v5 }
0x224b   :  { %v6769_v9 = vsel %vm6768_vm8, %v6763_v7, %v6767_v8 }
0x224c   :  { %v6772_v45 = vsel %vm6771_vm9, %v6769_v9, -inf }
0x224d   :  { %6773 = vmax.xlane.f32.xlu1 %v6772_v45 }
0x22da   :  { %v6774_v42 = vpop.xlane.xlu1 %6773 }
0x22db   :  { %v6779_v49 = vrot.slane %v6774_v42, %v6778_v55  ;;  %v6783_v2 = vrot.slane %v6774_v42, %v6782_v10  ;;  %v6787_v30 = vrot.slane %v6774_v42, %v6786_v11  ;;  %v6791_v6 = vrot.slane %v6774_v42, %v6790_v62 }
0x22dd   :  { %vm6798_vm10 = vcmp.eq.f32.partialorder %v6740_v59, %v6787_v30  ;;  %vm6796_vm11 = vcmp.eq.f32.partialorder %v6738_v61, %v6779_v49  ;;  %vm6797_vm12 = vcmp.eq.f32.partialorder %v6739_v60, %v6783_v2  ;;  %vm6799_vm13 = vcmp.eq.f32.partialorder %v6741_v51, %v6791_v6 }
0x22de   :  { %v6805_v12 = vsel %vm6798_vm10, %v6802_v0, 8  ;;  %v6803_v50 = vsel %vm6796_vm11, %v6802_v0, 8  ;;  %v6804_v44 = vsel %vm6797_vm12, %v6802_v0, 8  ;;  %v6806_v43 = vsel %vm6799_vm13, %v6802_v0, 8 }
0x22df   :  { %6814 = vperm.xlu0 %7809, %v6805_v12   ;;  %6808 = vperm.xlu1 %7808, %v6803_v50  }
0x22e3   :  { %6811 = vperm.xlu1 %7808, %v6804_v44  }
0x22e7   :  { %6817 = vperm.xlu1 %7808, %v6806_v43  }
0x235e   :  { %v6809_v25 = vpop.permute.xlu1 %6808  ;;  %v6815_v3 = vpop.permute.xlu0 %6814 }
0x235f   :  { %v6822_v29 = vrot.slane %v6809_v25, %v6750_v58  ;;  %v6830_v15 = vrot.slane %v6815_v3, %v6750_v58 }
0x2362   :  { %v6812_v24 = vpop.permute.xlu1 %6811 }
0x2363   :  { %v6826_v13 = vrot.slane %v6812_v24, %v6750_v58 }
0x2365   :  { %v6835_v14 = vsel %vm6764_vm6, %v6826_v13, %v6822_v29 }
0x2366   :  { %v6818_v16 = vpop.permute.xlu1 %6817  ;;  %v6836_v18 = vsel %vm6766_vm7, %v6830_v15, %v6835_v14 }
0x2367   :  { %v6834_v17 = vrot.slane %v6818_v16, %v6750_v58 }
0x2369   :  { %v6837_v37 = vsel %vm6768_vm8, %v6834_v17, %v6836_v18 }
0x236a   :  { %v6838_v38 = vsel %vm6771_vm9, %v6837_v37, 2147483647 }
0x236b   :  { %v6840_v19 = vshra.s32 %v6838_v38, 16  ;;  %v6839_v35 = vand.u32 65535, %v6838_v38 }
0x236d   :  { %v6842_v21 = vcvt.s32.f32 %v6840_v19  ;;  %v6841_v34 = vcvt.s32.f32 %v6839_v35 }
0x236f   :  { %6843 = vmin.xlane.f32.xlu1 %v6842_v21 }
0x23fc   :  { %v6844_v22 = vpop.xlane.xlu1 %6843 }
0x23fd   :  { %vm6845_vm14 = vcmp.eq.f32.partialorder %v6842_v21, %v6844_v22  ;;  %v6850_v27 = vcvt.f32.s32 %v6844_v22 }
0x23fe   :  { %v6846_v26 = vsel %vm6845_vm14, %v6841_v34, inf }
0x23ff   :  { %6847 = vmin.xlane.f32.xlu0 %v6846_v26  ;;  %v6851_v31 = vshll.u32 %v6850_v27, 16 }
0x248c   :  { %v6848_v28 = vpop.xlane.xlu0 %6847 }
0x248d   :  { %v6849_v32 = vcvt.f32.s32 %v6848_v28 }
0x248f   :  { %v6852_v33 = vadd.s32 %v6851_v31, %v6849_v32 }
0x2491   :  { %vm6853_vm15 = vcmp.eq.s32.totalorder %v8843_v52, %v6852_v33 }
0x2492   :  { %v7047_v39 = vsel %vm6853_vm15, 1.0, %v8022_v36 }
0x2493   :  { %6856 = vxpose.xlu0.b32.start.end [1/1] (short) (narrow) %v7047_v39, 8 }
0x2513   :  { %v6872_v41 = vpop.trf.xlu0 }
0x2514   :  { %6889 = vst.msk [vmem:[%s8862_s2] sm:$0xff] %vm6888_vm0, %v6872_v41 }
0x2515   :  { %6894 = vsyncpa [#allocation3], 1 }
0x2516   :  { %6895 = vsyncpa [#allocation5], 1 }

</bundles_post_ra>
